<compile_context>
chip_gen: v6e
topology: v6e:2x2x1
jax: 0.10.0
libtpu: 0.0.40
codegen_flags: <defaults>
</compile_context>

<pallas_src>
from functools import partial

import jax
import jax.numpy as jnp
import numpy as np
from jax.experimental import pallas as pl
from jax.experimental.pallas import tpu as pltpu

# ----------------------------- configuration ---------------------------------
BATCH = 2              # minibatch
N_SOURCES = 2          # number of source views
N_RAYS = 8             # rays per batch element ("i" in the torch code)
N_PTS = 8              # points per ray ("p")
N_HARMONIC_XYZ = 4     # -> embedding_dim_xyz = 4*2*3 + 3 = 27
N_HARMONIC_DIR = 2     # -> embedding_dim_dir = 2*2*3 + 3 = 15
D_HIDDEN = 32          # n_hidden_neurons
N_BLOCKS = 5           # n_blocks
D_LATENT = 32          # latent_code_dim
COMBINE_LAYER = 3      # combine_layer ('average' combine type)
DENSITY_NOISE_STD = 0.0

# Grid sizing: 1 step with the whole batch folded into M (best on v5e/v6e, which have a
# single TensorCore).  On v7x (2 TCs/chip) set GRID_STEPS=2 when BATCH >= 2 so both cores
# get one step each; never exceed the core count (extra steps are pure overhead here).
GRID_STEPS = 1

EMB_XYZ = N_HARMONIC_XYZ * 2 * 3 + 3
EMB_DIR = N_HARMONIC_DIR * 2 * 3 + 3
D_IN = EMB_XYZ + EMB_DIR
D_XZ = D_IN + D_LATENT
N_COMB = min(COMBINE_LAYER, N_BLOCKS)
P_TOTAL = N_RAYS * N_PTS
assert COMBINE_LAYER < N_BLOCKS
assert P_TOTAL % 8 == 0
assert BATCH % GRID_STEPS == 0
assert DENSITY_NOISE_STD == 0.0  # TODO(synk): nonzero would need in-kernel PRNG


# ------------------------------- Pallas kernel --------------------------------
def _resnet_kernel(xz_ref, d4_ref,
                   wf_ref, bfu_ref,
                   w0_ref, b0_ref,
                   w1_ref, b1_ref,
                   w_out_ref, b_out_ref,
                   out_ref,
                   z_scr,
                   *, nb, ns, tp, n_blocks, combine_layer, d_hidden):
    """One grid step = `nb` batch elements folded into the M dimension.

    Row layout of xz (and of x before the combine): (batch-major, source-inner)
        rows [(b*ns + s)*tp : (b*ns + s + 1)*tp]  ==  batch b, source s.
    After the 'average' combine, rows [b*tp : (b+1)*tp] == batch b.
    """
    h = d_hidden
    n_comb = min(combine_layer, n_blocks)
    bf16 = jnp.bfloat16

    xz = xz_ref[...]                                    # (nb*ns*tp, D_XZ) bf16

    # Fused lin_in + latent injection: one (M,74)x(74,128) dot, lane-dense N=128 output.
    fused = jnp.dot(xz, wf_ref[...], preferred_element_type=jnp.float32) + bfu_ref[...]
    x = fused[:, :h]                                    # lane-aligned at 0 (free slice)

    # Unpack the per-block injections ONCE into VMEM scratch so the block loop reads
    # lane-aligned tiles (no lane rotates on the residual dependency chain).
    for k in range(n_comb):
        z_scr[k] = fused[:, (k + 1) * h:(k + 2) * h]

    for blk in range(n_blocks):
        if blk == combine_layer:
            # combine_interleaved(..., 'average') over sources, per batch element:
            # static sublane-slice adds only (VPU), no reshape/XLU.
            parts = []
            for b in range(nb):
                acc = x[(b * ns) * tp:(b * ns) * tp + tp]
                for s in range(1, ns):
                    acc = acc + x[(b * ns + s) * tp:(b * ns + s + 1) * tp]
                parts.append(acc)
            x = (parts[0] if nb == 1 else jnp.concatenate(parts, axis=0)) * (1.0 / ns)
        if blk < combine_layer:
            x = x + z_scr[blk]
        net = jnp.dot(jnp.maximum(x, 0.0).astype(bf16), w0_ref[blk],
                      preferred_element_type=jnp.float32) + b0_ref[blk]
        dx = jnp.dot(jnp.maximum(net, 0.0).astype(bf16), w1_ref[blk],
                     preferred_element_type=jnp.float32) + b1_ref[blk]
        x = x + dx                                      # ResnetBlockFC (shortcut = identity)

    # lin_out(relu(x)): w_out columns were permuted on the host so feats = [sigma | r | g | b].
    feats = jnp.dot(jnp.maximum(x, 0.0).astype(bf16), w_out_ref[...],
                    preferred_element_type=jnp.float32) + b_out_ref[...]   # (nb*tp, 4) f32

    # get_densities (relu activation, noise_std=0) + sigmoid(rgb), all full-vreg:
    # deltas come in pre-broadcast to 4 lanes (f32); one iota mask + one select, no slices.
    lane = jax.lax.broadcasted_iota(jnp.int32, feats.shape, 1)
    dens = 1.0 - jnp.exp(-d4_ref[...] * jnp.maximum(feats, 0.0))
    out_ref[...] = jnp.where(lane == 0, dens, jax.nn.sigmoid(feats))       # [d | rgb]


def pack_kernel_params(params):
    """Build the fused lin_in+injection weight, permute w_out so sigma is column 0,
    cast MXU weights to bf16 (biases stay f32)."""
    f32 = jnp.float32
    bf16 = jnp.bfloat16
    w_in = params["w_in"]                       # (D_IN, H)
    d_in, h = w_in.shape
    nc = params["wz"].shape[0]
    d_lat = params["wz"].shape[1]

    wz_cat = jnp.concatenate([params["wz"][k] for k in range(nc)], axis=-1)   # (DL, nc*H)
    bz_cat = jnp.concatenate([params["bz"][k] for k in range(nc)], axis=-1)   # (1, nc*H)

    top = jnp.concatenate([w_in, jnp.zeros((d_in, nc * h), f32)], axis=-1)    # (D_IN, (1+nc)H)
    bot = jnp.concatenate([jnp.zeros((d_lat, h), f32), wz_cat], axis=-1)      # (DL,  (1+nc)H)
    w_fused = jnp.concatenate([top, bot], axis=0)                             # (D_XZ, (1+nc)H)
    b_fused = jnp.concatenate([params["b_in"], bz_cat], axis=-1)              # (1, (1+nc)H)

    # permute output columns: [r,g,b,sigma] -> [sigma,r,g,b] (done once on the host,
    # so the kernel epilogue needs no roll/slice/concat).
    w_out = jnp.concatenate([params["w_out"][:, 3:4], params["w_out"][:, :3]], axis=-1)
    b_out = jnp.concatenate([params["b_out"][:, 3:4], params["b_out"][:, :3]], axis=-1)

    return {
        "w_fused": w_fused.astype(bf16),
        "b_fused": b_fused.astype(f32),
        "w0": params["w0"].astype(bf16),
        "b0": params["b0"].astype(f32),
        "w1": params["w1"].astype(bf16),
        "b1": params["b1"].astype(f32),
        "w_out": w_out.astype(bf16),
        "b_out": b_out.astype(f32),
    }


def run_resnet_pallas(xz, deltas4, kp, *, nb, ns, tp, grid_steps=GRID_STEPS):
    """xz: (nb*ns*tp, D_XZ) bf16 — rows (batch-major, source-inner).
       deltas4: (nb*tp, 4) f32 — per-point deltas broadcast to 4 lanes.
       Returns (nb*tp, 4) f32 packed as [density | rgb]."""
    m_pre_total, d_xz = xz.shape
    m_post_total = deltas4.shape[0]
    assert nb % grid_steps == 0
    bt = nb // grid_steps                      # batch elements per grid step
    m_pre = bt * ns * tp
    m_post = bt * tp
    assert m_pre * grid_steps == m_pre_total and m_post * grid_steps == m_post_total

    h = kp["w0"].shape[-1]
    n_blocks = kp["w0"].shape[0]
    n_comb = kp["w_fused"].shape[-1] // h - 1

    kernel = partial(_resnet_kernel, nb=bt, ns=ns, tp=tp,
                     n_blocks=n_blocks, combine_layer=COMBINE_LAYER, d_hidden=h)

    def full(shape):
        n = len(shape)
        return pl.BlockSpec(shape, lambda g, _n=n: (0,) * _n)   # weights resident

    in_specs = [
        pl.BlockSpec((m_pre, d_xz), lambda g: (g, 0)),           # xz
        pl.BlockSpec((m_post, 4), lambda g: (g, 0)),             # deltas (f32, lane-bcast)
        full(kp["w_fused"].shape),
        full(kp["b_fused"].shape),
        full(kp["w0"].shape),
        full(kp["b0"].shape),
        full(kp["w1"].shape),
        full(kp["b1"].shape),
        full(kp["w_out"].shape),
        full(kp["b_out"].shape),
    ]
    out_specs = pl.BlockSpec((m_post, 4), lambda g: (g, 0))
    out_shape = jax.ShapeDtypeStruct((m_post_total, 4), jnp.float32)

    return pl.pallas_call(
        kernel,
        out_shape=out_shape,
        grid=(grid_steps,),
        in_specs=in_specs,
        out_specs=out_specs,
        scratch_shapes=[pltpu.VMEM((n_comb, m_pre, h), jnp.float32)],
        compiler_params=pltpu.CompilerParams(
            dimension_semantics=("parallel",)),                  # megacore sharding on v7x
    )(xz, deltas4,
      kp["w_fused"], kp["b_fused"],
      kp["w0"], kp["b0"], kp["w1"], kp["b1"], kp["w_out"], kp["b_out"])


# ------------------------------- JAX glue -------------------------------------
def harmonic_embedding(x, n_harmonic):
    # pytorch3d HarmonicEmbedding with logspace freqs, omega_0=1, append_input=True
    freqs = 2.0 ** jnp.arange(n_harmonic, dtype=x.dtype)
    embed = (x[..., None] * freqs).reshape(*x.shape[:-1], -1)
    return jnp.concatenate([jnp.sin(embed), jnp.cos(embed), x], axis=-1)


def safe_denom(w, eps):
    sign = jnp.sign(w) + (w == 0.0).astype(w.dtype)
    return sign * jnp.maximum(jnp.abs(w), eps)


def pixel_nerf_forward(origins, directions, lengths, cam, params, enc_params):
    B, I, P = lengths.shape
    NS = cam["R"].shape[0]

    # ray_bundle_to_ray_points
    pts_world = origins[..., None, :] + directions[..., None, :] * lengths[..., :, None]  # (B,I,P,3)

    # repeat_first_dim(..., n_repeats=n_sources): batch-major, source-inner
    pts_world = jnp.repeat(pts_world, NS, axis=0)            # (B*NS, I, P, 3)
    dirs_world = jnp.repeat(directions, NS, axis=0)          # (B*NS, I, 3)
    b_n = B * NS

    # per-(batch,source) cameras (source index = idx % NS)
    R = jnp.tile(cam["R"], (B, 1, 1))                        # (b_n, 3, 3)
    T = jnp.tile(cam["T"], (B, 1))                           # (b_n, 3)
    F = jnp.tile(cam["focal"], (B, 1))                       # (b_n, 2)
    PP = jnp.tile(cam["pp"], (B, 1))                         # (b_n, 2)

    eps = 1e-8
    pts_flat = pts_world.reshape(b_n, I * P, 3)
    # world-to-view (pytorch3d row-vector convention): p_view = p @ R + T
    pts_view = jnp.einsum("bnk,bkj->bnj", pts_flat, R) + T[:, None, :]
    # perspective projection (SfM calibration), then uv = -xy_ndc
    zv = safe_denom(pts_view[..., 2:3], eps)
    xy_proj = (pts_view[..., :2] * F[:, None, :]) / zv + PP[:, None, :]
    uv = (-1.0 * xy_proj).reshape(b_n, I, P, 2)

    # TODO(synk): PixelEncoder conv backbone + bilinear feature sampling not available;
    # deterministic linear stand-in uv -> latent_code_dim.
    latent_code = jnp.tanh(uv @ enc_params["w"] + enc_params["b"])        # (b_n,I,P,DL)

    pts_view = pts_view.reshape(b_n, I, P, 3)
    dirs_view = jnp.einsum("bik,bkj->bij", dirs_world, R)                 # R-only transform

    embeds_xyz = harmonic_embedding(pts_view, N_HARMONIC_XYZ)             # (b_n,I,P,27)
    dirs_n = dirs_view / jnp.maximum(
        jnp.linalg.norm(dirs_view, axis=-1, keepdims=True), 1e-12)
    embeds_dir = harmonic_embedding(dirs_n, N_HARMONIC_DIR)               # (b_n,I,15)
    embeds_dir = jnp.broadcast_to(embeds_dir[:, :, None, :], (b_n, I, P, EMB_DIR))
    xyz_dir = jnp.concatenate([embeds_xyz, embeds_dir], axis=-1)          # (b_n,I,P,D_IN)

    # deltas for get_densities (per original minibatch) — kept in f32 all the way
    deltas = jnp.concatenate(
        [lengths[..., 1:] - lengths[..., :-1],
         jnp.full_like(lengths[..., :1], 1e10)], axis=-1)[..., None]      # (B,I,P,1)

    # --- pack kernel inputs (wrapper-side layout plumbing; no in-kernel reshapes) ---
    PT = I * P
    xz = jnp.concatenate([xyz_dir, latent_code], axis=-1)                 # (B*NS,I,P,D_XZ)
    xz_k = xz.reshape(B * NS * PT, D_XZ).astype(jnp.bfloat16)             # batch-major, src-inner
    d4_k = jnp.broadcast_to(deltas.reshape(B * PT, 1), (B * PT, 4)).astype(jnp.float32)

    kp = pack_kernel_params(params)
    out = run_resnet_pallas(xz_k, d4_k, kp, nb=B, ns=NS, tp=PT)           # (B*PT, 4)
    out = out.reshape(B, I, P, 4)
    dens = out[..., :1]
    cols = out[..., 1:]
    return dens, cols, (xz_k, d4_k, kp)


# -------------------------- pure-JAX reference --------------------------------
def resnet_ref(xz, deltas4, kp, *, nb, ns, tp):
    """Mirrors the kernel math (same bf16 dot inputs, f32 accumulation) in plain JAX."""
    pf, bf16 = jnp.float32, jnp.bfloat16
    h = kp["w0"].shape[-1]

    fused = jnp.dot(xz, kp["w_fused"], preferred_element_type=pf) + kp["b_fused"]
    x = fused[:, :h]
    z_inj = fused[:, h:]

    for blk in range(N_BLOCKS):
        if blk == COMBINE_LAYER:
            x = x.reshape(nb, ns, tp, h).mean(axis=1).reshape(nb * tp, h)
        if blk < COMBINE_LAYER:
            x = x + z_inj[:, blk * h:(blk + 1) * h]
        net = jnp.dot(jnp.maximum(x, 0.0).astype(bf16), kp["w0"][blk],
                      preferred_element_type=pf) + kp["b0"][blk]
        dx = jnp.dot(jnp.maximum(net, 0.0).astype(bf16), kp["w1"][blk],
                     preferred_element_type=pf) + kp["b1"][blk]
        x = x + dx

    feats = jnp.dot(jnp.maximum(x, 0.0).astype(bf16), kp["w_out"],
                    preferred_element_type=pf) + kp["b_out"]               # [sigma|r|g|b]
    sigma, rgb = feats[:, :1], feats[:, 1:]
    dens = 1.0 - jnp.exp(-deltas4[:, :1] * jnp.maximum(sigma, 0.0))
    return dens, jax.nn.sigmoid(rgb)


# ------------------------------------ main -------------------------------------
def make_params(key):
    ks = jax.random.split(key, 12)

    def lin(k, din, dout):
        return (jax.random.normal(k, (din, dout), jnp.float32) / np.sqrt(din)).astype(jnp.float32)

    p = {
        "w_in": lin(ks[0], D_IN, D_HIDDEN),
        "b_in": 0.01 * jax.random.normal(ks[1], (1, D_HIDDEN), jnp.float32),
        "wz": jnp.stack([lin(k, D_LATENT, D_HIDDEN) for k in jax.random.split(ks[2], N_COMB)]),
        "bz": 0.01 * jax.random.normal(ks[3], (N_COMB, 1, D_HIDDEN), jnp.float32),
        "w0": jnp.stack([lin(k, D_HIDDEN, D_HIDDEN) for k in jax.random.split(ks[4], N_BLOCKS)]),
        "b0": 0.01 * jax.random.normal(ks[5], (N_BLOCKS, 1, D_HIDDEN), jnp.float32),
        "w1": jnp.stack([lin(k, D_HIDDEN, D_HIDDEN) for k in jax.random.split(ks[6], N_BLOCKS)]),
        "b1": 0.01 * jax.random.normal(ks[7], (N_BLOCKS, 1, D_HIDDEN), jnp.float32),
        "w_out": lin(ks[8], D_HIDDEN, 4),
        "b_out": 0.01 * jax.random.normal(ks[9], (1, 4), jnp.float32),
    }
    enc = {
        "w": jax.random.normal(ks[10], (2, D_LATENT), jnp.float32) * 0.5,
        "b": 0.01 * jax.random.normal(ks[11], (D_LATENT,), jnp.float32),
    }
    return p, enc


def rot_z(theta):
    c, s = np.cos(theta), np.sin(theta)
    return np.array([[c, -s, 0.0], [s, c, 0.0], [0.0, 0.0, 1.0]], dtype=np.float32)


if __name__ == "__main__":
    key = jax.random.PRNGKey(0)
    k_o, k_d, k_l, k_p = jax.random.split(key, 4)

    origins = 0.1 * jax.random.normal(k_o, (BATCH, N_RAYS, 3), jnp.float32)
    directions = jax.random.normal(k_d, (BATCH, N_RAYS, 3), jnp.float32)
    base = 1.0 + jnp.linspace(0.0, 1.0, N_PTS, dtype=jnp.float32)
    lengths = base[None, None, :] + 0.02 * jax.random.uniform(k_l, (BATCH, N_RAYS, N_PTS))

    cam = {
        "R": jnp.asarray(np.stack([rot_z(0.2 * (s + 1)) for s in range(N_SOURCES)])),
        "T": jnp.asarray(np.stack([[0.1 * s, -0.05 * s, 3.0 + 0.2 * s]
                                   for s in range(N_SOURCES)], dtype=np.float32)),
        "focal": jnp.full((N_SOURCES, 2), 1.5, jnp.float32),
        "pp": jnp.full((N_SOURCES, 2), 0.05, jnp.float32),
    }

    params, enc_params = make_params(k_p)

    dens, cols, (xz_k, d4_k, kp) = pixel_nerf_forward(
        origins, directions, lengths, cam, params, enc_params)
    jax.block_until_ready((dens, cols))

    # correctness check against a pure-JAX reference of the kernel's math (same bf16 MXU
    # inputs, same f32 deltas) — the bf16 activation cast is the only deviation from the
    # f32 torch model and is a deliberate MXU-precision choice.
    dens_ref, cols_ref = resnet_ref(xz_k, d4_k, kp, nb=BATCH, ns=N_SOURCES, tp=P_TOTAL)
    dens_ref = dens_ref.reshape(BATCH, N_RAYS, N_PTS, 1)
    cols_ref = cols_ref.reshape(BATCH, N_RAYS, N_PTS, 3)
    assert dens.shape == (BATCH, N_RAYS, N_PTS, 1)
    assert cols.shape == (BATCH, N_RAYS, N_PTS, 3)
    np.testing.assert_allclose(np.asarray(dens), np.asarray(dens_ref), atol=1e-2, rtol=1e-2)
    np.testing.assert_allclose(np.asarray(cols), np.asarray(cols_ref), atol=1e-2, rtol=1e-2)

    print("KERNEL_OK")
</pallas_src>

<mosaic_0001>
module attributes {stable_mosaic.version = 11 : i64} {
  func.func @_resnet_kernel(%arg0: i32, %arg1: memref<256x74xbf16, #tpu.memory_space<vmem>>, %arg2: memref<128x4xf32, #tpu.memory_space<vmem>>, %arg3: memref<74x128xbf16, #tpu.memory_space<vmem>>, %arg4: memref<1x128xf32, #tpu.memory_space<vmem>>, %arg5: memref<5x32x32xbf16, #tpu.memory_space<vmem>>, %arg6: memref<5x1x32xf32, #tpu.memory_space<vmem>>, %arg7: memref<5x32x32xbf16, #tpu.memory_space<vmem>>, %arg8: memref<5x1x32xf32, #tpu.memory_space<vmem>>, %arg9: memref<32x4xbf16, #tpu.memory_space<vmem>>, %arg10: memref<1x4xf32, #tpu.memory_space<vmem>>, %arg11: memref<128x4xf32, #tpu.memory_space<vmem>>, %arg12: memref<3x256x32xf32, #tpu.memory_space<vmem>>) attributes {dimension_semantics = [#tpu.dimension_semantics<parallel>], iteration_bounds = array<i64: 1>, scalar_prefetch = 0 : i64, scratch_operands = 1 : i64, tpu.core_type = #tpu.core_type<tc>, window_params = [{transform_indices = @transform_0, window_bounds = array<i64: 256, 74>}, {transform_indices = @transform_1, window_bounds = array<i64: 128, 4>}, {pipeline_mode = #tpu.pipeline_mode<synchronous>, transform_indices = @transform_2, window_bounds = array<i64: 74, 128>}, {pipeline_mode = #tpu.pipeline_mode<synchronous>, transform_indices = @transform_3, window_bounds = array<i64: 1, 128>}, {pipeline_mode = #tpu.pipeline_mode<synchronous>, transform_indices = @transform_4, window_bounds = array<i64: 5, 32, 32>}, {pipeline_mode = #tpu.pipeline_mode<synchronous>, transform_indices = @transform_5, window_bounds = array<i64: 5, 1, 32>}, {pipeline_mode = #tpu.pipeline_mode<synchronous>, transform_indices = @transform_6, window_bounds = array<i64: 5, 32, 32>}, {pipeline_mode = #tpu.pipeline_mode<synchronous>, transform_indices = @transform_7, window_bounds = array<i64: 5, 1, 32>}, {pipeline_mode = #tpu.pipeline_mode<synchronous>, transform_indices = @transform_8, window_bounds = array<i64: 32, 4>}, {pipeline_mode = #tpu.pipeline_mode<synchronous>, transform_indices = @transform_9, window_bounds = array<i64: 1, 4>}, {transform_indices = @transform_10, window_bounds = array<i64: 128, 4>}]} {
    %c0 = arith.constant 0 : index
    %c0_0 = arith.constant 0 : index
    %0 = vector.load %arg1[%c0, %c0_0] : memref<256x74xbf16, #tpu.memory_space<vmem>>, vector<256x74xbf16>
    %c0_1 = arith.constant 0 : index
    %c0_2 = arith.constant 0 : index
    %1 = vector.load %arg3[%c0_1, %c0_2] : memref<74x128xbf16, #tpu.memory_space<vmem>>, vector<74x128xbf16>
    %cst = arith.constant dense<0.000000e+00> : vector<256x128xf32>
    %2 = tpu.matmul %0, %1, %cst {dimension_numbers = #tpu.dot_dimension_numbers<[1], [0], [0], [1], [0, 0, 1, 1], [], []>} : vector<256x74xbf16>, vector<74x128xbf16>, vector<256x128xf32> -> vector<256x128xf32>
    %c0_3 = arith.constant 0 : index
    %c0_4 = arith.constant 0 : index
    %3 = vector.load %arg4[%c0_3, %c0_4] : memref<1x128xf32, #tpu.memory_space<vmem>>, vector<1x128xf32>
    %4 = vector.broadcast %3 : vector<1x128xf32> to vector<256x128xf32>
    %5 = arith.addf %2, %4 : vector<256x128xf32>
    %6 = vector.extract_strided_slice %5 {offsets = [0, 0], sizes = [256, 32], strides = [1, 1]} : vector<256x128xf32> to vector<256x32xf32>
    %7 = vector.extract_strided_slice %5 {offsets = [0, 32], sizes = [256, 32], strides = [1, 1]} : vector<256x128xf32> to vector<256x32xf32>
    %c0_5 = arith.constant 0 : index
    %c0_6 = arith.constant 0 : index
    %c0_7 = arith.constant 0 : index
    %8 = vector.load %arg12[%c0_5, %c0_6, %c0_7] : memref<3x256x32xf32, #tpu.memory_space<vmem>>, vector<1x256x32xf32>
    %9 = vector.shape_cast %8 : vector<1x256x32xf32> to vector<256x32xf32>
    %10 = vector.shape_cast %7 : vector<256x32xf32> to vector<1x256x32xf32>
    tpu.vector_store %arg12[%c0_5, %c0_6, %c0_7], %10 {strides = array<i32>} : memref<3x256x32xf32, #tpu.memory_space<vmem>>, vector<1x256x32xf32>,
    %11 = vector.extract_strided_slice %5 {offsets = [0, 64], sizes = [256, 32], strides = [1, 1]} : vector<256x128xf32> to vector<256x32xf32>
    %c1 = arith.constant 1 : index
    %c0_8 = arith.constant 0 : index
    %c0_9 = arith.constant 0 : index
    %12 = vector.load %arg12[%c1, %c0_8, %c0_9] : memref<3x256x32xf32, #tpu.memory_space<vmem>>, vector<1x256x32xf32>
    %13 = vector.shape_cast %12 : vector<1x256x32xf32> to vector<256x32xf32>
    %14 = vector.shape_cast %11 : vector<256x32xf32> to vector<1x256x32xf32>
    tpu.vector_store %arg12[%c1, %c0_8, %c0_9], %14 {strides = array<i32>} : memref<3x256x32xf32, #tpu.memory_space<vmem>>, vector<1x256x32xf32>,
    %15 = vector.extract_strided_slice %5 {offsets = [0, 96], sizes = [256, 32], strides = [1, 1]} : vector<256x128xf32> to vector<256x32xf32>
    %c2 = arith.constant 2 : index
    %c0_10 = arith.constant 0 : index
    %c0_11 = arith.constant 0 : index
    %16 = vector.load %arg12[%c2, %c0_10, %c0_11] : memref<3x256x32xf32, #tpu.memory_space<vmem>>, vector<1x256x32xf32>
    %17 = vector.shape_cast %16 : vector<1x256x32xf32> to vector<256x32xf32>
    %18 = vector.shape_cast %15 : vector<256x32xf32> to vector<1x256x32xf32>
    tpu.vector_store %arg12[%c2, %c0_10, %c0_11], %18 {strides = array<i32>} : memref<3x256x32xf32, #tpu.memory_space<vmem>>, vector<1x256x32xf32>,
    %c0_12 = arith.constant 0 : index
    %c0_13 = arith.constant 0 : index
    %c0_14 = arith.constant 0 : index
    %19 = vector.load %arg12[%c0_12, %c0_13, %c0_14] : memref<3x256x32xf32, #tpu.memory_space<vmem>>, vector<1x256x32xf32>
    %20 = vector.shape_cast %19 : vector<1x256x32xf32> to vector<256x32xf32>
    %21 = arith.addf %6, %20 : vector<256x32xf32>
    %cst_15 = arith.constant 0.000000e+00 : f32
    %22 = vector.broadcast %cst_15 : f32 to vector<256x32xf32>
    %23 = arith.maximumf %21, %22 : vector<256x32xf32>
    %24 = arith.truncf %23 : vector<256x32xf32> to vector<256x32xbf16>
    %c0_16 = arith.constant 0 : index
    %c0_17 = arith.constant 0 : index
    %c0_18 = arith.constant 0 : index
    %25 = vector.load %arg5[%c0_16, %c0_17, %c0_18] : memref<5x32x32xbf16, #tpu.memory_space<vmem>>, vector<1x32x32xbf16>
    %26 = vector.shape_cast %25 : vector<1x32x32xbf16> to vector<32x32xbf16>
    %cst_19 = arith.constant dense<0.000000e+00> : vector<256x32xf32>
    %27 = tpu.matmul %24, %26, %cst_19 {dimension_numbers = #tpu.dot_dimension_numbers<[1], [0], [0], [1], [0, 0, 1, 1], [], []>} : vector<256x32xbf16>, vector<32x32xbf16>, vector<256x32xf32> -> vector<256x32xf32>
    %c0_20 = arith.constant 0 : index
    %c0_21 = arith.constant 0 : index
    %c0_22 = arith.constant 0 : index
    %28 = vector.load %arg6[%c0_20, %c0_21, %c0_22] : memref<5x1x32xf32, #tpu.memory_space<vmem>>, vector<1x1x32xf32>
    %29 = vector.shape_cast %28 : vector<1x1x32xf32> to vector<1x32xf32>
    %30 = vector.broadcast %29 : vector<1x32xf32> to vector<256x32xf32>
    %31 = arith.addf %27, %30 : vector<256x32xf32>
    %cst_23 = arith.constant 0.000000e+00 : f32
    %32 = vector.broadcast %cst_23 : f32 to vector<256x32xf32>
    %33 = arith.maximumf %31, %32 : vector<256x32xf32>
    %34 = arith.truncf %33 : vector<256x32xf32> to vector<256x32xbf16>
    %c0_24 = arith.constant 0 : index
    %c0_25 = arith.constant 0 : index
    %c0_26 = arith.constant 0 : index
    %35 = vector.load %arg7[%c0_24, %c0_25, %c0_26] : memref<5x32x32xbf16, #tpu.memory_space<vmem>>, vector<1x32x32xbf16>
    %36 = vector.shape_cast %35 : vector<1x32x32xbf16> to vector<32x32xbf16>
    %cst_27 = arith.constant dense<0.000000e+00> : vector<256x32xf32>
    %37 = tpu.matmul %34, %36, %cst_27 {dimension_numbers = #tpu.dot_dimension_numbers<[1], [0], [0], [1], [0, 0, 1, 1], [], []>} : vector<256x32xbf16>, vector<32x32xbf16>, vector<256x32xf32> -> vector<256x32xf32>
    %c0_28 = arith.constant 0 : index
    %c0_29 = arith.constant 0 : index
    %c0_30 = arith.constant 0 : index
    %38 = vector.load %arg8[%c0_28, %c0_29, %c0_30] : memref<5x1x32xf32, #tpu.memory_space<vmem>>, vector<1x1x32xf32>
    %39 = vector.shape_cast %38 : vector<1x1x32xf32> to vector<1x32xf32>
    %40 = vector.broadcast %39 : vector<1x32xf32> to vector<256x32xf32>
    %41 = arith.addf %37, %40 : vector<256x32xf32>
    %42 = arith.addf %21, %41 : vector<256x32xf32>
    %c1_31 = arith.constant 1 : index
    %c0_32 = arith.constant 0 : index
    %c0_33 = arith.constant 0 : index
    %43 = vector.load %arg12[%c1_31, %c0_32, %c0_33] : memref<3x256x32xf32, #tpu.memory_space<vmem>>, vector<1x256x32xf32>
    %44 = vector.shape_cast %43 : vector<1x256x32xf32> to vector<256x32xf32>
    %45 = arith.addf %42, %44 : vector<256x32xf32>
    %cst_34 = arith.constant 0.000000e+00 : f32
    %46 = vector.broadcast %cst_34 : f32 to vector<256x32xf32>
    %47 = arith.maximumf %45, %46 : vector<256x32xf32>
    %48 = arith.truncf %47 : vector<256x32xf32> to vector<256x32xbf16>
    %c1_35 = arith.constant 1 : index
    %c0_36 = arith.constant 0 : index
    %c0_37 = arith.constant 0 : index
    %49 = vector.load %arg5[%c1_35, %c0_36, %c0_37] : memref<5x32x32xbf16, #tpu.memory_space<vmem>>, vector<1x32x32xbf16>
    %50 = vector.shape_cast %49 : vector<1x32x32xbf16> to vector<32x32xbf16>
    %cst_38 = arith.constant dense<0.000000e+00> : vector<256x32xf32>
    %51 = tpu.matmul %48, %50, %cst_38 {dimension_numbers = #tpu.dot_dimension_numbers<[1], [0], [0], [1], [0, 0, 1, 1], [], []>} : vector<256x32xbf16>, vector<32x32xbf16>, vector<256x32xf32> -> vector<256x32xf32>
    %c1_39 = arith.constant 1 : index
    %c0_40 = arith.constant 0 : index
    %c0_41 = arith.constant 0 : index
    %52 = vector.load %arg6[%c1_39, %c0_40, %c0_41] : memref<5x1x32xf32, #tpu.memory_space<vmem>>, vector<1x1x32xf32>
    %53 = vector.shape_cast %52 : vector<1x1x32xf32> to vector<1x32xf32>
    %54 = vector.broadcast %53 : vector<1x32xf32> to vector<256x32xf32>
    %55 = arith.addf %51, %54 : vector<256x32xf32>
    %cst_42 = arith.constant 0.000000e+00 : f32
    %56 = vector.broadcast %cst_42 : f32 to vector<256x32xf32>
    %57 = arith.maximumf %55, %56 : vector<256x32xf32>
    %58 = arith.truncf %57 : vector<256x32xf32> to vector<256x32xbf16>
    %c1_43 = arith.constant 1 : index
    %c0_44 = arith.constant 0 : index
    %c0_45 = arith.constant 0 : index
    %59 = vector.load %arg7[%c1_43, %c0_44, %c0_45] : memref<5x32x32xbf16, #tpu.memory_space<vmem>>, vector<1x32x32xbf16>
    %60 = vector.shape_cast %59 : vector<1x32x32xbf16> to vector<32x32xbf16>
    %cst_46 = arith.constant dense<0.000000e+00> : vector<256x32xf32>
    %61 = tpu.matmul %58, %60, %cst_46 {dimension_numbers = #tpu.dot_dimension_numbers<[1], [0], [0], [1], [0, 0, 1, 1], [], []>} : vector<256x32xbf16>, vector<32x32xbf16>, vector<256x32xf32> -> vector<256x32xf32>
    %c1_47 = arith.constant 1 : index
    %c0_48 = arith.constant 0 : index
    %c0_49 = arith.constant 0 : index
    %62 = vector.load %arg8[%c1_47, %c0_48, %c0_49] : memref<5x1x32xf32, #tpu.memory_space<vmem>>, vector<1x1x32xf32>
    %63 = vector.shape_cast %62 : vector<1x1x32xf32> to vector<1x32xf32>
    %64 = vector.broadcast %63 : vector<1x32xf32> to vector<256x32xf32>
    %65 = arith.addf %61, %64 : vector<256x32xf32>
    %66 = arith.addf %45, %65 : vector<256x32xf32>
    %c2_50 = arith.constant 2 : index
    %c0_51 = arith.constant 0 : index
    %c0_52 = arith.constant 0 : index
    %67 = vector.load %arg12[%c2_50, %c0_51, %c0_52] : memref<3x256x32xf32, #tpu.memory_space<vmem>>, vector<1x256x32xf32>
    %68 = vector.shape_cast %67 : vector<1x256x32xf32> to vector<256x32xf32>
    %69 = arith.addf %66, %68 : vector<256x32xf32>
    %cst_53 = arith.constant 0.000000e+00 : f32
    %70 = vector.broadcast %cst_53 : f32 to vector<256x32xf32>
    %71 = arith.maximumf %69, %70 : vector<256x32xf32>
    %72 = arith.truncf %71 : vector<256x32xf32> to vector<256x32xbf16>
    %c2_54 = arith.constant 2 : index
    %c0_55 = arith.constant 0 : index
    %c0_56 = arith.constant 0 : index
    %73 = vector.load %arg5[%c2_54, %c0_55, %c0_56] : memref<5x32x32xbf16, #tpu.memory_space<vmem>>, vector<1x32x32xbf16>
    %74 = vector.shape_cast %73 : vector<1x32x32xbf16> to vector<32x32xbf16>
    %cst_57 = arith.constant dense<0.000000e+00> : vector<256x32xf32>
    %75 = tpu.matmul %72, %74, %cst_57 {dimension_numbers = #tpu.dot_dimension_numbers<[1], [0], [0], [1], [0, 0, 1, 1], [], []>} : vector<256x32xbf16>, vector<32x32xbf16>, vector<256x32xf32> -> vector<256x32xf32>
    %c2_58 = arith.constant 2 : index
    %c0_59 = arith.constant 0 : index
    %c0_60 = arith.constant 0 : index
    %76 = vector.load %arg6[%c2_58, %c0_59, %c0_60] : memref<5x1x32xf32, #tpu.memory_space<vmem>>, vector<1x1x32xf32>
    %77 = vector.shape_cast %76 : vector<1x1x32xf32> to vector<1x32xf32>
    %78 = vector.broadcast %77 : vector<1x32xf32> to vector<256x32xf32>
    %79 = arith.addf %75, %78 : vector<256x32xf32>
    %cst_61 = arith.constant 0.000000e+00 : f32
    %80 = vector.broadcast %cst_61 : f32 to vector<256x32xf32>
    %81 = arith.maximumf %79, %80 : vector<256x32xf32>
    %82 = arith.truncf %81 : vector<256x32xf32> to vector<256x32xbf16>
    %c2_62 = arith.constant 2 : index
    %c0_63 = arith.constant 0 : index
    %c0_64 = arith.constant 0 : index
    %83 = vector.load %arg7[%c2_62, %c0_63, %c0_64] : memref<5x32x32xbf16, #tpu.memory_space<vmem>>, vector<1x32x32xbf16>
    %84 = vector.shape_cast %83 : vector<1x32x32xbf16> to vector<32x32xbf16>
    %cst_65 = arith.constant dense<0.000000e+00> : vector<256x32xf32>
    %85 = tpu.matmul %82, %84, %cst_65 {dimension_numbers = #tpu.dot_dimension_numbers<[1], [0], [0], [1], [0, 0, 1, 1], [], []>} : vector<256x32xbf16>, vector<32x32xbf16>, vector<256x32xf32> -> vector<256x32xf32>
    %c2_66 = arith.constant 2 : index
    %c0_67 = arith.constant 0 : index
    %c0_68 = arith.constant 0 : index
    %86 = vector.load %arg8[%c2_66, %c0_67, %c0_68] : memref<5x1x32xf32, #tpu.memory_space<vmem>>, vector<1x1x32xf32>
    %87 = vector.shape_cast %86 : vector<1x1x32xf32> to vector<1x32xf32>
    %88 = vector.broadcast %87 : vector<1x32xf32> to vector<256x32xf32>
    %89 = arith.addf %85, %88 : vector<256x32xf32>
    %90 = arith.addf %69, %89 : vector<256x32xf32>
    %91 = vector.extract_strided_slice %90 {offsets = [0, 0], sizes = [64, 32], strides = [1, 1]} : vector<256x32xf32> to vector<64x32xf32>
    %92 = vector.extract_strided_slice %90 {offsets = [64, 0], sizes = [64, 32], strides = [1, 1]} : vector<256x32xf32> to vector<64x32xf32>
    %93 = arith.addf %91, %92 : vector<64x32xf32>
    %94 = vector.extract_strided_slice %90 {offsets = [128, 0], sizes = [64, 32], strides = [1, 1]} : vector<256x32xf32> to vector<64x32xf32>
    %95 = vector.extract_strided_slice %90 {offsets = [192, 0], sizes = [64, 32], strides = [1, 1]} : vector<256x32xf32> to vector<64x32xf32>
    %96 = arith.addf %94, %95 : vector<64x32xf32>
    %97 = tpu.concatenate %93, %96 in 0 : vector<64x32xf32>, vector<64x32xf32> -> vector<128x32xf32>
    %cst_69 = arith.constant 5.000000e-01 : f32
    %98 = vector.broadcast %cst_69 : f32 to vector<128x32xf32>
    %99 = arith.mulf %97, %98 : vector<128x32xf32>
    %cst_70 = arith.constant 0.000000e+00 : f32
    %100 = vector.broadcast %cst_70 : f32 to vector<128x32xf32>
    %101 = arith.maximumf %99, %100 : vector<128x32xf32>
    %102 = arith.truncf %101 : vector<128x32xf32> to vector<128x32xbf16>
    %c3 = arith.constant 3 : index
    %c0_71 = arith.constant 0 : index
    %c0_72 = arith.constant 0 : index
    %103 = vector.load %arg5[%c3, %c0_71, %c0_72] : memref<5x32x32xbf16, #tpu.memory_space<vmem>>, vector<1x32x32xbf16>
    %104 = vector.shape_cast %103 : vector<1x32x32xbf16> to vector<32x32xbf16>
    %cst_73 = arith.constant dense<0.000000e+00> : vector<128x32xf32>
    %105 = tpu.matmul %102, %104, %cst_73 {dimension_numbers = #tpu.dot_dimension_numbers<[1], [0], [0], [1], [0, 0, 1, 1], [], []>} : vector<128x32xbf16>, vector<32x32xbf16>, vector<128x32xf32> -> vector<128x32xf32>
    %c3_74 = arith.constant 3 : index
    %c0_75 = arith.constant 0 : index
    %c0_76 = arith.constant 0 : index
    %106 = vector.load %arg6[%c3_74, %c0_75, %c0_76] : memref<5x1x32xf32, #tpu.memory_space<vmem>>, vector<1x1x32xf32>
    %107 = vector.shape_cast %106 : vector<1x1x32xf32> to vector<1x32xf32>
    %108 = vector.broadcast %107 : vector<1x32xf32> to vector<128x32xf32>
    %109 = arith.addf %105, %108 : vector<128x32xf32>
    %cst_77 = arith.constant 0.000000e+00 : f32
    %110 = vector.broadcast %cst_77 : f32 to vector<128x32xf32>
    %111 = arith.maximumf %109, %110 : vector<128x32xf32>
    %112 = arith.truncf %111 : vector<128x32xf32> to vector<128x32xbf16>
    %c3_78 = arith.constant 3 : index
    %c0_79 = arith.constant 0 : index
    %c0_80 = arith.constant 0 : index
    %113 = vector.load %arg7[%c3_78, %c0_79, %c0_80] : memref<5x32x32xbf16, #tpu.memory_space<vmem>>, vector<1x32x32xbf16>
    %114 = vector.shape_cast %113 : vector<1x32x32xbf16> to vector<32x32xbf16>
    %cst_81 = arith.constant dense<0.000000e+00> : vector<128x32xf32>
    %115 = tpu.matmul %112, %114, %cst_81 {dimension_numbers = #tpu.dot_dimension_numbers<[1], [0], [0], [1], [0, 0, 1, 1], [], []>} : vector<128x32xbf16>, vector<32x32xbf16>, vector<128x32xf32> -> vector<128x32xf32>
    %c3_82 = arith.constant 3 : index
    %c0_83 = arith.constant 0 : index
    %c0_84 = arith.constant 0 : index
    %116 = vector.load %arg8[%c3_82, %c0_83, %c0_84] : memref<5x1x32xf32, #tpu.memory_space<vmem>>, vector<1x1x32xf32>
    %117 = vector.shape_cast %116 : vector<1x1x32xf32> to vector<1x32xf32>
    %118 = vector.broadcast %117 : vector<1x32xf32> to vector<128x32xf32>
    %119 = arith.addf %115, %118 : vector<128x32xf32>
    %120 = arith.addf %99, %119 : vector<128x32xf32>
    %cst_85 = arith.constant 0.000000e+00 : f32
    %121 = vector.broadcast %cst_85 : f32 to vector<128x32xf32>
    %122 = arith.maximumf %120, %121 : vector<128x32xf32>
    %123 = arith.truncf %122 : vector<128x32xf32> to vector<128x32xbf16>
    %c4 = arith.constant 4 : index
    %c0_86 = arith.constant 0 : index
    %c0_87 = arith.constant 0 : index
    %124 = vector.load %arg5[%c4, %c0_86, %c0_87] : memref<5x32x32xbf16, #tpu.memory_space<vmem>>, vector<1x32x32xbf16>
    %125 = vector.shape_cast %124 : vector<1x32x32xbf16> to vector<32x32xbf16>
    %cst_88 = arith.constant dense<0.000000e+00> : vector<128x32xf32>
    %126 = tpu.matmul %123, %125, %cst_88 {dimension_numbers = #tpu.dot_dimension_numbers<[1], [0], [0], [1], [0, 0, 1, 1], [], []>} : vector<128x32xbf16>, vector<32x32xbf16>, vector<128x32xf32> -> vector<128x32xf32>
    %c4_89 = arith.constant 4 : index
    %c0_90 = arith.constant 0 : index
    %c0_91 = arith.constant 0 : index
    %127 = vector.load %arg6[%c4_89, %c0_90, %c0_91] : memref<5x1x32xf32, #tpu.memory_space<vmem>>, vector<1x1x32xf32>
    %128 = vector.shape_cast %127 : vector<1x1x32xf32> to vector<1x32xf32>
    %129 = vector.broadcast %128 : vector<1x32xf32> to vector<128x32xf32>
    %130 = arith.addf %126, %129 : vector<128x32xf32>
    %cst_92 = arith.constant 0.000000e+00 : f32
    %131 = vector.broadcast %cst_92 : f32 to vector<128x32xf32>
    %132 = arith.maximumf %130, %131 : vector<128x32xf32>
    %133 = arith.truncf %132 : vector<128x32xf32> to vector<128x32xbf16>
    %c4_93 = arith.constant 4 : index
    %c0_94 = arith.constant 0 : index
    %c0_95 = arith.constant 0 : index
    %134 = vector.load %arg7[%c4_93, %c0_94, %c0_95] : memref<5x32x32xbf16, #tpu.memory_space<vmem>>, vector<1x32x32xbf16>
    %135 = vector.shape_cast %134 : vector<1x32x32xbf16> to vector<32x32xbf16>
    %cst_96 = arith.constant dense<0.000000e+00> : vector<128x32xf32>
    %136 = tpu.matmul %133, %135, %cst_96 {dimension_numbers = #tpu.dot_dimension_numbers<[1], [0], [0], [1], [0, 0, 1, 1], [], []>} : vector<128x32xbf16>, vector<32x32xbf16>, vector<128x32xf32> -> vector<128x32xf32>
    %c4_97 = arith.constant 4 : index
    %c0_98 = arith.constant 0 : index
    %c0_99 = arith.constant 0 : index
    %137 = vector.load %arg8[%c4_97, %c0_98, %c0_99] : memref<5x1x32xf32, #tpu.memory_space<vmem>>, vector<1x1x32xf32>
    %138 = vector.shape_cast %137 : vector<1x1x32xf32> to vector<1x32xf32>
    %139 = vector.broadcast %138 : vector<1x32xf32> to vector<128x32xf32>
    %140 = arith.addf %136, %139 : vector<128x32xf32>
    %141 = arith.addf %120, %140 : vector<128x32xf32>
    %cst_100 = arith.constant 0.000000e+00 : f32
    %142 = vector.broadcast %cst_100 : f32 to vector<128x32xf32>
    %143 = arith.maximumf %141, %142 : vector<128x32xf32>
    %144 = arith.truncf %143 : vector<128x32xf32> to vector<128x32xbf16>
    %c0_101 = arith.constant 0 : index
    %c0_102 = arith.constant 0 : index
    %145 = vector.load %arg9[%c0_101, %c0_102] : memref<32x4xbf16, #tpu.memory_space<vmem>>, vector<32x4xbf16>
    %cst_103 = arith.constant dense<0.000000e+00> : vector<128x4xf32>
    %146 = tpu.matmul %144, %145, %cst_103 {dimension_numbers = #tpu.dot_dimension_numbers<[1], [0], [0], [1], [0, 0, 1, 1], [], []>} : vector<128x32xbf16>, vector<32x4xbf16>, vector<128x4xf32> -> vector<128x4xf32>
    %c0_104 = arith.constant 0 : index
    %c0_105 = arith.constant 0 : index
    %147 = vector.load %arg10[%c0_104, %c0_105] : memref<1x4xf32, #tpu.memory_space<vmem>>, vector<1x4xf32>
    %148 = vector.broadcast %147 : vector<1x4xf32> to vector<128x4xf32>
    %149 = arith.addf %146, %148 : vector<128x4xf32>
    %150 = tpu.iota {dimensions = array<i32: 1>} : vector<128x4xi32>
    %c0_106 = arith.constant 0 : index
    %c0_107 = arith.constant 0 : index
    %151 = vector.load %arg2[%c0_106, %c0_107] : memref<128x4xf32, #tpu.memory_space<vmem>>, vector<128x4xf32>
    %cst_108 = arith.constant 0.000000e+00 : f32
    %152 = vector.broadcast %cst_108 : f32 to vector<128x4xf32>
    %153 = arith.subf %152, %151 : vector<128x4xf32>
    %cst_109 = arith.constant 0.000000e+00 : f32
    %154 = vector.broadcast %cst_109 : f32 to vector<128x4xf32>
    %155 = arith.maximumf %149, %154 : vector<128x4xf32>
    %156 = arith.mulf %153, %155 : vector<128x4xf32>
    %157 = math.exp %156 : vector<128x4xf32>
    %cst_110 = arith.constant 1.000000e+00 : f32
    %158 = vector.broadcast %cst_110 : f32 to vector<128x4xf32>
    %159 = arith.subf %158, %157 : vector<128x4xf32>
    %c0_i32 = arith.constant 0 : i32
    %160 = vector.broadcast %c0_i32 : i32 to vector<128x4xi32>
    %161 = arith.cmpi eq, %150, %160 : vector<128x4xi32>
    %162 = arith.negf %149 : vector<128x4xf32>
    %163 = math.exp %162 : vector<128x4xf32>
    %cst_111 = arith.constant 1.000000e+00 : f32
    %164 = vector.broadcast %cst_111 : f32 to vector<128x4xf32>
    %165 = arith.addf %164, %163 : vector<128x4xf32>
    %166 = arith.divf %164, %165 : vector<128x4xf32>
    %167 = arith.select %161, %159, %166 : vector<128x4xi1>, vector<128x4xf32>
    %c0_112 = arith.constant 0 : index
    %c0_113 = arith.constant 0 : index
    %168 = vector.load %arg11[%c0_112, %c0_113] : memref<128x4xf32, #tpu.memory_space<vmem>>, vector<128x4xf32>
    tpu.vector_store %arg11[%c0_112, %c0_113], %167 {strides = array<i32>} : memref<128x4xf32, #tpu.memory_space<vmem>>, vector<128x4xf32>,
    return
  }
  func.func @transform_0(%arg0: i32) -> (i32, i32) {
    %c0_i32 = arith.constant 0 : i32
    %c0_i32_0 = arith.constant 0 : i32
    return %arg0, %c0_i32 : i32, i32
  }
  func.func @transform_1(%arg0: i32) -> (i32, i32) {
    %c0_i32 = arith.constant 0 : i32
    %c0_i32_0 = arith.constant 0 : i32
    return %arg0, %c0_i32 : i32, i32
  }
  func.func @transform_2(%arg0: i32) -> (i32, i32) {
    %c0_i32 = arith.constant 0 : i32
    %c0_i32_0 = arith.constant 0 : i32
    %c0_i32_1 = arith.constant 0 : i32
    return %c0_i32, %c0_i32_0 : i32, i32
  }
  func.func @transform_3(%arg0: i32) -> (i32, i32) {
    %c0_i32 = arith.constant 0 : i32
    %c0_i32_0 = arith.constant 0 : i32
    %c0_i32_1 = arith.constant 0 : i32
    return %c0_i32, %c0_i32_0 : i32, i32
  }
  func.func @transform_4(%arg0: i32) -> (i32, i32, i32) {
    %c0_i32 = arith.constant 0 : i32
    %c0_i32_0 = arith.constant 0 : i32
    %c0_i32_1 = arith.constant 0 : i32
    %c0_i32_2 = arith.constant 0 : i32
    return %c0_i32, %c0_i32_0, %c0_i32_1 : i32, i32, i32
  }
  func.func @transform_5(%arg0: i32) -> (i32, i32, i32) {
    %c0_i32 = arith.constant 0 : i32
    %c0_i32_0 = arith.constant 0 : i32
    %c0_i32_1 = arith.constant 0 : i32
    %c0_i32_2 = arith.constant 0 : i32
    return %c0_i32, %c0_i32_0, %c0_i32_1 : i32, i32, i32
  }
  func.func @transform_6(%arg0: i32) -> (i32, i32, i32) {
    %c0_i32 = arith.constant 0 : i32
    %c0_i32_0 = arith.constant 0 : i32
    %c0_i32_1 = arith.constant 0 : i32
    %c0_i32_2 = arith.constant 0 : i32
    return %c0_i32, %c0_i32_0, %c0_i32_1 : i32, i32, i32
  }
  func.func @transform_7(%arg0: i32) -> (i32, i32, i32) {
    %c0_i32 = arith.constant 0 : i32
    %c0_i32_0 = arith.constant 0 : i32
    %c0_i32_1 = arith.constant 0 : i32
    %c0_i32_2 = arith.constant 0 : i32
    return %c0_i32, %c0_i32_0, %c0_i32_1 : i32, i32, i32
  }
  func.func @transform_8(%arg0: i32) -> (i32, i32) {
    %c0_i32 = arith.constant 0 : i32
    %c0_i32_0 = arith.constant 0 : i32
    %c0_i32_1 = arith.constant 0 : i32
    return %c0_i32, %c0_i32_0 : i32, i32
  }
  func.func @transform_9(%arg0: i32) -> (i32, i32) {
    %c0_i32 = arith.constant 0 : i32
    %c0_i32_0 = arith.constant 0 : i32
    %c0_i32_1 = arith.constant 0 : i32
    return %c0_i32, %c0_i32_0 : i32, i32
  }
  func.func @transform_10(%arg0: i32) -> (i32, i32) {
    %c0_i32 = arith.constant 0 : i32
    %c0_i32_0 = arith.constant 0 : i32
    return %arg0, %c0_i32 : i32, i32
  }
}

</mosaic_0001>

<bundles_post_ra>
// kernel: tpu_custom_call.1
= control target key start
LH: loop header
LB: loop body
LE: loop exit
PB: predicated region body
PF: predicated region fallthrough
CT: control target
= control target key end

     0   :  { %vm243_vm0 = vcmask 1044480   ;;  %vm194_vm1 = vcmask 605184   ;;  %s4910_s18 = smov 96   ;;  %vm536_vm2 = vcmask 261120   ;;  %s4912_s19 = smov 32   ;;  %vm3942_vm4 = vcmask 31744   ;;  %s6630_s2 = inlined_call_operand.vmem [shape: bf16[74,128], index: 2, kind: input, shape index: {}]   ;;  %s6631_s0 = inlined_call_operand.vmem [shape: bf16[256,74], index: 0, kind: input, shape index: {}]   ;;  %s6632_s4 = inlined_call_operand.vmem [shape: bf16[5,32,32], index: 4, kind: input, shape index: {}]   ;;  %s6633_s3 = inlined_call_operand.vmem [shape: f32[1,128], index: 3, kind: input, shape index: {}]   ;;  %s6634_s6 = inlined_call_operand.vmem [shape: bf16[5,32,32], index: 6, kind: input, shape index: {}]   ;;  %s6635_s5 = inlined_call_operand.vmem [shape: f32[5,1,32], index: 5, kind: input, shape index: {}]   ;;  %s6636_s7 = inlined_call_operand.vmem [shape: f32[5,1,32], index: 7, kind: input, shape index: {}]   ;;  %s6637_s8 = inlined_call_operand.vmem [shape: bf16[32,4], index: 8, kind: input, shape index: {}]   ;;  %s6638_s9 = inlined_call_operand.vmem [shape: f32[1,4], index: 9, kind: input, shape index: {}]   ;;  %s6639_s1 = inlined_call_operand.vmem [shape: f32[128,4], index: 1, kind: input, shape index: {}]   ;;  %s6640_s10 = inlined_call_operand.vmem [shape: f32[128,4], index: 10, kind: output, shape index: {}]  }
   0x1   :  { %v4771_v0 = vld [vmem:[%s6630_s2 + $0x20] sm:$0x1f]   ;;  %v4772_v1 = vld [vmem:[%s6630_s2 + $0x18] sm:$0xff]   ;;  %v4773_v3 = vld [vmem:[%s6630_s2 + $0x10] sm:$0xff]  }
   0x2   :  { %4767 = vmatprep.subr.msk.bf16.mxu0 %vm243_vm0, %v4771_v0  ;;  %v245_v2 = vsel %vm243_vm0, %v4771_v0, 0  ;;  %v4776_v4 = vld [vmem:[%s6631_s0] sm:$0xff]   ;;  %v4774_v5 = vld [vmem:[%s6630_s2 + $0x8] sm:$0xff]   ;;  %v4778_v8 = vld [vmem:[%s6631_s0 + $0x10] sm:$0xff]  }
   0x3   :  { %4406 = vmatpush3.bf16.msra.mxu0 %v245_v2  ;;  %4415 = vmatprep.mubr.msk.bf16.mxu0 %vm194_vm1, %v4776_v4  ;;  %v4775_v6 = vld [vmem:[%s6630_s2] sm:$0xff]   ;;  %v4777_v7 = vld [vmem:[%s6631_s0 + $0x8] sm:$0xff]   ;;  %v4779_v9 = vld [vmem:[%s6631_s0 + $0x18] sm:$0xff]  }
   0x4   :  { %4407 = vmatprep.subr.bf16.mxu0 %v4772_v1  ;;  %v4780_v10 = vld [vmem:[%s6631_s0 + $0x20] sm:$0xff]   ;;  %v4781_v11 = vld [vmem:[%s6631_s0 + $0x28] sm:$0xff]   ;;  %v4782_v12 = vld [vmem:[%s6631_s0 + $0x30] sm:$0xff]  }
   0x5   :  { %v4783_v13 = vld [vmem:[%s6631_s0 + $0x38] sm:$0xff]   ;;  %v4784_v14 = vld [vmem:[%s6631_s0 + $0x40] sm:$0xff]   ;;  %v4785_v15 = vld [vmem:[%s6631_s0 + $0x48] sm:$0xff]  }
   0x6   :  { %v4786_v16 = vld [vmem:[%s6631_s0 + $0x50] sm:$0xff]   ;;  %v4787_v17 = vld [vmem:[%s6631_s0 + $0x58] sm:$0xff]   ;;  %v4788_v18 = vld [vmem:[%s6631_s0 + $0x60] sm:$0xff]  }
   0x7   :  { %4408 = vmatpush3.bf16.msra.mxu0 %v4772_v1  ;;  %v4789_v19 = vld [vmem:[%s6631_s0 + $0x68] sm:$0xff]   ;;  %v4790_v20 = vld [vmem:[%s6631_s0 + $0x70] sm:$0xff]   ;;  %v4791_v21 = vld [vmem:[%s6631_s0 + $0x78] sm:$0xff]  }
   0x8   :  { %4409 = vmatprep.subr.bf16.mxu0 %v4773_v3  ;;  %v4792_v22 = vld [vmem:[%s6632_s4 + $0x8] sm:$0xff]   ;;  %v4793_v23 = vld [vmem:[%s6632_s4] sm:$0xff]  }
   0x9   :  { %4763 = vmatprep.subr.bf16.mxu1 %v4792_v22  ;;  %v5056_v24 = vld [vmem:[%s6633_s3] ss:$0 sm:$0xff]  ;;  %s4911_s3 = smov 64  }
   0xa   :  { %4765 = vmatpush3.bf16.msra.mxu1 %v4792_v22 }
   0xb   :  { %4410 = vmatpush3.bf16.msra.mxu0 %v4773_v3  ;;  %4764 = vmatprep.subr.bf16.mxu1 %v4793_v23 }
   0xc   :  { %4411 = vmatprep.subr.bf16.mxu0 %v4774_v5 }
   0xe   :  { %4766 = vmatpush3.bf16.msra.mxu1 %v4793_v23 }
   0xf   :  { %4412 = vmatpush3.bf16.msra.mxu0 %v4774_v5 }
  0x10   :  { %4413 = vmatprep.subr.bf16.mxu0 %v4775_v6 }
  0x13   :  { %4414 = vmatpush3.bf16.msra.mxu0 %v4775_v6 }
  0x14   :  { %4447 = vmatprep.subr.bf16.mxu0 %v4792_v22 }
  0x16   :  { %4416 = vmatmul.mubr.msk.bf16.vlgmr.msra.gmra.mxu0 %vm194_vm1, %v4777_v7 }
  0x17   :  { %4419 = vmatprep.mubr.msk.bf16.mxu0 %vm194_vm1, %v4778_v8  ;;  %4448 = vmatpush3.bf16.msra.mxu0 %v4792_v22 }
  0x18   :  { %4449 = vmatprep.subr.bf16.mxu0 %v4793_v23 }
  0x1b   :  { %4450 = vmatpush3.bf16.msra.mxu0 %v4793_v23 }
  0x1e   :  { %4420 = vmatmul.mubr.msk.bf16.gmra.mxu0 %vm194_vm1, %v4779_v9 }
  0x1f   :  { %4423 = vmatprep.mubr.msk.bf16.mxu0 %vm194_vm1, %v4780_v10 }
  0x26   :  { %4424 = vmatmul.mubr.msk.bf16.gmra.mxu0 %vm194_vm1, %v4781_v11 }
  0x27   :  { %4427 = vmatprep.mubr.msk.bf16.mxu0 %vm194_vm1, %v4782_v12 }
  0x2e   :  { %4428 = vmatmul.mubr.msk.bf16.gmra.mxu0 %vm194_vm1, %v4783_v13 }
  0x2f   :  { %4431 = vmatprep.mubr.msk.bf16.mxu0 %vm194_vm1, %v4784_v14 }
  0x36   :  { %4432 = vmatmul.mubr.msk.bf16.gmra.mxu0 %vm194_vm1, %v4785_v15 }
  0x37   :  { %4435 = vmatprep.mubr.msk.bf16.mxu0 %vm194_vm1, %v4786_v16 }
  0x3e   :  { %4436 = vmatmul.mubr.msk.bf16.gmra.mxu0 %vm194_vm1, %v4787_v17 }
  0x3f   :  { %4439 = vmatprep.mubr.msk.bf16.mxu0 %vm194_vm1, %v4788_v18 }
  0x46   :  { %4440 = vmatmul.mubr.msk.bf16.gmra.mxu0 %vm194_vm1, %v4789_v19 }
  0x47   :  { %4443 = vmatprep.mubr.msk.bf16.mxu0 %vm194_vm1, %v4790_v20 }
  0x4e   :  { %4444 = vmatmul.mubr.msk.bf16.gmra.mxu0 %vm194_vm1, %v4791_v21 }
  0xd6   :  { %v4417_v25 = vpop.f32.mrf.mxu0 }
  0xd7   :  { %v5059_v26 = vadd.f32 %v4417_v25, %v5056_v24 }
  0xd8   :  { %v281_v27 = vpop.f32.mrf.mxu0 }
  0xd9   :  { %v5062_v28 = vadd.f32 %v5056_v24, %v281_v27  ;;  %444 = vrot.lane.b32.xlu1 %v5059_v26, %s4910_s18 }
  0xda   :  { %v4418_v29 = vpop.f32.mrf.mxu0 }
  0xdb   :  { %v5067_v30 = vadd.f32 %v4418_v29, %v5056_v24  ;;  %440 = vrot.lane.b32.xlu0 %v5062_v28, %s4910_s18 }
  0xdc   :  { %v284_v31 = vpop.f32.mrf.mxu0 }
  0xdd   :  { %v5072_v32 = vadd.f32 %v5056_v24, %v284_v31  ;;  %446 = vrot.lane.b32.xlu1 %v5067_v30, %s4910_s18 }
  0xde   :  { %v4421_v33 = vpop.f32.mrf.mxu0 }
  0xdf   :  { %442 = vrot.lane.b32.xlu0 %v5072_v32, %s4910_s18  ;;  %v5084_v38 = vadd.f32 %v4421_v33, %v5056_v24 }
  0xe0   :  { %v297_v34 = vpop.f32.mrf.mxu0 }
  0xe1   :  { %v5079_v35 = vadd.f32 %v5056_v24, %v297_v34 }
  0xe2   :  { %v4422_v36 = vpop.f32.mrf.mxu0 }
  0xe3   :  { %448 = vrot.lane.b32.xlu0 %v5079_v35, %s4910_s18  ;;  %v5094_v42 = vadd.f32 %v4422_v36, %v5056_v24 }
  0xe4   :  { %v300_v37 = vpop.f32.mrf.mxu0 }
  0xe5   :  { %v5087_v39 = vadd.f32 %v5056_v24, %v300_v37 }
  0xe6   :  { %v4425_v40 = vpop.f32.mrf.mxu0 }
  0xe7   :  { %450 = vrot.lane.b32.xlu1 %v5087_v39, %s4910_s18  ;;  %452 = vrot.lane.b32.xlu0 %v5084_v38, %s4910_s18  ;;  %v5104_v46 = vadd.f32 %v4425_v40, %v5056_v24 }
  0xe8   :  { %v313_v41 = vpop.f32.mrf.mxu0 }
  0xe9   :  { %v5097_v43 = vadd.f32 %v5056_v24, %v313_v41 }
  0xea   :  { %v4426_v44 = vpop.f32.mrf.mxu0 }
  0xeb   :  { %454 = vrot.lane.b32.xlu1 %v5094_v42, %s4910_s18  ;;  %456 = vrot.lane.b32.xlu0 %v5097_v43, %s4910_s18  ;;  %v5114_v50 = vadd.f32 %v4426_v44, %v5056_v24 }
  0xec   :  { %v316_v45 = vpop.f32.mrf.mxu0 }
  0xed   :  { %v5107_v47 = vadd.f32 %v5056_v24, %v316_v45 }
  0xee   :  { %v4429_v48 = vpop.f32.mrf.mxu0 }
  0xef   :  { %458 = vrot.lane.b32.xlu1 %v5107_v47, %s4910_s18  ;;  %460 = vrot.lane.b32.xlu0 %v5104_v46, %s4910_s18  ;;  %v5124_v54 = vadd.f32 %v4429_v48, %v5056_v24 }
  0xf0   :  { %v329_v49 = vpop.f32.mrf.mxu0 }
  0xf1   :  { %v5117_v51 = vadd.f32 %v5056_v24, %v329_v49 }
  0xf2   :  { %v4430_v52 = vpop.f32.mrf.mxu0 }
  0xf3   :  { %462 = vrot.lane.b32.xlu1 %v5114_v50, %s4910_s18  ;;  %464 = vrot.lane.b32.xlu0 %v5117_v51, %s4910_s18  ;;  %v5134_v58 = vadd.f32 %v4430_v52, %v5056_v24 }
  0xf4   :  { %v332_v53 = vpop.f32.mrf.mxu0 }
  0xf5   :  { %v5127_v55 = vadd.f32 %v5056_v24, %v332_v53 }
  0xf6   :  { %v4433_v56 = vpop.f32.mrf.mxu0 }
  0xf7   :  { %466 = vrot.lane.b32.xlu1 %v5127_v55, %s4910_s18  ;;  %468 = vrot.lane.b32.xlu0 %v5124_v54, %s4910_s18  ;;  %v5144_v62 = vadd.f32 %v4433_v56, %v5056_v24 }
  0xf8   :  { %v345_v57 = vpop.f32.mrf.mxu0 }
  0xf9   :  { %v5137_v59 = vadd.f32 %v5056_v24, %v345_v57 }
  0xfa   :  { %v4434_v60 = vpop.f32.mrf.mxu0 }
  0xfb   :  { %470 = vrot.lane.b32.xlu1 %v5134_v58, %s4910_s18  ;;  %472 = vrot.lane.b32.xlu0 %v5137_v59, %s4910_s18  ;;  %v5154_v2 = vadd.f32 %v4434_v60, %v5056_v24 }
  0xfc   :  { %v348_v61 = vpop.f32.mrf.mxu0 }
  0xfd   :  { %v5147_v63 = vadd.f32 %v5056_v24, %v348_v61 }
  0xfe   :  { %v4437_v0 = vpop.f32.mrf.mxu0 }
  0xff   :  { %474 = vrot.lane.b32.xlu1 %v5147_v63, %s4910_s18  ;;  %476 = vrot.lane.b32.xlu0 %v5144_v62, %s4910_s18  ;;  %v5164_v6 = vadd.f32 %v4437_v0, %v5056_v24 }
 0x100   :  { %v361_v1 = vpop.f32.mrf.mxu0 }
 0x101   :  { %v5157_v3 = vadd.f32 %v5056_v24, %v361_v1 }
 0x102   :  { %v4438_v4 = vpop.f32.mrf.mxu0 }
 0x103   :  { %478 = vrot.lane.b32.xlu1 %v5154_v2, %s4910_s18  ;;  %480 = vrot.lane.b32.xlu0 %v5157_v3, %s4910_s18  ;;  %v5174_v10 = vadd.f32 %v4438_v4, %v5056_v24 }
 0x104   :  { %v364_v5 = vpop.f32.mrf.mxu0 }
 0x105   :  { %v5167_v7 = vadd.f32 %v5056_v24, %v364_v5 }
 0x106   :  { %v4441_v8 = vpop.f32.mrf.mxu0 }
 0x107   :  { %482 = vrot.lane.b32.xlu1 %v5167_v7, %s4910_s18  ;;  %484 = vrot.lane.b32.xlu0 %v5164_v6, %s4910_s18  ;;  %v5184_v14 = vadd.f32 %v4441_v8, %v5056_v24 }
 0x108   :  { %v377_v9 = vpop.f32.mrf.mxu0 }
 0x109   :  { %v5177_v11 = vadd.f32 %v5056_v24, %v377_v9 }
 0x10a   :  { %v4442_v12 = vpop.f32.mrf.mxu0 }
 0x10b   :  { %486 = vrot.lane.b32.xlu1 %v5174_v10, %s4910_s18  ;;  %488 = vrot.lane.b32.xlu0 %v5177_v11, %s4910_s18  ;;  %v5194_v18 = vadd.f32 %v4442_v12, %v5056_v24 }
 0x10c   :  { %v380_v13 = vpop.f32.mrf.mxu0 }
 0x10d   :  { %v5187_v15 = vadd.f32 %v5056_v24, %v380_v13 }
 0x10e   :  { %v4445_v16 = vpop.f32.mrf.mxu0 }
 0x10f   :  { %490 = vrot.lane.b32.xlu1 %v5187_v15, %s4910_s18  ;;  %492 = vrot.lane.b32.xlu0 %v5184_v14, %s4910_s18  ;;  %v5204_v22 = vadd.f32 %v4445_v16, %v5056_v24 }
 0x110   :  { %v393_v17 = vpop.f32.mrf.mxu0 }
 0x111   :  { %v5197_v19 = vadd.f32 %v5056_v24, %v393_v17 }
 0x112   :  { %v4446_v20 = vpop.f32.mrf.mxu0 }
 0x113   :  { %494 = vrot.lane.b32.xlu1 %v5194_v18, %s4910_s18  ;;  %496 = vrot.lane.b32.xlu0 %v5197_v19, %s4910_s18  ;;  %v5214_v25 = vadd.f32 %v4446_v20, %v5056_v24 }
 0x114   :  { %v396_v21 = vpop.f32.mrf.mxu0 }
 0x115   :  { %v5207_v23 = vadd.f32 %v5056_v24, %v396_v21 }
 0x117   :  { %498 = vrot.lane.b32.xlu1 %v5207_v23, %s4910_s18  ;;  %500 = vrot.lane.b32.xlu0 %v5204_v22, %s4910_s18 }
 0x11b   :  { %502 = vrot.lane.b32.xlu1 %v5214_v25, %s4910_s18  ;;  %569 = vrot.lane.b32.xlu0 %v5062_v28, %s4911_s3 }
 0x11f   :  { %571 = vrot.lane.b32.xlu1 %v5072_v32, %s4911_s3  ;;  %573 = vrot.lane.b32.xlu0 %v5059_v26, %s4911_s3 }
 0x123   :  { %575 = vrot.lane.b32.xlu1 %v5067_v30, %s4911_s3  ;;  %577 = vrot.lane.b32.xlu0 %v5079_v35, %s4911_s3 }
 0x127   :  { %579 = vrot.lane.b32.xlu1 %v5087_v39, %s4911_s3  ;;  %581 = vrot.lane.b32.xlu0 %v5084_v38, %s4911_s3 }
 0x12b   :  { %583 = vrot.lane.b32.xlu1 %v5094_v42, %s4911_s3  ;;  %585 = vrot.lane.b32.xlu0 %v5097_v43, %s4911_s3 }
 0x12f   :  { %587 = vrot.lane.b32.xlu1 %v5107_v47, %s4911_s3  ;;  %589 = vrot.lane.b32.xlu0 %v5104_v46, %s4911_s3 }
 0x133   :  { %591 = vrot.lane.b32.xlu1 %v5114_v50, %s4911_s3  ;;  %593 = vrot.lane.b32.xlu0 %v5117_v51, %s4911_s3 }
 0x137   :  { %595 = vrot.lane.b32.xlu1 %v5127_v55, %s4911_s3  ;;  %597 = vrot.lane.b32.xlu0 %v5124_v54, %s4911_s3 }
 0x13b   :  { %599 = vrot.lane.b32.xlu1 %v5134_v58, %s4911_s3  ;;  %601 = vrot.lane.b32.xlu0 %v5137_v59, %s4911_s3 }
 0x13f   :  { %603 = vrot.lane.b32.xlu1 %v5147_v63, %s4911_s3  ;;  %605 = vrot.lane.b32.xlu0 %v5144_v62, %s4911_s3 }
 0x143   :  { %607 = vrot.lane.b32.xlu1 %v5154_v2, %s4911_s3  ;;  %609 = vrot.lane.b32.xlu0 %v5157_v3, %s4911_s3 }
 0x147   :  { %611 = vrot.lane.b32.xlu1 %v5167_v7, %s4911_s3  ;;  %613 = vrot.lane.b32.xlu0 %v5164_v6, %s4911_s3 }
 0x14b   :  { %v445_v24 = vpop.permute.xlu1 %444  ;;  %615 = vrot.lane.b32.xlu1 %v5174_v10, %s4911_s3  ;;  %617 = vrot.lane.b32.xlu0 %v5177_v11, %s4911_s3 }
 0x14c   :  { %539 = vst.msk [vmem:[#allocation2 + $0x10] sm:$0xff] %vm536_vm2, %v445_v24 }
 0x14d   :  { %v441_v27 = vpop.permute.xlu0 %440 }
 0x14e   :  { %537 = vst.msk [vmem:[#allocation2] sm:$0xff] %vm536_vm2, %v441_v27 }
 0x14f   :  { %v447_v29 = vpop.permute.xlu1 %446  ;;  %619 = vrot.lane.b32.xlu1 %v5187_v15, %s4911_s3  ;;  %621 = vrot.lane.b32.xlu0 %v5184_v14, %s4911_s3 }
 0x150   :  { %540 = vst.msk [vmem:[#allocation2 + $0x18] sm:$0xff] %vm536_vm2, %v447_v29 }
 0x151   :  { %v443_v31 = vpop.permute.xlu0 %442 }
 0x152   :  { %538 = vst.msk [vmem:[#allocation2 + $0x8] sm:$0xff] %vm536_vm2, %v443_v31 }
 0x153   :  { %623 = vrot.lane.b32.xlu1 %v5194_v18, %s4911_s3  ;;  %625 = vrot.lane.b32.xlu0 %v5197_v19, %s4911_s3  ;;  %v829_v36 = vld [vmem:[#allocation2 + $0x10] sm:$0xff] }
 0x154   :  { %v5292_v49 = vadd.f32 %v829_v36, %v5059_v26 }
 0x155   :  { %v449_v33 = vpop.permute.xlu0 %448  ;;  %v827_v34 = vld [vmem:[#allocation2] sm:$0xff] }
 0x156   :  { %541 = vst.msk [vmem:[#allocation2 + $0x20] sm:$0xff] %vm536_vm2, %v449_v33  ;;  %v5286_v40 = vadd.f32 %v827_v34, %v5062_v28  ;;  %v893_v0 = vmax.f32 %v5292_v49, 0.0 }
 0x157   :  { %627 = vrot.lane.b32.xlu1 %v5207_v23, %s4911_s3  ;;  %629 = vrot.lane.b32.xlu0 %v5204_v22, %s4911_s3  ;;  %v830_v37 = vld [vmem:[#allocation2 + $0x18] sm:$0xff] }
 0x158   :  { %v5289_v41 = vadd.f32 %v830_v37, %v5067_v30  ;;  %v891_v56 = vmax.f32 %v5286_v40, 0.0 }
 0x159   :  { %v451_v44 = vpop.permute.xlu1 %450  ;;  %v453_v45 = vpop.permute.xlu0 %452  ;;  %v828_v48 = vld [vmem:[#allocation2 + $0x8] sm:$0xff] }
 0x15a   :  { %542 = vst.msk [vmem:[#allocation2 + $0x28] sm:$0xff] %vm536_vm2, %v451_v44  ;;  %543 = vst.msk [vmem:[#allocation2 + $0x30] sm:$0xff] %vm536_vm2, %v453_v45  ;;  %v5297_v52 = vadd.f32 %v828_v48, %v5072_v32  ;;  %v894_v53 = vmax.f32 %v5289_v41, 0.0 }
 0x15b   :  { %631 = vrot.lane.b32.xlu1 %v5214_v25, %s4911_s3  ;;  %698 = vrot.lane.b32.xlu0 %v5062_v28, %s4912_s19 }
 0x15c   :  { %v892_v57 = vmax.f32 %v5297_v52, 0.0  ;;  %v924_v28 = vpack.c.bf16 %v894_v53, %v893_v0 }
 0x15d   :  { %v455_v60 = vpop.permute.xlu1 %454  ;;  %v457_v61 = vpop.permute.xlu0 %456  ;;  %v831_v1 = vld [vmem:[#allocation2 + $0x20] sm:$0xff] }
 0x15e   :  { %544 = vst.msk [vmem:[#allocation2 + $0x38] sm:$0xff] %vm536_vm2, %v455_v60  ;;  %545 = vst.msk [vmem:[#allocation2 + $0x40] sm:$0xff] %vm536_vm2, %v457_v61  ;;  %v923_v4 = vpack.c.bf16 %v892_v57, %v891_v56  ;;  %v5315_v5 = vadd.f32 %v831_v1, %v5079_v35 }
 0x15f   :  { %700 = vrot.lane.b32.xlu1 %v5072_v32, %s4912_s19  ;;  %702 = vrot.lane.b32.xlu0 %v5059_v26, %s4912_s19 }
 0x160   :  { %4451 = vmatprep.mubr.msk.bf16.mxu0 %vm536_vm2, %v923_v4  ;;  %v895_v26 = vmax.f32 %v5315_v5, 0.0 }
 0x161   :  { %v459_v8 = vpop.permute.xlu1 %458  ;;  %4452 = vmatmul.mubr.msk.bf16.vlgmr.msra.gmra.mxu0 %vm536_vm2, %v924_v28  ;;  %v461_v9 = vpop.permute.xlu0 %460  ;;  %v832_v12 = vld [vmem:[#allocation2 + $0x28] sm:$0xff]  ;;  %v833_v13 = vld [vmem:[#allocation2 + $0x30] sm:$0xff] }
 0x162   :  { %546 = vst.msk [vmem:[#allocation2 + $0x48] sm:$0xff] %vm536_vm2, %v459_v8  ;;  %547 = vst.msk [vmem:[#allocation2 + $0x50] sm:$0xff] %vm536_vm2, %v461_v9  ;;  %v5321_v32 = vadd.f32 %v832_v12, %v5087_v39  ;;  %v5330_v17 = vadd.f32 %v833_v13, %v5084_v38 }
 0x163   :  { %704 = vrot.lane.b32.xlu1 %v5067_v30, %s4912_s19  ;;  %706 = vrot.lane.b32.xlu0 %v5079_v35, %s4912_s19 }
 0x164   :  { %v896_v16 = vmax.f32 %v5321_v32, 0.0  ;;  %v897_v35 = vmax.f32 %v5330_v17, 0.0 }
 0x165   :  { %v463_v20 = vpop.permute.xlu1 %462  ;;  %v465_v21 = vpop.permute.xlu0 %464  ;;  %v834_v24 = vld [vmem:[#allocation2 + $0x38] sm:$0xff]  ;;  %v835_v27 = vld [vmem:[#allocation2 + $0x40] sm:$0xff] }
 0x166   :  { %548 = vst.msk [vmem:[#allocation2 + $0x58] sm:$0xff] %vm536_vm2, %v463_v20  ;;  %549 = vst.msk [vmem:[#allocation2 + $0x60] sm:$0xff] %vm536_vm2, %v465_v21  ;;  %v925_v29 = vpack.c.bf16 %v896_v16, %v895_v26  ;;  %v5335_v30 = vadd.f32 %v834_v24, %v5094_v42  ;;  %v5345_v33 = vadd.f32 %v835_v27, %v5097_v43 }
 0x167   :  { %708 = vrot.lane.b32.xlu1 %v5087_v39, %s4912_s19  ;;  %710 = vrot.lane.b32.xlu0 %v5084_v38, %s4912_s19 }
 0x168   :  { %4455 = vmatprep.mubr.msk.bf16.mxu1 %vm536_vm2, %v925_v29  ;;  %v898_v31 = vmax.f32 %v5335_v30, 0.0  ;;  %v899_v45 = vmax.f32 %v5345_v33, 0.0 }
 0x169   :  { %v467_v34 = vpop.permute.xlu1 %466  ;;  %v469_v36 = vpop.permute.xlu0 %468  ;;  %v836_v37 = vld [vmem:[#allocation2 + $0x48] sm:$0xff]  ;;  %v837_v44 = vld [vmem:[#allocation2 + $0x50] sm:$0xff] }
 0x16a   :  { %550 = vst.msk [vmem:[#allocation2 + $0x68] sm:$0xff] %vm536_vm2, %v467_v34  ;;  %551 = vst.msk [vmem:[#allocation2 + $0x70] sm:$0xff] %vm536_vm2, %v469_v36  ;;  %v926_v39 = vpack.c.bf16 %v898_v31, %v897_v35  ;;  %v5350_v38 = vadd.f32 %v836_v37, %v5107_v47  ;;  %v5360_v53 = vadd.f32 %v837_v44, %v5104_v46  ;;  %v4794_v34 = vld [vmem:[%s6634_s6 + $0x8] sm:$0xff]  }
 0x16b   :  { %712 = vrot.lane.b32.xlu1 %v5094_v42, %s4912_s19  ;;  %714 = vrot.lane.b32.xlu0 %v5097_v43, %s4912_s19 }
 0x16c   :  { %4456 = vmatmul.mubr.msk.bf16.vlgmr.msra.gmra.mxu1 %vm536_vm2, %v926_v39  ;;  %v900_v48 = vmax.f32 %v5350_v38, 0.0  ;;  %v901_v0 = vmax.f32 %v5360_v53, 0.0  ;;  %4483 = vmatprep.subr.bf16.mxu1 %v4794_v34 }
 0x16d   :  { %v471_v56 = vpop.permute.xlu1 %470  ;;  %v473_v57 = vpop.permute.xlu0 %472  ;;  %v838_v60 = vld [vmem:[#allocation2 + $0x58] sm:$0xff]  ;;  %v839_v61 = vld [vmem:[#allocation2 + $0x60] sm:$0xff]  ;;  %4484 = vmatpush3.bf16.msra.mxu1 %v4794_v34 }
 0x16e   :  { %552 = vst.msk [vmem:[#allocation2 + $0x78] sm:$0xff] %vm536_vm2, %v471_v56  ;;  %553 = vst.msk [vmem:[#allocation2 + $0x80] sm:$0xff] %vm536_vm2, %v473_v57  ;;  %v927_v42 = vpack.c.bf16 %v900_v48, %v899_v45  ;;  %v5365_v43 = vadd.f32 %v838_v60, %v5114_v50  ;;  %v5375_v4 = vadd.f32 %v839_v61, %v5117_v51 }
 0x16f   :  { %716 = vrot.lane.b32.xlu1 %v5107_v47, %s4912_s19  ;;  %718 = vrot.lane.b32.xlu0 %v5104_v46, %s4912_s19 }
 0x170   :  { %4459 = vmatprep.mubr.msk.bf16.mxu1 %vm536_vm2, %v927_v42  ;;  %v902_v1 = vmax.f32 %v5365_v43, 0.0  ;;  %v903_v13 = vmax.f32 %v5375_v4, 0.0 }
 0x171   :  { %v475_v28 = vpop.permute.xlu1 %474  ;;  %v477_v8 = vpop.permute.xlu0 %476  ;;  %v840_v9 = vld [vmem:[#allocation2 + $0x68] sm:$0xff]  ;;  %v841_v12 = vld [vmem:[#allocation2 + $0x70] sm:$0xff] }
 0x172   :  { %554 = vst.msk [vmem:[#allocation2 + $0x88] sm:$0xff] %vm536_vm2, %v475_v28  ;;  %555 = vst.msk [vmem:[#allocation2 + $0x90] sm:$0xff] %vm536_vm2, %v477_v8  ;;  %v928_v47 = vpack.c.bf16 %v902_v1, %v901_v0  ;;  %v5380_v46 = vadd.f32 %v840_v9, %v5127_v55  ;;  %v5390_v16 = vadd.f32 %v841_v12, %v5124_v54 }
 0x173   :  { %720 = vrot.lane.b32.xlu1 %v5114_v50, %s4912_s19  ;;  %722 = vrot.lane.b32.xlu0 %v5117_v51, %s4912_s19 }
 0x174   :  { %4460 = vmatmul.mubr.msk.bf16.gmra.mxu1 %vm536_vm2, %v928_v47  ;;  %v904_v26 = vmax.f32 %v5380_v46, 0.0  ;;  %v905_v29 = vmax.f32 %v5390_v16, 0.0 }
 0x175   :  { %v479_v20 = vpop.permute.xlu1 %478  ;;  %v481_v21 = vpop.permute.xlu0 %480  ;;  %v842_v24 = vld [vmem:[#allocation2 + $0x78] sm:$0xff]  ;;  %v843_v27 = vld [vmem:[#allocation2 + $0x80] sm:$0xff] }
 0x176   :  { %556 = vst.msk [vmem:[#allocation2 + $0x98] sm:$0xff] %vm536_vm2, %v479_v20  ;;  %557 = vst.msk [vmem:[#allocation2 + $0xa0] sm:$0xff] %vm536_vm2, %v481_v21  ;;  %v929_v50 = vpack.c.bf16 %v904_v26, %v903_v13  ;;  %v5395_v51 = vadd.f32 %v842_v24, %v5134_v58  ;;  %v5405_v31 = vadd.f32 %v843_v27, %v5137_v59 }
 0x177   :  { %724 = vrot.lane.b32.xlu1 %v5127_v55, %s4912_s19  ;;  %726 = vrot.lane.b32.xlu0 %v5124_v54, %s4912_s19 }
 0x178   :  { %4463 = vmatprep.mubr.msk.bf16.mxu1 %vm536_vm2, %v929_v50  ;;  %v906_v35 = vmax.f32 %v5395_v51, 0.0  ;;  %v907_v45 = vmax.f32 %v5405_v31, 0.0 }
 0x179   :  { %v483_v36 = vpop.permute.xlu1 %482  ;;  %v485_v37 = vpop.permute.xlu0 %484  ;;  %v844_v44 = vld [vmem:[#allocation2 + $0x88] sm:$0xff]  ;;  %v845_v55 = vld [vmem:[#allocation2 + $0x90] sm:$0xff] }
 0x17a   :  { %558 = vst.msk [vmem:[#allocation2 + $0xa8] sm:$0xff] %vm536_vm2, %v483_v36  ;;  %559 = vst.msk [vmem:[#allocation2 + $0xb0] sm:$0xff] %vm536_vm2, %v485_v37  ;;  %v930_v54 = vpack.c.bf16 %v906_v35, %v905_v29  ;;  %v5413_v39 = vadd.f32 %v844_v44, %v5147_v63  ;;  %v5423_v56 = vadd.f32 %v845_v55, %v5144_v62 }
 0x17b   :  { %728 = vrot.lane.b32.xlu1 %v5134_v58, %s4912_s19  ;;  %730 = vrot.lane.b32.xlu0 %v5137_v59, %s4912_s19 }
 0x17c   :  { %4464 = vmatmul.mubr.msk.bf16.gmra.mxu1 %vm536_vm2, %v930_v54  ;;  %v908_v48 = vmax.f32 %v5413_v39, 0.0  ;;  %v909_v0 = vmax.f32 %v5423_v56, 0.0 }
 0x17d   :  { %v487_v57 = vpop.permute.xlu1 %486  ;;  %v489_v60 = vpop.permute.xlu0 %488  ;;  %v846_v61 = vld [vmem:[#allocation2 + $0x98] sm:$0xff]  ;;  %v847_v42 = vld [vmem:[#allocation2 + $0xa0] sm:$0xff] }
 0x17e   :  { %560 = vst.msk [vmem:[#allocation2 + $0xb8] sm:$0xff] %vm536_vm2, %v487_v57  ;;  %561 = vst.msk [vmem:[#allocation2 + $0xc0] sm:$0xff] %vm536_vm2, %v489_v60  ;;  %v931_v58 = vpack.c.bf16 %v908_v48, %v907_v45  ;;  %v5428_v59 = vadd.f32 %v846_v61, %v5154_v2  ;;  %v5438_v28 = vadd.f32 %v847_v42, %v5157_v3 }
 0x17f   :  { %732 = vrot.lane.b32.xlu1 %v5147_v63, %s4912_s19  ;;  %734 = vrot.lane.b32.xlu0 %v5144_v62, %s4912_s19 }
 0x180   :  { %4467 = vmatprep.mubr.msk.bf16.mxu1 %vm536_vm2, %v931_v58  ;;  %v910_v1 = vmax.f32 %v5428_v59, 0.0  ;;  %v911_v13 = vmax.f32 %v5438_v28, 0.0  ;;  %v4795_v58 = vld [vmem:[%s6634_s6] sm:$0xff]  }
 0x181   :  { %v491_v8 = vpop.permute.xlu1 %490  ;;  %v493_v9 = vpop.permute.xlu0 %492  ;;  %v848_v12 = vld [vmem:[#allocation2 + $0xa8] sm:$0xff]  ;;  %v849_v47 = vld [vmem:[#allocation2 + $0xb0] sm:$0xff]  ;;  %4485 = vmatprep.subr.bf16.mxu1 %v4795_v58 }
 0x182   :  { %562 = vst.msk [vmem:[#allocation2 + $0xc8] sm:$0xff] %vm536_vm2, %v491_v8  ;;  %563 = vst.msk [vmem:[#allocation2 + $0xd0] sm:$0xff] %vm536_vm2, %v493_v9  ;;  %v932_v63 = vpack.c.bf16 %v910_v1, %v909_v0  ;;  %v5443_v62 = vadd.f32 %v848_v12, %v5167_v7  ;;  %v5453_v20 = vadd.f32 %v849_v47, %v5164_v6  ;;  %4486 = vmatpush3.bf16.msra.mxu1 %v4795_v58 }
 0x183   :  { %736 = vrot.lane.b32.xlu1 %v5154_v2, %s4912_s19  ;;  %738 = vrot.lane.b32.xlu0 %v5157_v3, %s4912_s19 }
 0x184   :  { %4468 = vmatmul.mubr.msk.bf16.gmra.mxu1 %vm536_vm2, %v932_v63  ;;  %v912_v26 = vmax.f32 %v5443_v62, 0.0  ;;  %v913_v29 = vmax.f32 %v5453_v20, 0.0 }
 0x185   :  { %v495_v21 = vpop.permute.xlu1 %494  ;;  %v497_v24 = vpop.permute.xlu0 %496  ;;  %v850_v27 = vld [vmem:[#allocation2 + $0xb8] sm:$0xff]  ;;  %v851_v50 = vld [vmem:[#allocation2 + $0xc0] sm:$0xff] }
 0x186   :  { %564 = vst.msk [vmem:[#allocation2 + $0xd8] sm:$0xff] %vm536_vm2, %v495_v21  ;;  %565 = vst.msk [vmem:[#allocation2 + $0xe0] sm:$0xff] %vm536_vm2, %v497_v24  ;;  %v933_v2 = vpack.c.bf16 %v912_v26, %v911_v13  ;;  %v5458_v3 = vadd.f32 %v850_v27, %v5174_v10  ;;  %v5468_v34 = vadd.f32 %v851_v50, %v5177_v11 }
 0x187   :  { %740 = vrot.lane.b32.xlu1 %v5167_v7, %s4912_s19  ;;  %742 = vrot.lane.b32.xlu0 %v5164_v6, %s4912_s19 }
 0x188   :  { %4471 = vmatprep.mubr.msk.bf16.mxu1 %vm536_vm2, %v933_v2  ;;  %v914_v35 = vmax.f32 %v5458_v3, 0.0  ;;  %v915_v54 = vmax.f32 %v5468_v34, 0.0 }
 0x189   :  { %v499_v36 = vpop.permute.xlu1 %498  ;;  %v501_v37 = vpop.permute.xlu0 %500  ;;  %v852_v44 = vld [vmem:[#allocation2 + $0xc8] sm:$0xff]  ;;  %v853_v55 = vld [vmem:[#allocation2 + $0xd0] sm:$0xff] }
 0x18a   :  { %566 = vst.msk [vmem:[#allocation2 + $0xe8] sm:$0xff] %vm536_vm2, %v499_v36  ;;  %567 = vst.msk [vmem:[#allocation2 + $0xf0] sm:$0xff] %vm536_vm2, %v501_v37  ;;  %v934_v7 = vpack.c.bf16 %v914_v35, %v913_v29  ;;  %v5473_v6 = vadd.f32 %v852_v44, %v5187_v15  ;;  %v5483_v48 = vadd.f32 %v853_v55, %v5184_v14 }
 0x18b   :  { %744 = vrot.lane.b32.xlu1 %v5174_v10, %s4912_s19  ;;  %746 = vrot.lane.b32.xlu0 %v5177_v11, %s4912_s19 }
 0x18c   :  { %4472 = vmatmul.mubr.msk.bf16.gmra.mxu1 %vm536_vm2, %v934_v7  ;;  %v916_v45 = vmax.f32 %v5473_v6, 0.0  ;;  %v917_v0 = vmax.f32 %v5483_v48, 0.0 }
 0x18d   :  { %v503_v57 = vpop.permute.xlu1 %502  ;;  %v570_v60 = vpop.permute.xlu0 %569  ;;  %v854_v61 = vld [vmem:[#allocation2 + $0xd8] sm:$0xff]  ;;  %v855_v42 = vld [vmem:[#allocation2 + $0xe0] sm:$0xff] }
 0x18e   :  { %568 = vst.msk [vmem:[#allocation2 + $0xf8] sm:$0xff] %vm536_vm2, %v503_v57  ;;  %666 = vst.msk [vmem:[#allocation2 + $0x100] sm:$0xff] %vm536_vm2, %v570_v60  ;;  %v935_v10 = vpack.c.bf16 %v916_v45, %v915_v54  ;;  %v5488_v11 = vadd.f32 %v854_v61, %v5194_v18  ;;  %v5501_v8 = vadd.f32 %v855_v42, %v5197_v19 }
 0x18f   :  { %748 = vrot.lane.b32.xlu1 %v5187_v15, %s4912_s19  ;;  %750 = vrot.lane.b32.xlu0 %v5184_v14, %s4912_s19 }
 0x190   :  { %4475 = vmatprep.mubr.msk.bf16.mxu1 %vm536_vm2, %v935_v10  ;;  %v918_v1 = vmax.f32 %v5488_v11, 0.0  ;;  %v919_v13 = vmax.f32 %v5501_v8, 0.0 }
 0x191   :  { %v572_v9 = vpop.permute.xlu1 %571  ;;  %v574_v12 = vpop.permute.xlu0 %573  ;;  %v856_v47 = vld [vmem:[#allocation2 + $0xe8] sm:$0xff]  ;;  %v857_v63 = vld [vmem:[#allocation2 + $0xf0] sm:$0xff] }
 0x192   :  { %667 = vst.msk [vmem:[#allocation2 + $0x108] sm:$0xff] %vm536_vm2, %v572_v9  ;;  %668 = vst.msk [vmem:[#allocation2 + $0x110] sm:$0xff] %vm536_vm2, %v574_v12  ;;  %v936_v14 = vpack.c.bf16 %v918_v1, %v917_v0  ;;  %v5506_v15 = vadd.f32 %v856_v47, %v5207_v23  ;;  %v5516_v21 = vadd.f32 %v857_v63, %v5204_v22 }
 0x193   :  { %752 = vrot.lane.b32.xlu1 %v5194_v18, %s4912_s19  ;;  %754 = vrot.lane.b32.xlu0 %v5197_v19, %s4912_s19 }
 0x194   :  { %4476 = vmatmul.mubr.msk.bf16.gmra.mxu1 %vm536_vm2, %v936_v14  ;;  %v920_v26 = vmax.f32 %v5506_v15, 0.0  ;;  %v921_v19 = vmax.f32 %v5516_v21, 0.0 }
 0x195   :  { %v576_v24 = vpop.permute.xlu1 %575  ;;  %v578_v27 = vpop.permute.xlu0 %577  ;;  %v858_v50 = vld [vmem:[#allocation2 + $0xf8] sm:$0xff] }
 0x196   :  { %669 = vst.msk [vmem:[#allocation2 + $0x118] sm:$0xff] %vm536_vm2, %v576_v24  ;;  %670 = vst.msk [vmem:[#allocation2 + $0x120] sm:$0xff] %vm536_vm2, %v578_v27  ;;  %v937_v18 = vpack.c.bf16 %v920_v26, %v919_v13  ;;  %v5521_v2 = vadd.f32 %v858_v50, %v5214_v25 }
 0x197   :  { %756 = vrot.lane.b32.xlu1 %v5207_v23, %s4912_s19  ;;  %758 = vrot.lane.b32.xlu0 %v5204_v22, %s4912_s19 }
 0x198   :  { %4479 = vmatprep.mubr.msk.bf16.mxu1 %vm536_vm2, %v937_v18  ;;  %v922_v29 = vmax.f32 %v5521_v2, 0.0 }
 0x199   :  { %v580_v35 = vpop.permute.xlu1 %579  ;;  %v582_v36 = vpop.permute.xlu0 %581 }
 0x19a   :  { %671 = vst.msk [vmem:[#allocation2 + $0x128] sm:$0xff] %vm536_vm2, %v580_v35  ;;  %672 = vst.msk [vmem:[#allocation2 + $0x130] sm:$0xff] %vm536_vm2, %v582_v36  ;;  %v938_v37 = vpack.c.bf16 %v922_v29, %v921_v19 }
 0x19b   :  { %760 = vrot.lane.b32.xlu1 %v5214_v25, %s4912_s19 }
 0x19c   :  { %4480 = vmatmul.mubr.msk.bf16.gmra.mxu1 %vm536_vm2, %v938_v37 }
 0x19d   :  { %v584_v23 = vpop.permute.xlu1 %583  ;;  %v586_v22 = vpop.permute.xlu0 %585 }
 0x19e   :  { %673 = vst.msk [vmem:[#allocation2 + $0x138] sm:$0xff] %vm536_vm2, %v584_v23  ;;  %674 = vst.msk [vmem:[#allocation2 + $0x140] sm:$0xff] %vm536_vm2, %v586_v22 }
 0x1a1   :  { %v588_v44 = vpop.permute.xlu1 %587  ;;  %v590_v55 = vpop.permute.xlu0 %589 }
 0x1a2   :  { %675 = vst.msk [vmem:[#allocation2 + $0x148] sm:$0xff] %vm536_vm2, %v588_v44  ;;  %676 = vst.msk [vmem:[#allocation2 + $0x150] sm:$0xff] %vm536_vm2, %v590_v55 }
 0x1a5   :  { %v592_v7 = vpop.permute.xlu1 %591  ;;  %v594_v54 = vpop.permute.xlu0 %593 }
 0x1a6   :  { %677 = vst.msk [vmem:[#allocation2 + $0x158] sm:$0xff] %vm536_vm2, %v592_v7  ;;  %678 = vst.msk [vmem:[#allocation2 + $0x160] sm:$0xff] %vm536_vm2, %v594_v54 }
 0x1a9   :  { %v596_v25 = vpop.permute.xlu1 %595  ;;  %v598_v45 = vpop.permute.xlu0 %597 }
 0x1aa   :  { %679 = vst.msk [vmem:[#allocation2 + $0x168] sm:$0xff] %vm536_vm2, %v596_v25  ;;  %680 = vst.msk [vmem:[#allocation2 + $0x170] sm:$0xff] %vm536_vm2, %v598_v45 }
 0x1ad   :  { %v600_v57 = vpop.permute.xlu1 %599  ;;  %v602_v60 = vpop.permute.xlu0 %601 }
 0x1ae   :  { %681 = vst.msk [vmem:[#allocation2 + $0x178] sm:$0xff] %vm536_vm2, %v600_v57  ;;  %682 = vst.msk [vmem:[#allocation2 + $0x180] sm:$0xff] %vm536_vm2, %v602_v60 }
 0x1b1   :  { %v604_v61 = vpop.permute.xlu1 %603  ;;  %v606_v42 = vpop.permute.xlu0 %605 }
 0x1b2   :  { %683 = vst.msk [vmem:[#allocation2 + $0x188] sm:$0xff] %vm536_vm2, %v604_v61  ;;  %684 = vst.msk [vmem:[#allocation2 + $0x190] sm:$0xff] %vm536_vm2, %v606_v42 }
 0x1b5   :  { %v608_v10 = vpop.permute.xlu1 %607  ;;  %v610_v58 = vpop.permute.xlu0 %609 }
 0x1b6   :  { %685 = vst.msk [vmem:[#allocation2 + $0x198] sm:$0xff] %vm536_vm2, %v608_v10  ;;  %686 = vst.msk [vmem:[#allocation2 + $0x1a0] sm:$0xff] %vm536_vm2, %v610_v58 }
 0x1b9   :  { %v612_v0 = vpop.permute.xlu1 %611  ;;  %v614_v1 = vpop.permute.xlu0 %613 }
 0x1ba   :  { %687 = vst.msk [vmem:[#allocation2 + $0x1a8] sm:$0xff] %vm536_vm2, %v612_v0  ;;  %688 = vst.msk [vmem:[#allocation2 + $0x1b0] sm:$0xff] %vm536_vm2, %v614_v1 }
 0x1bd   :  { %v616_v9 = vpop.permute.xlu1 %615  ;;  %v618_v12 = vpop.permute.xlu0 %617 }
 0x1be   :  { %689 = vst.msk [vmem:[#allocation2 + $0x1b8] sm:$0xff] %vm536_vm2, %v616_v9  ;;  %690 = vst.msk [vmem:[#allocation2 + $0x1c0] sm:$0xff] %vm536_vm2, %v618_v12 }
 0x1c1   :  { %v620_v47 = vpop.permute.xlu1 %619  ;;  %v622_v63 = vpop.permute.xlu0 %621 }
 0x1c2   :  { %691 = vst.msk [vmem:[#allocation2 + $0x1c8] sm:$0xff] %vm536_vm2, %v620_v47  ;;  %692 = vst.msk [vmem:[#allocation2 + $0x1d0] sm:$0xff] %vm536_vm2, %v622_v63 }
 0x1c5   :  { %v624_v14 = vpop.permute.xlu1 %623  ;;  %v626_v13 = vpop.permute.xlu0 %625 }
 0x1c6   :  { %693 = vst.msk [vmem:[#allocation2 + $0x1d8] sm:$0xff] %vm536_vm2, %v624_v14  ;;  %694 = vst.msk [vmem:[#allocation2 + $0x1e0] sm:$0xff] %vm536_vm2, %v626_v13 }
 0x1c9   :  { %v628_v26 = vpop.permute.xlu1 %627  ;;  %v630_v24 = vpop.permute.xlu0 %629 }
 0x1ca   :  { %695 = vst.msk [vmem:[#allocation2 + $0x1e8] sm:$0xff] %vm536_vm2, %v628_v26  ;;  %696 = vst.msk [vmem:[#allocation2 + $0x1f0] sm:$0xff] %vm536_vm2, %v630_v24 }
 0x1cd   :  { %v632_v27 = vpop.permute.xlu1 %631  ;;  %v699_v50 = vpop.permute.xlu0 %698 }
 0x1ce   :  { %697 = vst.msk [vmem:[#allocation2 + $0x1f8] sm:$0xff] %vm536_vm2, %v632_v27  ;;  %795 = vst.msk [vmem:[#allocation2 + $0x200] sm:$0xff] %vm536_vm2, %v699_v50 }
 0x1d1   :  { %v701_v18 = vpop.permute.xlu1 %700  ;;  %v703_v19 = vpop.permute.xlu0 %702 }
 0x1d2   :  { %796 = vst.msk [vmem:[#allocation2 + $0x208] sm:$0xff] %vm536_vm2, %v701_v18  ;;  %797 = vst.msk [vmem:[#allocation2 + $0x210] sm:$0xff] %vm536_vm2, %v703_v19  ;;  %v5595_v19 = vld [vmem:[%s6635_s5] ss:$0 sm:$0xff] }
 0x1d5   :  { %v705_v29 = vpop.permute.xlu1 %704  ;;  %v707_v35 = vpop.permute.xlu0 %706 }
 0x1d6   :  { %798 = vst.msk [vmem:[#allocation2 + $0x218] sm:$0xff] %vm536_vm2, %v705_v29  ;;  %799 = vst.msk [vmem:[#allocation2 + $0x220] sm:$0xff] %vm536_vm2, %v707_v35 }
 0x1d9   :  { %v709_v36 = vpop.permute.xlu1 %708  ;;  %v711_v37 = vpop.permute.xlu0 %710 }
 0x1da   :  { %800 = vst.msk [vmem:[#allocation2 + $0x228] sm:$0xff] %vm536_vm2, %v709_v36  ;;  %801 = vst.msk [vmem:[#allocation2 + $0x230] sm:$0xff] %vm536_vm2, %v711_v37 }
 0x1dd   :  { %v713_v23 = vpop.permute.xlu1 %712  ;;  %v715_v22 = vpop.permute.xlu0 %714 }
 0x1de   :  { %802 = vst.msk [vmem:[#allocation2 + $0x238] sm:$0xff] %vm536_vm2, %v713_v23  ;;  %803 = vst.msk [vmem:[#allocation2 + $0x240] sm:$0xff] %vm536_vm2, %v715_v22 }
 0x1e1   :  { %v717_v44 = vpop.permute.xlu1 %716  ;;  %v719_v55 = vpop.permute.xlu0 %718 }
 0x1e2   :  { %804 = vst.msk [vmem:[#allocation2 + $0x248] sm:$0xff] %vm536_vm2, %v717_v44  ;;  %805 = vst.msk [vmem:[#allocation2 + $0x250] sm:$0xff] %vm536_vm2, %v719_v55 }
 0x1e5   :  { %v721_v7 = vpop.permute.xlu1 %720  ;;  %v723_v54 = vpop.permute.xlu0 %722 }
 0x1e6   :  { %806 = vst.msk [vmem:[#allocation2 + $0x258] sm:$0xff] %vm536_vm2, %v721_v7  ;;  %807 = vst.msk [vmem:[#allocation2 + $0x260] sm:$0xff] %vm536_vm2, %v723_v54 }
 0x1e9   :  { %v725_v25 = vpop.permute.xlu1 %724  ;;  %v727_v45 = vpop.permute.xlu0 %726 }
 0x1ea   :  { %808 = vst.msk [vmem:[#allocation2 + $0x268] sm:$0xff] %vm536_vm2, %v725_v25  ;;  %809 = vst.msk [vmem:[#allocation2 + $0x270] sm:$0xff] %vm536_vm2, %v727_v45 }
 0x1ed   :  { %v729_v57 = vpop.permute.xlu1 %728  ;;  %v731_v60 = vpop.permute.xlu0 %730 }
 0x1ee   :  { %810 = vst.msk [vmem:[#allocation2 + $0x278] sm:$0xff] %vm536_vm2, %v729_v57  ;;  %811 = vst.msk [vmem:[#allocation2 + $0x280] sm:$0xff] %vm536_vm2, %v731_v60 }
 0x1f1   :  { %v733_v61 = vpop.permute.xlu1 %732  ;;  %v735_v42 = vpop.permute.xlu0 %734 }
 0x1f2   :  { %812 = vst.msk [vmem:[#allocation2 + $0x288] sm:$0xff] %vm536_vm2, %v733_v61  ;;  %813 = vst.msk [vmem:[#allocation2 + $0x290] sm:$0xff] %vm536_vm2, %v735_v42 }
 0x1f5   :  { %v737_v10 = vpop.permute.xlu1 %736  ;;  %v739_v58 = vpop.permute.xlu0 %738 }
 0x1f6   :  { %814 = vst.msk [vmem:[#allocation2 + $0x298] sm:$0xff] %vm536_vm2, %v737_v10  ;;  %815 = vst.msk [vmem:[#allocation2 + $0x2a0] sm:$0xff] %vm536_vm2, %v739_v58 }
 0x1f9   :  { %v741_v0 = vpop.permute.xlu1 %740  ;;  %v743_v1 = vpop.permute.xlu0 %742 }
 0x1fa   :  { %816 = vst.msk [vmem:[#allocation2 + $0x2a8] sm:$0xff] %vm536_vm2, %v741_v0  ;;  %817 = vst.msk [vmem:[#allocation2 + $0x2b0] sm:$0xff] %vm536_vm2, %v743_v1 }
 0x1fd   :  { %v745_v9 = vpop.permute.xlu1 %744  ;;  %v747_v12 = vpop.permute.xlu0 %746 }
 0x1fe   :  { %818 = vst.msk [vmem:[#allocation2 + $0x2b8] sm:$0xff] %vm536_vm2, %v745_v9  ;;  %819 = vst.msk [vmem:[#allocation2 + $0x2c0] sm:$0xff] %vm536_vm2, %v747_v12 }
 0x201   :  { %v749_v47 = vpop.permute.xlu1 %748  ;;  %v751_v63 = vpop.permute.xlu0 %750 }
 0x202   :  { %820 = vst.msk [vmem:[#allocation2 + $0x2c8] sm:$0xff] %vm536_vm2, %v749_v47  ;;  %821 = vst.msk [vmem:[#allocation2 + $0x2d0] sm:$0xff] %vm536_vm2, %v751_v63 }
 0x205   :  { %v753_v14 = vpop.permute.xlu1 %752  ;;  %v755_v13 = vpop.permute.xlu0 %754 }
 0x206   :  { %822 = vst.msk [vmem:[#allocation2 + $0x2d8] sm:$0xff] %vm536_vm2, %v753_v14  ;;  %823 = vst.msk [vmem:[#allocation2 + $0x2e0] sm:$0xff] %vm536_vm2, %v755_v13 }
 0x209   :  { %v757_v26 = vpop.permute.xlu1 %756  ;;  %v759_v24 = vpop.permute.xlu0 %758 }
 0x20a   :  { %824 = vst.msk [vmem:[#allocation2 + $0x2e8] sm:$0xff] %vm536_vm2, %v757_v26  ;;  %825 = vst.msk [vmem:[#allocation2 + $0x2f0] sm:$0xff] %vm536_vm2, %v759_v24 }
 0x20d   :  { %v761_v27 = vpop.permute.xlu1 %760 }
 0x20e   :  { %826 = vst.msk [vmem:[#allocation2 + $0x2f8] sm:$0xff] %vm536_vm2, %v761_v27 }
 0x221   :  { %v4453_v50 = vpop.f32.mrf.mxu0 }
 0x222   :  { %v1053_v37 = vadd.f32 %v4453_v50, %v5595_v19 }
 0x223   :  { %v1044_v18 = vpop.f32.mrf.mxu0 }
 0x224   :  { %v1045_v35 = vadd.f32 %v5595_v19, %v1044_v18  ;;  %v1173_v54 = vmax.f32 %v1053_v37, 0.0 }
 0x225   :  { %v4454_v29 = vpop.f32.mrf.mxu0 }
 0x226   :  { %v1056_v36 = vadd.f32 %v4454_v29, %v5595_v19  ;;  %v1171_v55 = vmax.f32 %v1045_v35, 0.0 }
 0x227   :  { %v1047_v23 = vpop.f32.mrf.mxu0 }
 0x228   :  { %v1048_v22 = vadd.f32 %v5595_v19, %v1047_v23  ;;  %v1174_v44 = vmax.f32 %v1056_v36, 0.0 }
 0x22a   :  { %v1172_v7 = vmax.f32 %v1048_v22, 0.0  ;;  %v1204_v57 = vpack.c.bf16 %v1174_v44, %v1173_v54 }
 0x22c   :  { %v1203_v25 = vpack.c.bf16 %v1172_v7, %v1171_v55  ;;  %v4457_v45 = vpop.f32.mrf.mxu1 }
 0x22d   :  { %v1069_v58 = vadd.f32 %v4457_v45, %v5595_v19 }
 0x22e   :  { %v1060_v60 = vpop.f32.mrf.mxu1  ;;  %4487 = vmatprep.mubr.msk.bf16.mxu1 %vm536_vm2, %v1203_v25 }
 0x22f   :  { %4488 = vmatmul.mubr.msk.bf16.vlgmr.msra.gmra.mxu1 %vm536_vm2, %v1204_v57  ;;  %v1061_v42 = vadd.f32 %v5595_v19, %v1060_v60  ;;  %v1177_v14 = vmax.f32 %v1069_v58, 0.0 }
 0x230   :  { %v4458_v61 = vpop.f32.mrf.mxu1 }
 0x231   :  { %v1072_v10 = vadd.f32 %v4458_v61, %v5595_v19  ;;  %v1175_v47 = vmax.f32 %v1061_v42, 0.0 }
 0x232   :  { %v1063_v0 = vpop.f32.mrf.mxu1 }
 0x233   :  { %v1064_v1 = vadd.f32 %v5595_v19, %v1063_v0  ;;  %v1178_v9 = vmax.f32 %v1072_v10, 0.0 }
 0x234   :  { %v4461_v12 = vpop.f32.mrf.mxu1 }
 0x235   :  { %v1176_v63 = vmax.f32 %v1064_v1, 0.0  ;;  %v1206_v24 = vpack.c.bf16 %v1178_v9, %v1177_v14  ;;  %v1085_v29 = vadd.f32 %v4461_v12, %v5595_v19 }
 0x236   :  { %v1076_v13 = vpop.f32.mrf.mxu1 }
 0x237   :  { %v1205_v26 = vpack.c.bf16 %v1176_v63, %v1175_v47  ;;  %v1077_v50 = vadd.f32 %v5595_v19, %v1076_v13  ;;  %v1181_v55 = vmax.f32 %v1085_v29, 0.0 }
 0x238   :  { %v4462_v27 = vpop.f32.mrf.mxu1 }
 0x239   :  { %v1088_v18 = vadd.f32 %v4462_v27, %v5595_v19  ;;  %4491 = vmatprep.mubr.msk.bf16.mxu1 %vm536_vm2, %v1205_v26  ;;  %v1179_v22 = vmax.f32 %v1077_v50, 0.0 }
 0x23a   :  { %v1079_v35 = vpop.f32.mrf.mxu1  ;;  %4492 = vmatmul.mubr.msk.bf16.gmra.mxu1 %vm536_vm2, %v1206_v24 }
 0x23b   :  { %v1080_v36 = vadd.f32 %v5595_v19, %v1079_v35  ;;  %v1182_v37 = vmax.f32 %v1088_v18, 0.0 }
 0x23c   :  { %v4465_v23 = vpop.f32.mrf.mxu1 }
 0x23d   :  { %v1180_v44 = vmax.f32 %v1080_v36, 0.0  ;;  %v1208_v25 = vpack.c.bf16 %v1182_v37, %v1181_v55  ;;  %v1101_v61 = vadd.f32 %v4465_v23, %v5595_v19 }
 0x23e   :  { %v1092_v7 = vpop.f32.mrf.mxu1 }
 0x23f   :  { %v1207_v54 = vpack.c.bf16 %v1180_v44, %v1179_v22  ;;  %v1093_v57 = vadd.f32 %v5595_v19, %v1092_v7  ;;  %v1185_v12 = vmax.f32 %v1101_v61, 0.0 }
 0x240   :  { %v4466_v45 = vpop.f32.mrf.mxu1 }
 0x241   :  { %v1104_v60 = vadd.f32 %v4466_v45, %v5595_v19  ;;  %4495 = vmatprep.mubr.msk.bf16.mxu1 %vm536_vm2, %v1207_v54  ;;  %v1183_v1 = vmax.f32 %v1093_v57, 0.0 }
 0x242   :  { %v1095_v42 = vpop.f32.mrf.mxu1  ;;  %4496 = vmatmul.mubr.msk.bf16.gmra.mxu1 %vm536_vm2, %v1208_v25 }
 0x243   :  { %v1096_v10 = vadd.f32 %v5595_v19, %v1095_v42  ;;  %v1186_v58 = vmax.f32 %v1104_v60, 0.0 }
 0x244   :  { %v4469_v0 = vpop.f32.mrf.mxu1 }
 0x245   :  { %v1184_v9 = vmax.f32 %v1096_v10, 0.0  ;;  %v1210_v14 = vpack.c.bf16 %v1186_v58, %v1185_v12  ;;  %v1117_v27 = vadd.f32 %v4469_v0, %v5595_v19 }
 0x246   :  { %v1108_v47 = vpop.f32.mrf.mxu1 }
 0x247   :  { %v1209_v63 = vpack.c.bf16 %v1184_v9, %v1183_v1  ;;  %v1109_v26 = vadd.f32 %v5595_v19, %v1108_v47  ;;  %v1189_v23 = vmax.f32 %v1117_v27, 0.0 }
 0x248   :  { %v4470_v13 = vpop.f32.mrf.mxu1 }
 0x249   :  { %v1120_v24 = vadd.f32 %v4470_v13, %v5595_v19  ;;  %4499 = vmatprep.mubr.msk.bf16.mxu1 %vm536_vm2, %v1209_v63  ;;  %v1187_v36 = vmax.f32 %v1109_v26, 0.0 }
 0x24a   :  { %v1111_v50 = vpop.f32.mrf.mxu1  ;;  %4500 = vmatmul.mubr.msk.bf16.gmra.mxu1 %vm536_vm2, %v1210_v14 }
 0x24b   :  { %v1112_v18 = vadd.f32 %v5595_v19, %v1111_v50  ;;  %v1190_v29 = vmax.f32 %v1120_v24, 0.0 }
 0x24c   :  { %v4473_v35 = vpop.f32.mrf.mxu1 }
 0x24d   :  { %v1188_v37 = vmax.f32 %v1112_v18, 0.0  ;;  %v1212_v55 = vpack.c.bf16 %v1190_v29, %v1189_v23  ;;  %v1133_v45 = vadd.f32 %v4473_v35, %v5595_v19 }
 0x24e   :  { %v1124_v22 = vpop.f32.mrf.mxu1 }
 0x24f   :  { %v1211_v44 = vpack.c.bf16 %v1188_v37, %v1187_v36  ;;  %v1125_v54 = vadd.f32 %v5595_v19, %v1124_v22  ;;  %v1193_v0 = vmax.f32 %v1133_v45, 0.0 }
 0x250   :  { %v4474_v7 = vpop.f32.mrf.mxu1 }
 0x251   :  { %v1136_v25 = vadd.f32 %v4474_v7, %v5595_v19  ;;  %4503 = vmatprep.mubr.msk.bf16.mxu1 %vm536_vm2, %v1211_v44  ;;  %v1191_v10 = vmax.f32 %v1125_v54, 0.0 }
 0x252   :  { %v1127_v57 = vpop.f32.mrf.mxu1  ;;  %4504 = vmatmul.mubr.msk.bf16.gmra.mxu1 %vm536_vm2, %v1212_v55 }
 0x253   :  { %v1128_v60 = vadd.f32 %v5595_v19, %v1127_v57  ;;  %v1194_v61 = vmax.f32 %v1136_v25, 0.0 }
 0x254   :  { %v4477_v42 = vpop.f32.mrf.mxu1 }
 0x255   :  { %v1192_v58 = vmax.f32 %v1128_v60, 0.0  ;;  %v1214_v12 = vpack.c.bf16 %v1194_v61, %v1193_v0  ;;  %v1149_v13 = vadd.f32 %v4477_v42, %v5595_v19  ;;  %v4798_v0 = vld [vmem:[%s6634_s6 + $0x18] sm:$0xff]  }
 0x256   :  { %v1140_v1 = vpop.f32.mrf.mxu1  ;;  %4555 = vmatprep.subr.bf16.mxu1 %v4798_v0 }
 0x257   :  { %v1213_v9 = vpack.c.bf16 %v1192_v58, %v1191_v10  ;;  %v1141_v63 = vadd.f32 %v5595_v19, %v1140_v1  ;;  %v1197_v35 = vmax.f32 %v1149_v13, 0.0  ;;  %v4796_v58 = vld [vmem:[%s6632_s4 + $0x18] sm:$0xff]   ;;  %v4799_v1 = vld [vmem:[%s6634_s6 + $0x10] sm:$0xff]   ;;  %4556 = vmatpush3.bf16.msra.mxu1 %v4798_v0 }
 0x258   :  { %v4478_v47 = vpop.f32.mrf.mxu1  ;;  %4519 = vmatprep.subr.bf16.mxu0 %v4796_v58  ;;  %4557 = vmatprep.subr.bf16.mxu1 %v4799_v1 }
 0x259   :  { %v1152_v14 = vadd.f32 %v4478_v47, %v5595_v19  ;;  %4507 = vmatprep.mubr.msk.bf16.mxu1 %vm536_vm2, %v1213_v9  ;;  %v1195_v18 = vmax.f32 %v1141_v63, 0.0  ;;  %4520 = vmatpush3.bf16.msra.mxu0 %v4796_v58  ;;  %v5660_v9 = vld [vmem:[%s6636_s7] ss:$0 sm:$0xff] }
 0x25a   :  { %v1143_v26 = vpop.f32.mrf.mxu1  ;;  %4508 = vmatmul.mubr.msk.bf16.gmra.mxu1 %vm536_vm2, %v1214_v12 }
 0x25b   :  { %v1144_v24 = vadd.f32 %v5595_v19, %v1143_v26  ;;  %v1198_v27 = vmax.f32 %v1152_v14, 0.0  ;;  %4558 = vmatpush3.bf16.msra.mxu1 %v4799_v1 }
 0x25c   :  { %v4481_v50 = vpop.f32.mrf.mxu1 }
 0x25d   :  { %v1196_v29 = vmax.f32 %v1144_v24, 0.0  ;;  %v1216_v23 = vpack.c.bf16 %v1198_v27, %v1197_v35  ;;  %v1165_v7 = vadd.f32 %v4481_v50, %v5595_v19  ;;  %v1483_v35 = vld [vmem:[#allocation2 + $0x100] sm:$0xff] }
 0x25e   :  { %v1156_v36 = vpop.f32.mrf.mxu1 }
 0x25f   :  { %v1215_v37 = vpack.c.bf16 %v1196_v29, %v1195_v18  ;;  %v1157_v44 = vadd.f32 %v5595_v19, %v1156_v36  ;;  %v1201_v61 = vmax.f32 %v1165_v7, 0.0  ;;  %v1486_v36 = vld [vmem:[#allocation2 + $0x118] sm:$0xff] }
 0x260   :  { %v4482_v22 = vpop.f32.mrf.mxu1 }
 0x261   :  { %v1168_v55 = vadd.f32 %v4482_v22, %v5595_v19  ;;  %4511 = vmatprep.mubr.msk.bf16.mxu1 %vm536_vm2, %v1215_v37  ;;  %v1199_v57 = vmax.f32 %v1157_v44, 0.0  ;;  %v1485_v37 = vld [vmem:[#allocation2 + $0x110] sm:$0xff] }
 0x262   :  { %v1159_v54 = vpop.f32.mrf.mxu1  ;;  %4512 = vmatmul.mubr.msk.bf16.gmra.mxu1 %vm536_vm2, %v1216_v23 }
 0x263   :  { %v1160_v25 = vadd.f32 %v5595_v19, %v1159_v54  ;;  %v1202_v45 = vmax.f32 %v1168_v55, 0.0  ;;  %v4797_v19 = vld [vmem:[%s6632_s4 + $0x10] sm:$0xff]  }
 0x264   :  { %4521 = vmatprep.subr.bf16.mxu0 %v4797_v19 }
 0x265   :  { %v1200_v60 = vmax.f32 %v1160_v25, 0.0  ;;  %v1218_v10 = vpack.c.bf16 %v1202_v45, %v1201_v61  ;;  %4522 = vmatpush3.bf16.msra.mxu0 %v4797_v19 }
 0x267   :  { %v1217_v42 = vpack.c.bf16 %v1200_v60, %v1199_v57 }
 0x269   :  { %4515 = vmatprep.mubr.msk.bf16.mxu1 %vm536_vm2, %v1217_v42 }
 0x26a   :  { %4516 = vmatmul.mubr.msk.bf16.gmra.mxu1 %vm536_vm2, %v1218_v10 }
 0x2ef   :  { %v4489_v12 = vpop.f32.mrf.mxu1 }
 0x2f0   :  { %v1333_v47 = vadd.f32 %v4489_v12, %v5660_v9 }
 0x2f1   :  { %v1324_v63 = vpop.f32.mrf.mxu1 }
 0x2f2   :  { %v1325_v14 = vadd.f32 %v5660_v9, %v1324_v63  ;;  %v1453_v27 = vadd.f32 %v1333_v47, %v5292_v49  ;;  %v1490_v63 = vld [vmem:[#allocation2 + $0x138] sm:$0xff] }
 0x2f3   :  { %v4490_v13 = vpop.f32.mrf.mxu1 }
 0x2f4   :  { %v1451_v26 = vadd.f32 %v1325_v14, %v5286_v40  ;;  %v1336_v24 = vadd.f32 %v4490_v13, %v5660_v9  ;;  %v5674_v55 = vadd.f32 %v1485_v37, %v1453_v27  ;;  %v1484_v40 = vld [vmem:[#allocation2 + $0x108] sm:$0xff]  ;;  %v1487_v13 = vld [vmem:[#allocation2 + $0x120] sm:$0xff]  ;;  %v1489_v27 = vld [vmem:[#allocation2 + $0x130] sm:$0xff] }
 0x2f5   :  { %v1327_v50 = vpop.f32.mrf.mxu1 }
 0x2f6   :  { %v1454_v18 = vadd.f32 %v1336_v24, %v5289_v41  ;;  %v1328_v29 = vadd.f32 %v5660_v9, %v1327_v50  ;;  %v5669_v23 = vadd.f32 %v1483_v35, %v1451_v26  ;;  %v1549_v57 = vmax.f32 %v5674_v55, 0.0  ;;  %v1488_v50 = vld [vmem:[#allocation2 + $0x128] sm:$0xff] }
 0x2f8   :  { %v5671_v22 = vadd.f32 %v1486_v36, %v1454_v18  ;;  %v1452_v44 = vadd.f32 %v1328_v29, %v5297_v52  ;;  %v1547_v41 = vmax.f32 %v5669_v23, 0.0 }
 0x2fa   :  { %v5676_v7 = vadd.f32 %v1484_v40, %v1452_v44  ;;  %v4493_v49 = vpop.f32.mrf.mxu1  ;;  %v1550_v54 = vmax.f32 %v5671_v22, 0.0 }
 0x2fb   :  { %v1349_v60 = vadd.f32 %v4493_v49, %v5660_v9 }
 0x2fc   :  { %v1548_v25 = vmax.f32 %v5676_v7, 0.0  ;;  %v1340_v45 = vpop.f32.mrf.mxu1  ;;  %v1580_v10 = vpack.c.bf16 %v1550_v54, %v1549_v57 }
 0x2fd   :  { %v1341_v61 = vadd.f32 %v5660_v9, %v1340_v45  ;;  %v1457_v1 = vadd.f32 %v1349_v60, %v5330_v17  ;;  %v1494_v60 = vld [vmem:[#allocation2 + $0x158] sm:$0xff] }
 0x2fe   :  { %v4494_v52 = vpop.f32.mrf.mxu1  ;;  %v1579_v42 = vpack.c.bf16 %v1548_v25, %v1547_v41 }
 0x2ff   :  { %v1352_v58 = vadd.f32 %v4494_v52, %v5660_v9  ;;  %v1455_v19 = vadd.f32 %v1341_v61, %v5315_v5  ;;  %v5696_v29 = vadd.f32 %v1489_v27, %v1457_v1  ;;  %v1492_v1 = vld [vmem:[#allocation2 + $0x148] sm:$0xff] }
 0x300   :  { %v1343_v0 = vpop.f32.mrf.mxu1  ;;  %4523 = vmatprep.mubr.msk.bf16.mxu0 %vm536_vm2, %v1579_v42  ;;  %v1491_v42 = vld [vmem:[#allocation2 + $0x140] sm:$0xff] }
 0x301   :  { %v1458_v12 = vadd.f32 %v1352_v58, %v5335_v30  ;;  %v1344_v47 = vadd.f32 %v5660_v9, %v1343_v0  ;;  %4524 = vmatmul.mubr.msk.bf16.vlgmr.msra.gmra.mxu0 %vm536_vm2, %v1580_v10  ;;  %v5694_v5 = vadd.f32 %v1487_v13, %v1455_v19  ;;  %v1553_v41 = vmax.f32 %v5696_v29, 0.0  ;;  %v1493_v0 = vld [vmem:[#allocation2 + $0x150] sm:$0xff] }
 0x302   :  { %v4497_v14 = vpop.f32.mrf.mxu1 }
 0x303   :  { %v5691_v26 = vadd.f32 %v1490_v63, %v1458_v12  ;;  %v1456_v24 = vadd.f32 %v1344_v47, %v5321_v32  ;;  %v1365_v30 = vadd.f32 %v4497_v14, %v5660_v9  ;;  %v1551_v40 = vmax.f32 %v5694_v5, 0.0 }
 0x304   :  { %v1356_v18 = vpop.f32.mrf.mxu1 }
 0x305   :  { %v5698_v17 = vadd.f32 %v1488_v50, %v1456_v24  ;;  %v1357_v35 = vadd.f32 %v5660_v9, %v1356_v18  ;;  %v1554_v37 = vmax.f32 %v5691_v26, 0.0  ;;  %v1461_v25 = vadd.f32 %v1365_v30, %v5360_v53 }
 0x306   :  { %v4498_v36 = vpop.f32.mrf.mxu1 }
 0x307   :  { %v1552_v44 = vmax.f32 %v5698_v17, 0.0  ;;  %v1368_v32 = vadd.f32 %v4498_v36, %v5660_v9  ;;  %v1459_v49 = vadd.f32 %v1357_v35, %v5345_v33  ;;  %v1582_v19 = vpack.c.bf16 %v1554_v37, %v1553_v41 }
 0x308   :  { %v1359_v54 = vpop.f32.mrf.mxu1  ;;  %v5717_v12 = vadd.f32 %v1493_v0, %v1461_v25 }
 0x309   :  { %v1462_v45 = vadd.f32 %v1368_v32, %v5365_v43  ;;  %v1360_v57 = vadd.f32 %v5660_v9, %v1359_v54  ;;  %v1581_v52 = vpack.c.bf16 %v1552_v44, %v1551_v40  ;;  %v5714_v33 = vadd.f32 %v1491_v42, %v1459_v49  ;;  %v1498_v44 = vld [vmem:[#allocation2 + $0x178] sm:$0xff]  ;;  %v1495_v49 = vld [vmem:[#allocation2 + $0x160] sm:$0xff] }
 0x30a   :  { %v4501_v61 = vpop.f32.mrf.mxu1  ;;  %v1557_v30 = vmax.f32 %v5717_v12, 0.0 }
 0x30b   :  { %v5711_v10 = vadd.f32 %v1494_v60, %v1462_v45  ;;  %v1460_v58 = vadd.f32 %v1360_v57, %v5350_v38  ;;  %4527 = vmatprep.mubr.msk.bf16.mxu0 %vm536_vm2, %v1581_v52  ;;  %v1381_v47 = vadd.f32 %v4501_v61, %v5660_v9  ;;  %v1555_v27 = vmax.f32 %v5714_v33, 0.0  ;;  %v1497_v45 = vld [vmem:[#allocation2 + $0x170] sm:$0xff]  ;;  %v1496_v57 = vld [vmem:[#allocation2 + $0x168] sm:$0xff] }
 0x30c   :  { %v1372_v53 = vpop.f32.mrf.mxu1  ;;  %4528 = vmatmul.mubr.msk.bf16.gmra.mxu0 %vm536_vm2, %v1582_v19 }
 0x30d   :  { %v5719_v43 = vadd.f32 %v1492_v1, %v1460_v58  ;;  %v1373_v63 = vadd.f32 %v5660_v9, %v1372_v53  ;;  %v1558_v38 = vmax.f32 %v5711_v10, 0.0  ;;  %v1465_v35 = vadd.f32 %v1381_v47, %v5390_v16 }
 0x30e   :  { %v4502_v14 = vpop.f32.mrf.mxu1 }
 0x30f   :  { %v1556_v13 = vmax.f32 %v5719_v43, 0.0  ;;  %v1384_v24 = vadd.f32 %v4502_v14, %v5660_v9  ;;  %v1463_v50 = vadd.f32 %v1373_v63, %v5375_v4  ;;  %v1584_v25 = vpack.c.bf16 %v1558_v38, %v1557_v30 }
 0x310   :  { %v1375_v18 = vpop.f32.mrf.mxu1  ;;  %v5739_v60 = vadd.f32 %v1497_v45, %v1465_v35 }
 0x311   :  { %v1466_v36 = vadd.f32 %v1384_v24, %v5395_v51  ;;  %v1376_v37 = vadd.f32 %v5660_v9, %v1375_v18  ;;  %v1583_v40 = vpack.c.bf16 %v1556_v13, %v1555_v27  ;;  %v5736_v4 = vadd.f32 %v1495_v49, %v1463_v50  ;;  %v1502_v13 = vld [vmem:[#allocation2 + $0x198] sm:$0xff]  ;;  %v1499_v50 = vld [vmem:[#allocation2 + $0x180] sm:$0xff] }
 0x312   :  { %v4505_v32 = vpop.f32.mrf.mxu1  ;;  %v1561_v47 = vmax.f32 %v5739_v60, 0.0 }
 0x313   :  { %v5733_v54 = vadd.f32 %v1498_v44, %v1466_v36  ;;  %v1464_v41 = vadd.f32 %v1376_v37, %v5380_v46  ;;  %4531 = vmatprep.mubr.msk.bf16.mxu0 %vm536_vm2, %v1583_v40  ;;  %v1397_v61 = vadd.f32 %v4505_v32, %v5660_v9  ;;  %v1559_v0 = vmax.f32 %v5736_v4, 0.0  ;;  %v1501_v36 = vld [vmem:[#allocation2 + $0x190] sm:$0xff]  ;;  %v1500_v37 = vld [vmem:[#allocation2 + $0x188] sm:$0xff] }
 0x314   :  { %v1388_v16 = vpop.f32.mrf.mxu1  ;;  %4532 = vmatmul.mubr.msk.bf16.gmra.mxu0 %vm536_vm2, %v1584_v25 }
 0x315   :  { %v5741_v51 = vadd.f32 %v1496_v57, %v1464_v41  ;;  %v1389_v52 = vadd.f32 %v5660_v9, %v1388_v16  ;;  %v1562_v46 = vmax.f32 %v5733_v54, 0.0  ;;  %v1469_v63 = vadd.f32 %v1397_v61, %v5423_v56 }
 0x316   :  { %v4506_v42 = vpop.f32.mrf.mxu1 }
 0x317   :  { %v1560_v58 = vmax.f32 %v5741_v51, 0.0  ;;  %v1400_v19 = vadd.f32 %v4506_v42, %v5660_v9  ;;  %v1467_v1 = vadd.f32 %v1389_v52, %v5405_v31  ;;  %v1586_v35 = vpack.c.bf16 %v1562_v46, %v1561_v47 }
 0x318   :  { %v1391_v53 = vpop.f32.mrf.mxu1  ;;  %v5761_v44 = vadd.f32 %v1501_v36, %v1469_v63 }
 0x319   :  { %v1470_v14 = vadd.f32 %v1400_v19, %v5428_v59  ;;  %v1392_v38 = vadd.f32 %v5660_v9, %v1391_v53  ;;  %v1585_v27 = vpack.c.bf16 %v1560_v58, %v1559_v0  ;;  %v5758_v31 = vadd.f32 %v1499_v50, %v1467_v1  ;;  %v1506_v58 = vld [vmem:[#allocation2 + $0x1b8] sm:$0xff]  ;;  %v1503_v1 = vld [vmem:[#allocation2 + $0x1a0] sm:$0xff] }
 0x31a   :  { %v4509_v24 = vpop.f32.mrf.mxu1  ;;  %v1565_v61 = vmax.f32 %v5761_v44, 0.0 }
 0x31b   :  { %v5755_v18 = vadd.f32 %v1502_v13, %v1470_v14  ;;  %v1468_v30 = vadd.f32 %v1392_v38, %v5413_v39  ;;  %4535 = vmatprep.mubr.msk.bf16.mxu0 %vm536_vm2, %v1585_v27  ;;  %v1413_v32 = vadd.f32 %v4509_v24, %v5660_v9  ;;  %v1563_v45 = vmax.f32 %v5758_v31, 0.0  ;;  %v1505_v14 = vld [vmem:[#allocation2 + $0x1b0] sm:$0xff]  ;;  %v1504_v38 = vld [vmem:[#allocation2 + $0x1a8] sm:$0xff] }
 0x31c   :  { %v1404_v56 = vpop.f32.mrf.mxu1  ;;  %4536 = vmatmul.mubr.msk.bf16.gmra.mxu0 %vm536_vm2, %v1586_v35 }
 0x31d   :  { %v5763_v59 = vadd.f32 %v1500_v37, %v1468_v30  ;;  %v1405_v40 = vadd.f32 %v5660_v9, %v1404_v56  ;;  %v1566_v39 = vmax.f32 %v5755_v18, 0.0  ;;  %v1473_v52 = vadd.f32 %v1413_v32, %v5453_v20 }
 0x31e   :  { %v4510_v49 = vpop.f32.mrf.mxu1 }
 0x31f   :  { %v1564_v41 = vmax.f32 %v5763_v59, 0.0  ;;  %v1416_v25 = vadd.f32 %v4510_v49, %v5660_v9  ;;  %v1471_v57 = vadd.f32 %v1405_v40, %v5438_v28  ;;  %v1588_v63 = vpack.c.bf16 %v1566_v39, %v1565_v61 }
 0x320   :  { %v1407_v16 = vpop.f32.mrf.mxu1  ;;  %v5783_v13 = vadd.f32 %v1505_v14, %v1473_v52 }
 0x321   :  { %v1474_v42 = vadd.f32 %v1416_v25, %v5458_v3  ;;  %v1408_v46 = vadd.f32 %v5660_v9, %v1407_v16  ;;  %v1587_v0 = vpack.c.bf16 %v1564_v41, %v1563_v45  ;;  %v5780_v28 = vadd.f32 %v1503_v1, %v1471_v57  ;;  %v1510_v41 = vld [vmem:[#allocation2 + $0x1d8] sm:$0xff]  ;;  %v1507_v57 = vld [vmem:[#allocation2 + $0x1c0] sm:$0xff] }
 0x322   :  { %v4513_v19 = vpop.f32.mrf.mxu1  ;;  %v1569_v32 = vmax.f32 %v5783_v13, 0.0 }
 0x323   :  { %v5777_v53 = vadd.f32 %v1506_v58, %v1474_v42  ;;  %v1472_v47 = vadd.f32 %v1408_v46, %v5443_v62  ;;  %4539 = vmatprep.mubr.msk.bf16.mxu0 %vm536_vm2, %v1587_v0  ;;  %v1429_v24 = vadd.f32 %v4513_v19, %v5660_v9  ;;  %v1567_v36 = vmax.f32 %v5780_v28, 0.0  ;;  %v1509_v42 = vld [vmem:[#allocation2 + $0x1d0] sm:$0xff]  ;;  %v1508_v46 = vld [vmem:[#allocation2 + $0x1c8] sm:$0xff] }
 0x324   :  { %v1420_v20 = vpop.f32.mrf.mxu1  ;;  %4540 = vmatmul.mubr.msk.bf16.gmra.mxu0 %vm536_vm2, %v1588_v63 }
 0x325   :  { %v5785_v3 = vadd.f32 %v1504_v38, %v1472_v47  ;;  %v1421_v27 = vadd.f32 %v5660_v9, %v1420_v20  ;;  %v1570_v62 = vmax.f32 %v5777_v53, 0.0  ;;  %v1477_v40 = vadd.f32 %v1429_v24, %v5483_v48 }
 0x326   :  { %v4514_v50 = vpop.f32.mrf.mxu1 }
 0x327   :  { %v1568_v30 = vmax.f32 %v5785_v3, 0.0  ;;  %v1432_v35 = vadd.f32 %v4514_v50, %v5660_v9  ;;  %v1475_v37 = vadd.f32 %v1421_v27, %v5468_v34  ;;  %v1590_v52 = vpack.c.bf16 %v1570_v62, %v1569_v32 }
 0x328   :  { %v1423_v56 = vpop.f32.mrf.mxu1  ;;  %v5805_v58 = vadd.f32 %v1509_v42, %v1477_v40  ;;  %v1513_v40 = vld [vmem:[#allocation2 + $0x1f0] sm:$0xff] }
 0x329   :  { %v1478_v49 = vadd.f32 %v1432_v35, %v5488_v11  ;;  %v1424_v39 = vadd.f32 %v5660_v9, %v1423_v56  ;;  %v1589_v45 = vpack.c.bf16 %v1568_v30, %v1567_v36  ;;  %v5802_v34 = vadd.f32 %v1507_v57, %v1475_v37  ;;  %v1511_v30 = vld [vmem:[#allocation2 + $0x1e0] sm:$0xff]  ;;  %v1514_v35 = vld [vmem:[#allocation2 + $0x1f8] sm:$0xff]  ;;  %v4800_v57 = vld [vmem:[%s6632_s4 + $0x28] sm:$0xff]  }
 0x32a   :  { %v4517_v25 = vpop.f32.mrf.mxu1  ;;  %v1573_v24 = vmax.f32 %v5805_v58, 0.0  ;;  %4591 = vmatprep.subr.bf16.mxu0 %v4800_v57 }
 0x32b   :  { %v5799_v16 = vadd.f32 %v1510_v41, %v1478_v49  ;;  %v1476_v61 = vadd.f32 %v1424_v39, %v5473_v6  ;;  %4543 = vmatprep.mubr.msk.bf16.mxu0 %vm536_vm2, %v1589_v45  ;;  %v1445_v19 = vadd.f32 %v4517_v25, %v5660_v9  ;;  %v1571_v38 = vmax.f32 %v5802_v34, 0.0  ;;  %v1512_v49 = vld [vmem:[#allocation2 + $0x1e8] sm:$0xff]  ;;  %4592 = vmatpush3.bf16.msra.mxu0 %v4800_v57 }
 0x32c   :  { %v1436_v48 = vpop.f32.mrf.mxu1  ;;  %4544 = vmatmul.mubr.msk.bf16.gmra.mxu0 %vm536_vm2, %v1590_v52 }
 0x32d   :  { %v5807_v11 = vadd.f32 %v1508_v46, %v1476_v61  ;;  %v1437_v0 = vadd.f32 %v5660_v9, %v1436_v48  ;;  %v1574_v6 = vmax.f32 %v5799_v16, 0.0  ;;  %v1481_v27 = vadd.f32 %v1445_v19, %v5516_v21  ;;  %v4801_v61 = vld [vmem:[%s6632_s4 + $0x20] sm:$0xff]  }
 0x32e   :  { %v4518_v1 = vpop.f32.mrf.mxu1  ;;  %4593 = vmatprep.subr.bf16.mxu0 %v4801_v61  ;;  %v5847_v46 = vld [vmem:[%s6635_s5 + $0x1] ss:$0 sm:$0xff] }
 0x32f   :  { %v1572_v47 = vmax.f32 %v5807_v11, 0.0  ;;  %v1479_v63 = vadd.f32 %v1437_v0, %v5501_v8  ;;  %v1448_v14 = vadd.f32 %v4518_v1, %v5660_v9  ;;  %v1592_v32 = vpack.c.bf16 %v1574_v6, %v1573_v24  ;;  %4594 = vmatpush3.bf16.msra.mxu0 %v4801_v61 }
 0x330   :  { %v1439_v20 = vpop.f32.mrf.mxu1  ;;  %v5827_v39 = vadd.f32 %v1513_v40, %v1481_v27 }
 0x331   :  { %v1482_v50 = vadd.f32 %v1448_v14, %v5521_v2  ;;  %v1440_v62 = vadd.f32 %v5660_v9, %v1439_v20  ;;  %v1591_v36 = vpack.c.bf16 %v1572_v47, %v1571_v38  ;;  %v5821_v37 = vadd.f32 %v1511_v30, %v1479_v63 }
 0x332   :  { %v1577_v25 = vmax.f32 %v5827_v39, 0.0 }
 0x333   :  { %v5823_v56 = vadd.f32 %v1514_v35, %v1482_v50  ;;  %v1480_v8 = vadd.f32 %v1440_v62, %v5506_v15  ;;  %4547 = vmatprep.mubr.msk.bf16.mxu0 %vm536_vm2, %v1591_v36  ;;  %v1575_v2 = vmax.f32 %v5821_v37, 0.0 }
 0x334   :  { %4548 = vmatmul.mubr.msk.bf16.gmra.mxu0 %vm536_vm2, %v1592_v32 }
 0x335   :  { %v5829_v21 = vadd.f32 %v1512_v49, %v1480_v8  ;;  %v1578_v9 = vmax.f32 %v5823_v56, 0.0 }
 0x337   :  { %v1576_v41 = vmax.f32 %v5829_v21, 0.0  ;;  %v1594_v45 = vpack.c.bf16 %v1578_v9, %v1577_v25 }
 0x339   :  { %v1593_v15 = vpack.c.bf16 %v1576_v41, %v1575_v2 }
 0x33b   :  { %4551 = vmatprep.mubr.msk.bf16.mxu0 %vm536_vm2, %v1593_v15 }
 0x33c   :  { %4552 = vmatmul.mubr.msk.bf16.gmra.mxu0 %vm536_vm2, %v1594_v45 }
 0x3c1   :  { %v4525_v52 = vpop.f32.mrf.mxu0 }
 0x3c2   :  { %v1711_v1 = vadd.f32 %v4525_v52, %v5847_v46 }
 0x3c3   :  { %v1702_v42 = vpop.f32.mrf.mxu0 }
 0x3c4   :  { %v1703_v19 = vadd.f32 %v5847_v46, %v1702_v42  ;;  %v1831_v20 = vmax.f32 %v1711_v1, 0.0 }
 0x3c5   :  { %v4526_v48 = vpop.f32.mrf.mxu0 }
 0x3c6   :  { %v1714_v0 = vadd.f32 %v4526_v48, %v5847_v46  ;;  %v1829_v14 = vmax.f32 %v1703_v19, 0.0 }
 0x3c7   :  { %v1705_v6 = vpop.f32.mrf.mxu0 }
 0x3c8   :  { %v1706_v47 = vadd.f32 %v5847_v46, %v1705_v6  ;;  %v1832_v63 = vmax.f32 %v1714_v0, 0.0 }
 0x3ca   :  { %v1830_v38 = vmax.f32 %v1706_v47, 0.0  ;;  %v1862_v27 = vpack.c.bf16 %v1832_v63, %v1831_v20 }
 0x3cc   :  { %v1861_v24 = vpack.c.bf16 %v1830_v38, %v1829_v14  ;;  %v4529_v50 = vpop.f32.mrf.mxu0 }
 0x3cd   :  { %v1727_v8 = vadd.f32 %v4529_v50, %v5847_v46 }
 0x3ce   :  { %4559 = vmatprep.mubr.msk.bf16.mxu1 %vm536_vm2, %v1861_v24  ;;  %v1718_v62 = vpop.f32.mrf.mxu0 }
 0x3cf   :  { %4560 = vmatmul.mubr.msk.bf16.vlgmr.msra.gmra.mxu1 %vm536_vm2, %v1862_v27  ;;  %v1719_v35 = vadd.f32 %v5847_v46, %v1718_v62  ;;  %v1835_v25 = vmax.f32 %v1727_v8, 0.0 }
 0x3d0   :  { %v4530_v30 = vpop.f32.mrf.mxu0 }
 0x3d1   :  { %v1730_v36 = vadd.f32 %v4530_v30, %v5847_v46  ;;  %v1833_v9 = vmax.f32 %v1719_v35, 0.0 }
 0x3d2   :  { %v1721_v32 = vpop.f32.mrf.mxu0 }
 0x3d3   :  { %v1722_v40 = vadd.f32 %v5847_v46, %v1721_v32  ;;  %v1836_v49 = vmax.f32 %v1730_v36, 0.0 }
 0x3d4   :  { %v4533_v2 = vpop.f32.mrf.mxu0 }
 0x3d5   :  { %v1834_v41 = vmax.f32 %v1722_v40, 0.0  ;;  %v1864_v57 = vpack.c.bf16 %v1836_v49, %v1835_v25  ;;  %v1743_v48 = vadd.f32 %v4533_v2, %v5847_v46 }
 0x3d6   :  { %v1734_v15 = vpop.f32.mrf.mxu0 }
 0x3d7   :  { %v1863_v45 = vpack.c.bf16 %v1834_v41, %v1833_v9  ;;  %v1735_v52 = vadd.f32 %v5847_v46, %v1734_v15  ;;  %v1839_v14 = vmax.f32 %v1743_v48, 0.0 }
 0x3d8   :  { %v4534_v61 = vpop.f32.mrf.mxu0 }
 0x3d9   :  { %v1746_v42 = vadd.f32 %v4534_v61, %v5847_v46  ;;  %4563 = vmatprep.mubr.msk.bf16.mxu1 %vm536_vm2, %v1863_v45  ;;  %v1837_v47 = vmax.f32 %v1735_v52, 0.0 }
 0x3da   :  { %v1737_v19 = vpop.f32.mrf.mxu0  ;;  %4564 = vmatmul.mubr.msk.bf16.gmra.mxu1 %vm536_vm2, %v1864_v57 }
 0x3db   :  { %v1738_v0 = vadd.f32 %v5847_v46, %v1737_v19  ;;  %v1840_v1 = vmax.f32 %v1746_v42, 0.0 }
 0x3dc   :  { %v4537_v6 = vpop.f32.mrf.mxu0 }
 0x3dd   :  { %v1838_v63 = vmax.f32 %v1738_v0, 0.0  ;;  %v1866_v24 = vpack.c.bf16 %v1840_v1, %v1839_v14  ;;  %v1759_v30 = vadd.f32 %v4537_v6, %v5847_v46 }
 0x3de   :  { %v1750_v38 = vpop.f32.mrf.mxu0 }
 0x3df   :  { %v1865_v20 = vpack.c.bf16 %v1838_v63, %v1837_v47  ;;  %v1751_v50 = vadd.f32 %v5847_v46, %v1750_v38  ;;  %v1843_v2 = vmax.f32 %v1759_v30, 0.0 }
 0x3e0   :  { %v4538_v27 = vpop.f32.mrf.mxu0 }
 0x3e1   :  { %v1762_v62 = vadd.f32 %v4538_v27, %v5847_v46  ;;  %4567 = vmatprep.mubr.msk.bf16.mxu1 %vm536_vm2, %v1865_v20  ;;  %v1841_v40 = vmax.f32 %v1751_v50, 0.0 }
 0x3e2   :  { %v1753_v35 = vpop.f32.mrf.mxu0  ;;  %4568 = vmatmul.mubr.msk.bf16.gmra.mxu1 %vm536_vm2, %v1866_v24 }
 0x3e3   :  { %v1754_v36 = vadd.f32 %v5847_v46, %v1753_v35  ;;  %v1844_v8 = vmax.f32 %v1762_v62, 0.0 }
 0x3e4   :  { %v4541_v32 = vpop.f32.mrf.mxu0 }
 0x3e5   :  { %v1842_v49 = vmax.f32 %v1754_v36, 0.0  ;;  %v1868_v25 = vpack.c.bf16 %v1844_v8, %v1843_v2  ;;  %v1775_v61 = vadd.f32 %v4541_v32, %v5847_v46 }
 0x3e6   :  { %v1766_v9 = vpop.f32.mrf.mxu0 }
 0x3e7   :  { %v1867_v41 = vpack.c.bf16 %v1842_v49, %v1841_v40  ;;  %v1767_v45 = vadd.f32 %v5847_v46, %v1766_v9  ;;  %v1847_v6 = vmax.f32 %v1775_v61, 0.0 }
 0x3e8   :  { %v4542_v15 = vpop.f32.mrf.mxu0 }
 0x3e9   :  { %v1778_v57 = vadd.f32 %v4542_v15, %v5847_v46  ;;  %4571 = vmatprep.mubr.msk.bf16.mxu1 %vm536_vm2, %v1867_v41  ;;  %v1845_v0 = vmax.f32 %v1767_v45, 0.0 }
 0x3ea   :  { %v1769_v52 = vpop.f32.mrf.mxu0  ;;  %4572 = vmatmul.mubr.msk.bf16.gmra.mxu1 %vm536_vm2, %v1868_v25 }
 0x3eb   :  { %v1770_v42 = vadd.f32 %v5847_v46, %v1769_v52  ;;  %v1848_v48 = vmax.f32 %v1778_v57, 0.0 }
 0x3ec   :  { %v4545_v19 = vpop.f32.mrf.mxu0 }
 0x3ed   :  { %v1846_v1 = vmax.f32 %v1770_v42, 0.0  ;;  %v1870_v14 = vpack.c.bf16 %v1848_v48, %v1847_v6  ;;  %v1791_v27 = vadd.f32 %v4545_v19, %v5847_v46 }
 0x3ee   :  { %v1782_v47 = vpop.f32.mrf.mxu0 }
 0x3ef   :  { %v1869_v63 = vpack.c.bf16 %v1846_v1, %v1845_v0  ;;  %v1783_v20 = vadd.f32 %v5847_v46, %v1782_v47  ;;  %v1851_v32 = vmax.f32 %v1791_v27, 0.0 }
 0x3f0   :  { %v4546_v38 = vpop.f32.mrf.mxu0 }
 0x3f1   :  { %v1794_v24 = vadd.f32 %v4546_v38, %v5847_v46  ;;  %4575 = vmatprep.mubr.msk.bf16.mxu1 %vm536_vm2, %v1869_v63  ;;  %v1849_v36 = vmax.f32 %v1783_v20, 0.0 }
 0x3f2   :  { %v1785_v50 = vpop.f32.mrf.mxu0  ;;  %4576 = vmatmul.mubr.msk.bf16.gmra.mxu1 %vm536_vm2, %v1870_v14 }
 0x3f3   :  { %v1786_v62 = vadd.f32 %v5847_v46, %v1785_v50  ;;  %v1852_v30 = vmax.f32 %v1794_v24, 0.0 }
 0x3f4   :  { %v4549_v35 = vpop.f32.mrf.mxu0 }
 0x3f5   :  { %v1850_v8 = vmax.f32 %v1786_v62, 0.0  ;;  %v1872_v2 = vpack.c.bf16 %v1852_v30, %v1851_v32  ;;  %v1807_v15 = vadd.f32 %v4549_v35, %v5847_v46  ;;  %v4803_v32 = vld [vmem:[%s6634_s6 + $0x20] sm:$0xff]  }
 0x3f6   :  { %v1798_v40 = vpop.f32.mrf.mxu0 }
 0x3f7   :  { %v1871_v49 = vpack.c.bf16 %v1850_v8, %v1849_v36  ;;  %v1799_v41 = vadd.f32 %v5847_v46, %v1798_v40  ;;  %v1855_v19 = vmax.f32 %v1807_v15, 0.0  ;;  %v4802_v8 = vld [vmem:[%s6634_s6 + $0x28] sm:$0xff]  }
 0x3f8   :  { %v4550_v9 = vpop.f32.mrf.mxu0  ;;  %4627 = vmatprep.subr.bf16.mxu1 %v4802_v8 }
 0x3f9   :  { %v1810_v25 = vadd.f32 %v4550_v9, %v5847_v46  ;;  %4579 = vmatprep.mubr.msk.bf16.mxu1 %vm536_vm2, %v1871_v49  ;;  %v1853_v42 = vmax.f32 %v1799_v41, 0.0  ;;  %4628 = vmatpush3.bf16.msra.mxu1 %v4802_v8 }
 0x3fa   :  { %v1801_v45 = vpop.f32.mrf.mxu0  ;;  %4580 = vmatmul.mubr.msk.bf16.gmra.mxu1 %vm536_vm2, %v1872_v2  ;;  %4629 = vmatprep.subr.bf16.mxu1 %v4803_v32 }
 0x3fb   :  { %v1802_v57 = vadd.f32 %v5847_v46, %v1801_v45  ;;  %v1856_v61 = vmax.f32 %v1810_v25, 0.0 }
 0x3fc   :  { %v4553_v52 = vpop.f32.mrf.mxu0 }
 0x3fd   :  { %v1854_v48 = vmax.f32 %v1802_v57, 0.0  ;;  %v1874_v6 = vpack.c.bf16 %v1856_v61, %v1855_v19  ;;  %v1823_v38 = vadd.f32 %v4553_v52, %v5847_v46  ;;  %4630 = vmatpush3.bf16.msra.mxu1 %v4803_v32  ;;  %v2145_v19 = vld [vmem:[#allocation2 + $0x210] sm:$0xff] }
 0x3fe   :  { %v1814_v0 = vpop.f32.mrf.mxu0 }
 0x3ff   :  { %v1873_v1 = vpack.c.bf16 %v1854_v48, %v1853_v42  ;;  %v1815_v63 = vadd.f32 %v5847_v46, %v1814_v0  ;;  %v1859_v30 = vmax.f32 %v1823_v38, 0.0  ;;  %v2143_v42 = vld [vmem:[#allocation2 + $0x200] sm:$0xff]  ;;  %v2146_v48 = vld [vmem:[#allocation2 + $0x218] sm:$0xff] }
 0x400   :  { %v4554_v47 = vpop.f32.mrf.mxu0 }
 0x401   :  { %v1826_v14 = vadd.f32 %v4554_v47, %v5847_v46  ;;  %4583 = vmatprep.mubr.msk.bf16.mxu1 %vm536_vm2, %v1873_v1  ;;  %v1857_v50 = vmax.f32 %v1815_v63, 0.0 }
 0x402   :  { %v1817_v20 = vpop.f32.mrf.mxu0  ;;  %4584 = vmatmul.mubr.msk.bf16.gmra.mxu1 %vm536_vm2, %v1874_v6 }
 0x403   :  { %v1818_v24 = vadd.f32 %v5847_v46, %v1817_v20  ;;  %v1860_v27 = vmax.f32 %v1826_v14, 0.0  ;;  %v5906_v46 = vld [vmem:[%s6636_s7 + $0x1] ss:$0 sm:$0xff] }
 0x405   :  { %v1858_v62 = vmax.f32 %v1818_v24, 0.0  ;;  %v1876_v36 = vpack.c.bf16 %v1860_v27, %v1859_v30 }
 0x407   :  { %v1875_v35 = vpack.c.bf16 %v1858_v62, %v1857_v50 }
 0x409   :  { %4587 = vmatprep.mubr.msk.bf16.mxu1 %vm536_vm2, %v1875_v35 }
 0x40a   :  { %4588 = vmatmul.mubr.msk.bf16.gmra.mxu1 %vm536_vm2, %v1876_v36 }
 0x48f   :  { %v4561_v40 = vpop.f32.mrf.mxu1 }
 0x490   :  { %v1993_v49 = vadd.f32 %v4561_v40, %v5906_v46 }
 0x491   :  { %v1984_v2 = vpop.f32.mrf.mxu1 }
 0x492   :  { %v1985_v9 = vadd.f32 %v5906_v46, %v1984_v2  ;;  %v2113_v45 = vadd.f32 %v1993_v49, %v5674_v55  ;;  %v2150_v2 = vld [vmem:[#allocation2 + $0x238] sm:$0xff] }
 0x493   :  { %v4562_v41 = vpop.f32.mrf.mxu1 }
 0x494   :  { %v2111_v25 = vadd.f32 %v1985_v9, %v5669_v23  ;;  %v1996_v15 = vadd.f32 %v4562_v41, %v5906_v46  ;;  %v5920_v47 = vadd.f32 %v2145_v19, %v2113_v45  ;;  %v2144_v23 = vld [vmem:[#allocation2 + $0x208] sm:$0xff]  ;;  %v2147_v41 = vld [vmem:[#allocation2 + $0x220] sm:$0xff]  ;;  %v2149_v45 = vld [vmem:[#allocation2 + $0x230] sm:$0xff] }
 0x495   :  { %v1987_v57 = vpop.f32.mrf.mxu1 }
 0x496   :  { %v2114_v61 = vadd.f32 %v1996_v15, %v5671_v22  ;;  %v1988_v52 = vadd.f32 %v5906_v46, %v1987_v57  ;;  %v5915_v0 = vadd.f32 %v2143_v42, %v2111_v25  ;;  %v2209_v20 = vmax.f32 %v5920_v47, 0.0 }
 0x498   :  { %v5917_v1 = vadd.f32 %v2146_v48, %v2114_v61  ;;  %v2112_v6 = vadd.f32 %v1988_v52, %v5676_v7  ;;  %v2207_v22 = vmax.f32 %v5915_v0, 0.0 }
 0x49a   :  { %v5922_v63 = vadd.f32 %v2144_v23, %v2112_v6  ;;  %v2210_v55 = vmax.f32 %v5917_v1, 0.0  ;;  %v4565_v14 = vpop.f32.mrf.mxu1 }
 0x49b   :  { %v2009_v27 = vadd.f32 %v4565_v14, %v5906_v46 }
 0x49c   :  { %v2208_v38 = vmax.f32 %v5922_v63, 0.0  ;;  %v2000_v24 = vpop.f32.mrf.mxu1  ;;  %v2240_v62 = vpack.c.bf16 %v2210_v55, %v2209_v20 }
 0x49d   :  { %v2001_v50 = vadd.f32 %v5906_v46, %v2000_v24  ;;  %v2117_v32 = vadd.f32 %v2009_v27, %v5696_v29  ;;  %v2154_v27 = vld [vmem:[#allocation2 + $0x258] sm:$0xff] }
 0x49e   :  { %v2239_v7 = vpack.c.bf16 %v2208_v38, %v2207_v22  ;;  %v4566_v30 = vpop.f32.mrf.mxu1 }
 0x49f   :  { %v2012_v35 = vadd.f32 %v4566_v30, %v5906_v46  ;;  %v2115_v36 = vadd.f32 %v2001_v50, %v5694_v5  ;;  %v2148_v5 = vld [vmem:[#allocation2 + $0x228] sm:$0xff]  ;;  %v5942_v52 = vadd.f32 %v2149_v45, %v2117_v32 }
 0x4a0   :  { %4595 = vmatprep.mubr.msk.bf16.mxu0 %vm536_vm2, %v2239_v7  ;;  %v2003_v8 = vpop.f32.mrf.mxu1  ;;  %v2152_v32 = vld [vmem:[#allocation2 + $0x248] sm:$0xff] }
 0x4a1   :  { %4596 = vmatmul.mubr.msk.bf16.vlgmr.msra.gmra.mxu0 %vm536_vm2, %v2240_v62  ;;  %v2118_v40 = vadd.f32 %v2012_v35, %v5691_v26  ;;  %v2004_v49 = vadd.f32 %v5906_v46, %v2003_v8  ;;  %v5940_v57 = vadd.f32 %v2147_v41, %v2115_v36  ;;  %v2213_v22 = vmax.f32 %v5942_v52, 0.0  ;;  %v2151_v62 = vld [vmem:[#allocation2 + $0x240] sm:$0xff]  ;;  %v2153_v8 = vld [vmem:[#allocation2 + $0x250] sm:$0xff] }
 0x4a2   :  { %v4569_v9 = vpop.f32.mrf.mxu1 }
 0x4a3   :  { %v5937_v25 = vadd.f32 %v2150_v2, %v2118_v40  ;;  %v2116_v15 = vadd.f32 %v2004_v49, %v5698_v17  ;;  %v2025_v26 = vadd.f32 %v4569_v9, %v5906_v46  ;;  %v2211_v23 = vmax.f32 %v5940_v57, 0.0 }
 0x4a4   :  { %v2016_v61 = vpop.f32.mrf.mxu1 }
 0x4a5   :  { %v5944_v42 = vadd.f32 %v2148_v5, %v2116_v15  ;;  %v2017_v29 = vadd.f32 %v5906_v46, %v2016_v61  ;;  %v2214_v19 = vmax.f32 %v5937_v25, 0.0  ;;  %v2121_v38 = vadd.f32 %v2025_v26, %v5717_v12 }
 0x4a6   :  { %v4570_v48 = vpop.f32.mrf.mxu1 }
 0x4a7   :  { %v2212_v6 = vmax.f32 %v5944_v42, 0.0  ;;  %v2028_v17 = vadd.f32 %v4570_v48, %v5906_v46  ;;  %v2119_v55 = vadd.f32 %v2017_v29, %v5714_v33  ;;  %v2242_v36 = vpack.c.bf16 %v2214_v19, %v2213_v22 }
 0x4a8   :  { %v2019_v14 = vpop.f32.mrf.mxu1  ;;  %v5963_v40 = vadd.f32 %v2153_v8, %v2121_v38 }
 0x4a9   :  { %v2122_v20 = vadd.f32 %v2028_v17, %v5711_v10  ;;  %v2020_v24 = vadd.f32 %v5906_v46, %v2019_v14  ;;  %v2241_v7 = vpack.c.bf16 %v2212_v6, %v2211_v23  ;;  %v5960_v33 = vadd.f32 %v2151_v62, %v2119_v55  ;;  %v2158_v6 = vld [vmem:[#allocation2 + $0x278] sm:$0xff]  ;;  %v2155_v55 = vld [vmem:[#allocation2 + $0x260] sm:$0xff] }
 0x4aa   :  { %v4573_v50 = vpop.f32.mrf.mxu1  ;;  %v2217_v26 = vmax.f32 %v5963_v40, 0.0 }
 0x4ab   :  { %v5957_v30 = vadd.f32 %v2154_v27, %v2122_v20  ;;  %v2120_v35 = vadd.f32 %v2020_v24, %v5719_v43  ;;  %4599 = vmatprep.mubr.msk.bf16.mxu0 %vm536_vm2, %v2241_v7  ;;  %v2041_v49 = vadd.f32 %v4573_v50, %v5906_v46  ;;  %v2215_v45 = vmax.f32 %v5960_v33, 0.0  ;;  %v2157_v20 = vld [vmem:[#allocation2 + $0x270] sm:$0xff]  ;;  %v2156_v24 = vld [vmem:[#allocation2 + $0x268] sm:$0xff] }
 0x4ac   :  { %v2032_v12 = vpop.f32.mrf.mxu1  ;;  %4600 = vmatmul.mubr.msk.bf16.gmra.mxu0 %vm536_vm2, %v2242_v36 }
 0x4ad   :  { %v5965_v10 = vadd.f32 %v2152_v32, %v2120_v35  ;;  %v2033_v2 = vadd.f32 %v5906_v46, %v2032_v12  ;;  %v2218_v43 = vmax.f32 %v5957_v30, 0.0  ;;  %v2125_v29 = vadd.f32 %v2041_v49, %v5739_v60 }
 0x4ae   :  { %v4574_v9 = vpop.f32.mrf.mxu1 }
 0x4af   :  { %v2216_v41 = vmax.f32 %v5965_v10, 0.0  ;;  %v2044_v15 = vadd.f32 %v4574_v9, %v5906_v46  ;;  %v2123_v5 = vadd.f32 %v2033_v2, %v5736_v4  ;;  %v2244_v38 = vpack.c.bf16 %v2218_v43, %v2217_v26 }
 0x4b0   :  { %v2035_v61 = vpop.f32.mrf.mxu1  ;;  %v5985_v27 = vadd.f32 %v2157_v20, %v2125_v29 }
 0x4b1   :  { %v2126_v48 = vadd.f32 %v2044_v15, %v5733_v54  ;;  %v2036_v19 = vadd.f32 %v5906_v46, %v2035_v61  ;;  %v2243_v23 = vpack.c.bf16 %v2216_v41, %v2215_v45  ;;  %v5982_v4 = vadd.f32 %v2155_v55, %v2123_v5  ;;  %v2162_v41 = vld [vmem:[#allocation2 + $0x298] sm:$0xff]  ;;  %v2159_v5 = vld [vmem:[#allocation2 + $0x280] sm:$0xff] }
 0x4b2   :  { %v4577_v17 = vpop.f32.mrf.mxu1  ;;  %v2221_v49 = vmax.f32 %v5985_v27, 0.0 }
 0x4b3   :  { %v5979_v14 = vadd.f32 %v2158_v6, %v2126_v48  ;;  %v2124_v22 = vadd.f32 %v2036_v19, %v5741_v51  ;;  %4603 = vmatprep.mubr.msk.bf16.mxu0 %vm536_vm2, %v2243_v23  ;;  %v2057_v50 = vadd.f32 %v4577_v17, %v5906_v46  ;;  %v2219_v8 = vmax.f32 %v5982_v4, 0.0  ;;  %v2161_v48 = vld [vmem:[#allocation2 + $0x290] sm:$0xff]  ;;  %v2160_v19 = vld [vmem:[#allocation2 + $0x288] sm:$0xff] }
 0x4b4   :  { %v2048_v60 = vpop.f32.mrf.mxu1  ;;  %4604 = vmatmul.mubr.msk.bf16.gmra.mxu0 %vm536_vm2, %v2244_v38 }
 0x4b5   :  { %v5987_v54 = vadd.f32 %v2156_v24, %v2124_v22  ;;  %v2049_v7 = vadd.f32 %v5906_v46, %v2048_v60  ;;  %v2222_v51 = vmax.f32 %v5979_v14, 0.0  ;;  %v2129_v2 = vadd.f32 %v2057_v50, %v5761_v44 }
 0x4b6   :  { %v4578_v62 = vpop.f32.mrf.mxu1 }
 0x4b7   :  { %v2220_v35 = vmax.f32 %v5987_v54, 0.0  ;;  %v2060_v36 = vadd.f32 %v4578_v62, %v5906_v46  ;;  %v2127_v32 = vadd.f32 %v2049_v7, %v5758_v31  ;;  %v2246_v29 = vpack.c.bf16 %v2222_v51, %v2221_v49 }
 0x4b8   :  { %v2051_v12 = vpop.f32.mrf.mxu1  ;;  %v6007_v6 = vadd.f32 %v2161_v48, %v2129_v2 }
 0x4b9   :  { %v2130_v9 = vadd.f32 %v2060_v36, %v5755_v18  ;;  %v2052_v43 = vadd.f32 %v5906_v46, %v2051_v12  ;;  %v2245_v45 = vpack.c.bf16 %v2220_v35, %v2219_v8  ;;  %v6004_v31 = vadd.f32 %v2159_v5, %v2127_v32  ;;  %v2166_v35 = vld [vmem:[#allocation2 + $0x2b8] sm:$0xff]  ;;  %v2163_v32 = vld [vmem:[#allocation2 + $0x2a0] sm:$0xff] }
 0x4ba   :  { %v4581_v15 = vpop.f32.mrf.mxu1  ;;  %v2225_v50 = vmax.f32 %v6007_v6, 0.0 }
 0x4bb   :  { %v6001_v61 = vadd.f32 %v2162_v41, %v2130_v9  ;;  %v2128_v26 = vadd.f32 %v2052_v43, %v5763_v59  ;;  %4607 = vmatprep.mubr.msk.bf16.mxu0 %vm536_vm2, %v2245_v45  ;;  %v2073_v17 = vadd.f32 %v4581_v15, %v5906_v46  ;;  %v2223_v20 = vmax.f32 %v6004_v31, 0.0  ;;  %v2165_v9 = vld [vmem:[#allocation2 + $0x2b0] sm:$0xff]  ;;  %v2164_v43 = vld [vmem:[#allocation2 + $0x2a8] sm:$0xff] }
 0x4bc   :  { %v2064_v44 = vpop.f32.mrf.mxu1  ;;  %4608 = vmatmul.mubr.msk.bf16.gmra.mxu0 %vm536_vm2, %v2246_v29 }
 0x4bd   :  { %v6009_v18 = vadd.f32 %v2160_v19, %v2128_v26  ;;  %v2065_v23 = vadd.f32 %v5906_v46, %v2064_v44  ;;  %v2226_v59 = vmax.f32 %v6001_v61, 0.0  ;;  %v2133_v7 = vadd.f32 %v2073_v17, %v5783_v13 }
 0x4be   :  { %v4582_v55 = vpop.f32.mrf.mxu1 }
 0x4bf   :  { %v2224_v22 = vmax.f32 %v6009_v18, 0.0  ;;  %v2076_v38 = vadd.f32 %v4582_v55, %v5906_v46  ;;  %v2131_v24 = vadd.f32 %v2065_v23, %v5780_v28  ;;  %v2248_v2 = vpack.c.bf16 %v2226_v59, %v2225_v50 }
 0x4c0   :  { %v2067_v60 = vpop.f32.mrf.mxu1  ;;  %v6029_v41 = vadd.f32 %v2165_v9, %v2133_v7 }
 0x4c1   :  { %v2134_v62 = vadd.f32 %v2076_v38, %v5777_v53  ;;  %v2068_v51 = vadd.f32 %v5906_v46, %v2067_v60  ;;  %v2247_v8 = vpack.c.bf16 %v2224_v22, %v2223_v20  ;;  %v6026_v28 = vadd.f32 %v2163_v32, %v2131_v24  ;;  %v2170_v22 = vld [vmem:[#allocation2 + $0x2d8] sm:$0xff]  ;;  %v2167_v24 = vld [vmem:[#allocation2 + $0x2c0] sm:$0xff] }
 0x4c2   :  { %v4585_v36 = vpop.f32.mrf.mxu1  ;;  %v2229_v17 = vmax.f32 %v6029_v41, 0.0 }
 0x4c3   :  { %v6023_v12 = vadd.f32 %v2166_v35, %v2134_v62  ;;  %v2132_v49 = vadd.f32 %v2068_v51, %v5785_v3  ;;  %4611 = vmatprep.mubr.msk.bf16.mxu0 %vm536_vm2, %v2247_v8  ;;  %v2089_v15 = vadd.f32 %v4585_v36, %v5906_v46  ;;  %v2227_v48 = vmax.f32 %v6026_v28, 0.0  ;;  %v2169_v62 = vld [vmem:[#allocation2 + $0x2d0] sm:$0xff]  ;;  %v2168_v51 = vld [vmem:[#allocation2 + $0x2c8] sm:$0xff] }
 0x4c4   :  { %v2080_v13 = vpop.f32.mrf.mxu1  ;;  %4612 = vmatmul.mubr.msk.bf16.gmra.mxu0 %vm536_vm2, %v2248_v2 }
 0x4c5   :  { %v6031_v53 = vadd.f32 %v2164_v43, %v2132_v49  ;;  %v2081_v45 = vadd.f32 %v5906_v46, %v2080_v13  ;;  %v2230_v3 = vmax.f32 %v6023_v12, 0.0  ;;  %v2137_v23 = vadd.f32 %v2089_v15, %v5805_v58 }
 0x4c6   :  { %v4586_v5 = vpop.f32.mrf.mxu1 }
 0x4c7   :  { %v2228_v26 = vmax.f32 %v6031_v53, 0.0  ;;  %v2092_v29 = vadd.f32 %v4586_v5, %v5906_v46  ;;  %v2135_v19 = vadd.f32 %v2081_v45, %v5802_v34  ;;  %v2250_v7 = vpack.c.bf16 %v2230_v3, %v2229_v17 }
 0x4c8   :  { %v2083_v44 = vpop.f32.mrf.mxu1  ;;  %v6051_v35 = vadd.f32 %v2169_v62, %v2137_v23  ;;  %v2173_v23 = vld [vmem:[#allocation2 + $0x2f0] sm:$0xff]  ;;  %v6090_v62 = vld [vmem:[%s6635_s5 + $0x2] ss:$0 sm:$0xff] }
 0x4c9   :  { %v2138_v55 = vadd.f32 %v2092_v29, %v5799_v16  ;;  %v2084_v59 = vadd.f32 %v5906_v46, %v2083_v44  ;;  %v2249_v20 = vpack.c.bf16 %v2228_v26, %v2227_v48  ;;  %v6048_v34 = vadd.f32 %v2167_v24, %v2135_v19  ;;  %v2171_v26 = vld [vmem:[#allocation2 + $0x2e0] sm:$0xff]  ;;  %v2174_v29 = vld [vmem:[#allocation2 + $0x2f8] sm:$0xff] }
 0x4ca   :  { %v4589_v38 = vpop.f32.mrf.mxu1  ;;  %v2233_v15 = vmax.f32 %v6051_v35, 0.0  ;;  %v4804_v24 = vld [vmem:[%s6632_s4 + $0x38] sm:$0xff]  }
 0x4cb   :  { %v6045_v60 = vadd.f32 %v2170_v22, %v2138_v55  ;;  %v2136_v50 = vadd.f32 %v2084_v59, %v5807_v11  ;;  %4615 = vmatprep.mubr.msk.bf16.mxu0 %vm536_vm2, %v2249_v20  ;;  %v2105_v36 = vadd.f32 %v4589_v38, %v5906_v46  ;;  %v2231_v43 = vmax.f32 %v6048_v34, 0.0  ;;  %v2172_v55 = vld [vmem:[#allocation2 + $0x2e8] sm:$0xff]  ;;  %4663 = vmatprep.subr.bf16.mxu0 %v4804_v24 }
 0x4cc   :  { %v2096_v58 = vpop.f32.mrf.mxu1  ;;  %4616 = vmatmul.mubr.msk.bf16.gmra.mxu0 %vm536_vm2, %v2250_v7 }
 0x4cd   :  { %v6053_v16 = vadd.f32 %v2168_v51, %v2136_v50  ;;  %v2097_v8 = vadd.f32 %v5906_v46, %v2096_v58  ;;  %v2234_v11 = vmax.f32 %v6045_v60, 0.0  ;;  %v2141_v45 = vadd.f32 %v2105_v36, %v5827_v39  ;;  %4664 = vmatpush3.bf16.msra.mxu0 %v4804_v24 }
 0x4ce   :  { %v4590_v32 = vpop.f32.mrf.mxu1 }
 0x4cf   :  { %v2232_v49 = vmax.f32 %v6053_v16, 0.0  ;;  %v2139_v2 = vadd.f32 %v2097_v8, %v5821_v37  ;;  %v2108_v9 = vadd.f32 %v4590_v32, %v5906_v46  ;;  %v2252_v17 = vpack.c.bf16 %v2234_v11, %v2233_v15 }
 0x4d0   :  { %v2099_v13 = vpop.f32.mrf.mxu1  ;;  %v6073_v59 = vadd.f32 %v2173_v23, %v2141_v45 }
 0x4d1   :  { %v2142_v5 = vadd.f32 %v2108_v9, %v5823_v56  ;;  %v2100_v3 = vadd.f32 %v5906_v46, %v2099_v13  ;;  %v2251_v48 = vpack.c.bf16 %v2232_v49, %v2231_v43  ;;  %v6067_v19 = vadd.f32 %v2171_v26, %v2139_v2 }
 0x4d2   :  { %v2237_v38 = vmax.f32 %v6073_v59, 0.0 }
 0x4d3   :  { %v6069_v44 = vadd.f32 %v2174_v29, %v2142_v5  ;;  %v2140_v37 = vadd.f32 %v2100_v3, %v5829_v21  ;;  %4619 = vmatprep.mubr.msk.bf16.mxu0 %vm536_vm2, %v2251_v48  ;;  %v2235_v56 = vmax.f32 %v6067_v19, 0.0 }
 0x4d4   :  { %4620 = vmatmul.mubr.msk.bf16.gmra.mxu0 %vm536_vm2, %v2252_v17 }
 0x4d5   :  { %v6075_v39 = vadd.f32 %v2172_v55, %v2140_v37  ;;  %v2238_v46 = vmax.f32 %v6069_v44, 0.0 }
 0x4d7   :  { %v2236_v22 = vmax.f32 %v6075_v39, 0.0  ;;  %v2254_v20 = vpack.c.bf16 %v2238_v46, %v2237_v38 }
 0x4d9   :  { %v2253_v21 = vpack.c.bf16 %v2236_v22, %v2235_v56 }
 0x4db   :  { %4623 = vmatprep.mubr.msk.bf16.mxu0 %vm536_vm2, %v2253_v21 }
 0x4dc   :  { %4624 = vmatmul.mubr.msk.bf16.gmra.mxu0 %vm536_vm2, %v2254_v20 }
 0x561   :  { %v4597_v50 = vpop.f32.mrf.mxu0 }
 0x562   :  { %v2371_v8 = vadd.f32 %v4597_v50, %v6090_v62 }
 0x563   :  { %v2362_v7 = vpop.f32.mrf.mxu0 }
 0x564   :  { %v2363_v58 = vadd.f32 %v6090_v62, %v2362_v7  ;;  %v2491_v43 = vmax.f32 %v2371_v8, 0.0 }
 0x565   :  { %v4598_v51 = vpop.f32.mrf.mxu0 }
 0x566   :  { %v2374_v36 = vadd.f32 %v4598_v51, %v6090_v62  ;;  %v2489_v2 = vmax.f32 %v2363_v58, 0.0 }
 0x567   :  { %v2365_v32 = vpop.f32.mrf.mxu0 }
 0x568   :  { %v2366_v11 = vadd.f32 %v6090_v62, %v2365_v32  ;;  %v2492_v49 = vmax.f32 %v2374_v36, 0.0 }
 0x56a   :  { %v2490_v9 = vmax.f32 %v2366_v11, 0.0  ;;  %v2522_v15 = vpack.c.bf16 %v2492_v49, %v2491_v43 }
 0x56c   :  { %v2521_v13 = vpack.c.bf16 %v2490_v9, %v2489_v2  ;;  %v4601_v45 = vpop.f32.mrf.mxu0 }
 0x56d   :  { %v2387_v48 = vadd.f32 %v4601_v45, %v6090_v62 }
 0x56e   :  { %4631 = vmatprep.mubr.msk.bf16.mxu1 %vm536_vm2, %v2521_v13  ;;  %v2378_v5 = vpop.f32.mrf.mxu0 }
 0x56f   :  { %4632 = vmatmul.mubr.msk.bf16.vlgmr.msra.gmra.mxu1 %vm536_vm2, %v2522_v15  ;;  %v2379_v26 = vadd.f32 %v6090_v62, %v2378_v5  ;;  %v2495_v22 = vmax.f32 %v2387_v48, 0.0 }
 0x570   :  { %v4602_v3 = vpop.f32.mrf.mxu0 }
 0x571   :  { %v2390_v29 = vadd.f32 %v4602_v3, %v6090_v62  ;;  %v2493_v56 = vmax.f32 %v2379_v26, 0.0 }
 0x572   :  { %v2381_v37 = vpop.f32.mrf.mxu0 }
 0x573   :  { %v2382_v17 = vadd.f32 %v6090_v62, %v2381_v37  ;;  %v2496_v23 = vmax.f32 %v2390_v29, 0.0 }
 0x574   :  { %v4605_v55 = vpop.f32.mrf.mxu0 }
 0x575   :  { %v2494_v46 = vmax.f32 %v2382_v17, 0.0  ;;  %v2524_v20 = vpack.c.bf16 %v2496_v23, %v2495_v22  ;;  %v2403_v51 = vadd.f32 %v4605_v55, %v6090_v62 }
 0x576   :  { %v2394_v38 = vpop.f32.mrf.mxu0 }
 0x577   :  { %v2523_v21 = vpack.c.bf16 %v2494_v46, %v2493_v56  ;;  %v2395_v50 = vadd.f32 %v6090_v62, %v2394_v38  ;;  %v2499_v2 = vmax.f32 %v2403_v51, 0.0 }
 0x578   :  { %v4606_v24 = vpop.f32.mrf.mxu0 }
 0x579   :  { %v2406_v7 = vadd.f32 %v4606_v24, %v6090_v62  ;;  %4635 = vmatprep.mubr.msk.bf16.mxu1 %vm536_vm2, %v2523_v21  ;;  %v2497_v11 = vmax.f32 %v2395_v50, 0.0 }
 0x57a   :  { %v2397_v58 = vpop.f32.mrf.mxu0  ;;  %4636 = vmatmul.mubr.msk.bf16.gmra.mxu1 %vm536_vm2, %v2524_v20 }
 0x57b   :  { %v2398_v36 = vadd.f32 %v6090_v62, %v2397_v58  ;;  %v2500_v8 = vmax.f32 %v2406_v7, 0.0 }
 0x57c   :  { %v4609_v32 = vpop.f32.mrf.mxu0 }
 0x57d   :  { %v2498_v49 = vmax.f32 %v2398_v36, 0.0  ;;  %v2526_v13 = vpack.c.bf16 %v2500_v8, %v2499_v2  ;;  %v2419_v3 = vadd.f32 %v4609_v32, %v6090_v62 }
 0x57e   :  { %v2410_v9 = vpop.f32.mrf.mxu0 }
 0x57f   :  { %v2525_v43 = vpack.c.bf16 %v2498_v49, %v2497_v11  ;;  %v2411_v45 = vadd.f32 %v6090_v62, %v2410_v9  ;;  %v2503_v55 = vmax.f32 %v2419_v3, 0.0 }
 0x580   :  { %v4610_v15 = vpop.f32.mrf.mxu0 }
 0x581   :  { %v2422_v5 = vadd.f32 %v4610_v15, %v6090_v62  ;;  %4639 = vmatprep.mubr.msk.bf16.mxu1 %vm536_vm2, %v2525_v43  ;;  %v2501_v17 = vmax.f32 %v2411_v45, 0.0 }
 0x582   :  { %v2413_v26 = vpop.f32.mrf.mxu0  ;;  %4640 = vmatmul.mubr.msk.bf16.gmra.mxu1 %vm536_vm2, %v2526_v13 }
 0x583   :  { %v2414_v29 = vadd.f32 %v6090_v62, %v2413_v26  ;;  %v2504_v48 = vmax.f32 %v2422_v5, 0.0 }
 0x584   :  { %v4613_v37 = vpop.f32.mrf.mxu0 }
 0x585   :  { %v2502_v23 = vmax.f32 %v2414_v29, 0.0  ;;  %v2528_v22 = vpack.c.bf16 %v2504_v48, %v2503_v55  ;;  %v2435_v24 = vadd.f32 %v4613_v37, %v6090_v62 }
 0x586   :  { %v2426_v56 = vpop.f32.mrf.mxu0 }
 0x587   :  { %v2527_v46 = vpack.c.bf16 %v2502_v23, %v2501_v17  ;;  %v2427_v21 = vadd.f32 %v6090_v62, %v2426_v56  ;;  %v2507_v32 = vmax.f32 %v2435_v24, 0.0 }
 0x588   :  { %v4614_v38 = vpop.f32.mrf.mxu0 }
 0x589   :  { %v2438_v20 = vadd.f32 %v4614_v38, %v6090_v62  ;;  %4643 = vmatprep.mubr.msk.bf16.mxu1 %vm536_vm2, %v2527_v46  ;;  %v2505_v36 = vmax.f32 %v2427_v21, 0.0 }
 0x58a   :  { %v2429_v50 = vpop.f32.mrf.mxu0  ;;  %4644 = vmatmul.mubr.msk.bf16.gmra.mxu1 %vm536_vm2, %v2528_v22 }
 0x58b   :  { %v2430_v7 = vadd.f32 %v6090_v62, %v2429_v50  ;;  %v2508_v51 = vmax.f32 %v2438_v20, 0.0 }
 0x58c   :  { %v4617_v58 = vpop.f32.mrf.mxu0 }
 0x58d   :  { %v2506_v8 = vmax.f32 %v2430_v7, 0.0  ;;  %v2530_v2 = vpack.c.bf16 %v2508_v51, %v2507_v32  ;;  %v2451_v15 = vadd.f32 %v4617_v58, %v6090_v62 }
 0x58e   :  { %v2442_v11 = vpop.f32.mrf.mxu0 }
 0x58f   :  { %v2529_v49 = vpack.c.bf16 %v2506_v8, %v2505_v36  ;;  %v2443_v43 = vadd.f32 %v6090_v62, %v2442_v11  ;;  %v2511_v37 = vmax.f32 %v2451_v15, 0.0 }
 0x590   :  { %v4618_v9 = vpop.f32.mrf.mxu0 }
 0x591   :  { %v2454_v13 = vadd.f32 %v4618_v9, %v6090_v62  ;;  %4647 = vmatprep.mubr.msk.bf16.mxu1 %vm536_vm2, %v2529_v49  ;;  %v2509_v29 = vmax.f32 %v2443_v43, 0.0 }
 0x592   :  { %v2445_v45 = vpop.f32.mrf.mxu0  ;;  %4648 = vmatmul.mubr.msk.bf16.gmra.mxu1 %vm536_vm2, %v2530_v2 }
 0x593   :  { %v2446_v5 = vadd.f32 %v6090_v62, %v2445_v45  ;;  %v2512_v3 = vmax.f32 %v2454_v13, 0.0 }
 0x594   :  { %v4621_v26 = vpop.f32.mrf.mxu0 }
 0x595   :  { %v2510_v48 = vmax.f32 %v2446_v5, 0.0  ;;  %v2532_v55 = vpack.c.bf16 %v2512_v3, %v2511_v37  ;;  %v2467_v38 = vadd.f32 %v4621_v26, %v6090_v62 }
 0x596   :  { %v2458_v17 = vpop.f32.mrf.mxu0 }
 0x597   :  { %v2531_v23 = vpack.c.bf16 %v2510_v48, %v2509_v29  ;;  %v2459_v46 = vadd.f32 %v6090_v62, %v2458_v17  ;;  %v2515_v58 = vmax.f32 %v2467_v38, 0.0  ;;  %v4805_v48 = vld [vmem:[%s6632_s4 + $0x30] sm:$0xff]  }
 0x598   :  { %v4622_v56 = vpop.f32.mrf.mxu0  ;;  %4665 = vmatprep.subr.bf16.mxu0 %v4805_v48 }
 0x599   :  { %v2470_v22 = vadd.f32 %v4622_v56, %v6090_v62  ;;  %4651 = vmatprep.mubr.msk.bf16.mxu1 %vm536_vm2, %v2531_v23  ;;  %v2513_v7 = vmax.f32 %v2459_v46, 0.0  ;;  %4666 = vmatpush3.bf16.msra.mxu0 %v4805_v48 }
 0x59a   :  { %v2461_v21 = vpop.f32.mrf.mxu0  ;;  %4652 = vmatmul.mubr.msk.bf16.gmra.mxu1 %vm536_vm2, %v2532_v55 }
 0x59b   :  { %v2462_v20 = vadd.f32 %v6090_v62, %v2461_v21  ;;  %v2516_v24 = vmax.f32 %v2470_v22, 0.0  ;;  %v6152_v21 = vld [vmem:[%s6636_s7 + $0x2] ss:$0 sm:$0xff] }
 0x59c   :  { %v4625_v50 = vpop.f32.mrf.mxu0 }
 0x59d   :  { %v2514_v51 = vmax.f32 %v2462_v20, 0.0  ;;  %v2534_v32 = vpack.c.bf16 %v2516_v24, %v2515_v58  ;;  %v2483_v9 = vadd.f32 %v4625_v50, %v6090_v62 }
 0x59e   :  { %v2474_v36 = vpop.f32.mrf.mxu0 }
 0x59f   :  { %v2533_v8 = vpack.c.bf16 %v2514_v51, %v2513_v7  ;;  %v2475_v49 = vadd.f32 %v6090_v62, %v2474_v36  ;;  %v2519_v3 = vmax.f32 %v2483_v9, 0.0 }
 0x5a0   :  { %v4626_v11 = vpop.f32.mrf.mxu0 }
 0x5a1   :  { %v2486_v2 = vadd.f32 %v4626_v11, %v6090_v62  ;;  %4655 = vmatprep.mubr.msk.bf16.mxu1 %vm536_vm2, %v2533_v8  ;;  %v2517_v45 = vmax.f32 %v2475_v49, 0.0 }
 0x5a2   :  { %v2477_v43 = vpop.f32.mrf.mxu0  ;;  %4656 = vmatmul.mubr.msk.bf16.gmra.mxu1 %vm536_vm2, %v2534_v32 }
 0x5a3   :  { %v2478_v13 = vadd.f32 %v6090_v62, %v2477_v43  ;;  %v2520_v15 = vmax.f32 %v2486_v2, 0.0  ;;  %v6146_v62 = vld [vmem:[%s6634_s6 + $0x38] sm:$0xff]  }
 0x5a4   :  { %4683 = vmatprep.subr.bf16.mxu0 %v6146_v62 }
 0x5a5   :  { %v2518_v5 = vmax.f32 %v2478_v13, 0.0  ;;  %v2536_v29 = vpack.c.bf16 %v2520_v15, %v2519_v3 }
 0x5a7   :  { %v2535_v26 = vpack.c.bf16 %v2518_v5, %v2517_v45 }
 0x5a9   :  { %4659 = vmatprep.mubr.msk.bf16.mxu1 %vm536_vm2, %v2535_v26 }
 0x5aa   :  { %4660 = vmatmul.mubr.msk.bf16.gmra.mxu1 %vm536_vm2, %v2536_v29 }
 0x62f   :  { %v4633_v37 = vpop.f32.mrf.mxu1 }
 0x630   :  { %v2653_v7 = vadd.f32 %v4633_v37, %v6152_v21 }
 0x631   :  { %v2644_v17 = vpop.f32.mrf.mxu1 }
 0x632   :  { %v2645_v24 = vadd.f32 %v6152_v21, %v2644_v17  ;;  %v2773_v43 = vadd.f32 %v2653_v7, %v5920_v47 }
 0x633   :  { %v4634_v23 = vpop.f32.mrf.mxu1 }
 0x634   :  { %v2656_v58 = vadd.f32 %v4634_v23, %v6152_v21  ;;  %v2771_v11 = vadd.f32 %v2645_v24, %v5915_v0 }
 0x635   :  { %v2647_v55 = vpop.f32.mrf.mxu1 }
 0x636   :  { %v2648_v49 = vadd.f32 %v6152_v21, %v2647_v55  ;;  %v2774_v15 = vadd.f32 %v2656_v58, %v5917_v1 }
 0x638   :  { %v2772_v0 = vadd.f32 %v2648_v49, %v5922_v63 }
 0x63a   :  { %v4637_v56 = vpop.f32.mrf.mxu1 }
 0x63c   :  { %v2660_v46 = vpop.f32.mrf.mxu1 }
 0x63d   :  { %v2661_v37 = vadd.f32 %v6152_v21, %v2660_v46 }
 0x63e   :  { %v4638_v22 = vpop.f32.mrf.mxu1 }
 0x63f   :  { %v2672_v47 = vadd.f32 %v4638_v22, %v6152_v21  ;;  %v2775_v7 = vadd.f32 %v2661_v37, %v5940_v57 }
 0x640   :  { %v2663_v38 = vpop.f32.mrf.mxu1 }
 0x642   :  { %v4641_v20 = vpop.f32.mrf.mxu1 }
 0x643   :  { %v2685_v50 = vadd.f32 %v4641_v20, %v6152_v21 }
 0x644   :  { %v2676_v51 = vpop.f32.mrf.mxu1 }
 0x645   :  { %v2677_v36 = vadd.f32 %v6152_v21, %v2676_v51  ;;  %v2781_v8 = vadd.f32 %v2685_v50, %v5963_v40  ;;  %v2664_v51 = vadd.f32 %v6152_v21, %v2663_v38 }
 0x646   :  { %v4642_v32 = vpop.f32.mrf.mxu1 }
 0x647   :  { %v2779_v2 = vadd.f32 %v2677_v36, %v5960_v33  ;;  %v2688_v9 = vadd.f32 %v4642_v32, %v6152_v21  ;;  %v2805_v40 = vadd.f32 %v2781_v8, %v2773_v43  ;;  %v2669_v33 = vadd.f32 %v4637_v56, %v6152_v21 }
 0x648   :  { %v2679_v13 = vpop.f32.mrf.mxu1  ;;  %v2778_v8 = vadd.f32 %v2672_v47, %v5937_v25  ;;  %v2776_v43 = vadd.f32 %v2664_v51, %v5944_v42 }
 0x649   :  { %v2803_v45 = vadd.f32 %v2779_v2, %v2771_v11  ;;  %v2782_v5 = vadd.f32 %v2688_v9, %v5957_v30  ;;  %v2680_v3 = vadd.f32 %v6152_v21, %v2679_v13  ;;  %v6179_v63 = vmul.f32 0.5, %v2805_v40 }
 0x64a   :  { %v4645_v26 = vpop.f32.mrf.mxu1  ;;  %v2777_v50 = vadd.f32 %v2669_v33, %v5942_v52 }
 0x64b   :  { %v2806_v29 = vadd.f32 %v2782_v5, %v2774_v15  ;;  %v2780_v48 = vadd.f32 %v2680_v3, %v5965_v10  ;;  %v2701_v1 = vadd.f32 %v4645_v26, %v6152_v21  ;;  %v6174_v23 = vmul.f32 0.5, %v2803_v45 }
 0x64c   :  { %v2692_v17 = vpop.f32.mrf.mxu1 }
 0x64d   :  { %v6176_v30 = vmul.f32 0.5, %v2806_v29  ;;  %v2804_v55 = vadd.f32 %v2780_v48, %v2772_v0  ;;  %v2693_v20 = vadd.f32 %v6152_v21, %v2692_v17  ;;  %v2785_v56 = vadd.f32 %v2701_v1, %v5985_v27 }
 0x64e   :  { %v4646_v24 = vpop.f32.mrf.mxu1  ;;  %v2835_v32 = vmax.f32 %v6174_v23, 0.0 }
 0x64f   :  { %v6181_v10 = vmul.f32 0.5, %v2804_v55  ;;  %v2783_v46 = vadd.f32 %v2693_v20, %v5982_v4  ;;  %v2704_v22 = vadd.f32 %v4646_v24, %v6152_v21  ;;  %v2838_v58 = vmax.f32 %v6176_v30, 0.0 }
 0x650   :  { %v2695_v36 = vpop.f32.mrf.mxu1  ;;  %v2837_v4 = vmax.f32 %v6179_v63, 0.0  ;;  %v2809_v57 = vadd.f32 %v2785_v56, %v2777_v50 }
 0x651   :  { %v2836_v11 = vmax.f32 %v6181_v10, 0.0  ;;  %v2786_v27 = vadd.f32 %v2704_v22, %v5979_v14  ;;  %v2807_v49 = vadd.f32 %v2783_v46, %v2775_v7  ;;  %v2696_v52 = vadd.f32 %v6152_v21, %v2695_v36 }
 0x652   :  { %v4649_v2 = vpop.f32.mrf.mxu1  ;;  %v2852_v13 = vpack.c.bf16 %v2838_v58, %v2837_v4  ;;  %v6204_v40 = vmul.f32 0.5, %v2809_v57 }
 0x653   :  { %v2810_v9 = vadd.f32 %v2786_v27, %v2778_v8  ;;  %v2851_v38 = vpack.c.bf16 %v2836_v11, %v2835_v32  ;;  %v2784_v25 = vadd.f32 %v2696_v52, %v5987_v54  ;;  %v6201_v14 = vmul.f32 0.5, %v2807_v49 }
 0x654   :  { %v2708_v15 = vpop.f32.mrf.mxu1  ;;  %v2841_v33 = vmax.f32 %v6204_v40, 0.0  ;;  %v2717_v56 = vadd.f32 %v4649_v2, %v6152_v21 }
 0x655   :  { %v6198_v45 = vmul.f32 0.5, %v2810_v9  ;;  %4667 = vmatprep.mubr.msk.bf16.mxu0 %vm536_vm2, %v2851_v38  ;;  %v2808_v5 = vadd.f32 %v2784_v25, %v2776_v43  ;;  %v2839_v0 = vmax.f32 %v6201_v14, 0.0  ;;  %v2709_v20 = vadd.f32 %v6152_v21, %v2708_v15 }
 0x656   :  { %v4650_v3 = vpop.f32.mrf.mxu1  ;;  %4668 = vmatmul.mubr.msk.bf16.vlgmr.msra.gmra.mxu0 %vm536_vm2, %v2852_v13  ;;  %v2789_v11 = vadd.f32 %v2717_v56, %v6007_v6 }
 0x657   :  { %4684 = vmatpush3.bf16.msra.mxu0 %v6146_v62  ;;  %v6207_v26 = vmul.f32 0.5, %v2808_v5  ;;  %v2842_v54 = vmax.f32 %v6198_v45, 0.0  ;;  %v2720_v22 = vadd.f32 %v4650_v3, %v6152_v21  ;;  %v2787_v58 = vadd.f32 %v2709_v20, %v6004_v31 }
 0x658   :  { %v2711_v42 = vpop.f32.mrf.mxu1 }
 0x659   :  { %v2840_v29 = vmax.f32 %v6207_v26, 0.0  ;;  %v2854_v1 = vpack.c.bf16 %v2842_v54, %v2841_v33  ;;  %v2712_v36 = vadd.f32 %v6152_v21, %v2711_v42  ;;  %v2790_v4 = vadd.f32 %v2720_v22, %v6001_v61 }
 0x65a   :  { %v4653_v48 = vpop.f32.mrf.mxu1 }
 0x65b   :  { %v2853_v47 = vpack.c.bf16 %v2840_v29, %v2839_v0  ;;  %v2788_v9 = vadd.f32 %v2712_v36, %v6009_v18  ;;  %v2733_v43 = vadd.f32 %v4653_v48, %v6152_v21 }
 0x65c   :  { %v2724_v37 = vpop.f32.mrf.mxu1 }
 0x65d   :  { %4671 = vmatprep.mubr.msk.bf16.mxu0 %vm536_vm2, %v2853_v47  ;;  %v2793_v33 = vadd.f32 %v2733_v43, %v6029_v41 }
 0x65e   :  { %v4654_v17 = vpop.f32.mrf.mxu1  ;;  %4672 = vmatmul.mubr.msk.bf16.gmra.mxu0 %vm536_vm2, %v2854_v1 }
 0x65f   :  { %v2736_v6 = vadd.f32 %v4654_v17, %v6152_v21 }
 0x660   :  { %v2727_v62 = vpop.f32.mrf.mxu1 }
 0x661   :  { %v2728_v54 = vadd.f32 %v6152_v21, %v2727_v62 }
 0x662   :  { %v4657_v55 = vpop.f32.mrf.mxu1 }
 0x663   :  { %v2749_v24 = vadd.f32 %v4657_v55, %v6152_v21 }
 0x664   :  { %v2740_v46 = vpop.f32.mrf.mxu1 }
 0x665   :  { %v2741_v50 = vadd.f32 %v6152_v21, %v2740_v46  ;;  %v2797_v7 = vadd.f32 %v2749_v24, %v6051_v35  ;;  %v2725_v35 = vadd.f32 %v6152_v21, %v2724_v37  ;;  %v2794_v37 = vadd.f32 %v2736_v6, %v6023_v12 }
 0x666   :  { %v4658_v51 = vpop.f32.mrf.mxu1  ;;  %v2792_v24 = vadd.f32 %v2728_v54, %v6031_v53 }
 0x667   :  { %v2795_v8 = vadd.f32 %v2741_v50, %v6048_v34  ;;  %v2752_v32 = vadd.f32 %v4658_v51, %v6152_v21  ;;  %v2813_v57 = vadd.f32 %v2797_v7, %v2789_v11  ;;  %v2791_v3 = vadd.f32 %v2725_v35, %v6026_v28  ;;  %v4808_v11 = vld [vmem:[%s6632_s4 + $0x48] sm:$0xff]  }
 0x668   :  { %v2743_v27 = vpop.f32.mrf.mxu1  ;;  %4703 = vmatprep.subr.bf16.mxu1 %v4808_v11 }
 0x669   :  { %v2811_v49 = vadd.f32 %v2795_v8, %v2787_v58  ;;  %v2798_v52 = vadd.f32 %v2752_v32, %v6045_v60  ;;  %v2744_v2 = vadd.f32 %v6152_v21, %v2743_v27  ;;  %v6241_v18 = vmul.f32 0.5, %v2813_v57  ;;  %v4807_v32 = vld [vmem:[%s6634_s6 + $0x30] sm:$0xff]   ;;  %v4809_v27 = vld [vmem:[%s6632_s4 + $0x40] sm:$0xff]   ;;  %4704 = vmatpush3.bf16.msra.mxu1 %v4808_v11 }
 0x66a   :  { %v4661_v31 = vpop.f32.mrf.mxu1  ;;  %4685 = vmatprep.subr.bf16.mxu0 %v4807_v32  ;;  %4705 = vmatprep.subr.bf16.mxu1 %v4809_v27 }
 0x66b   :  { %v2814_v38 = vadd.f32 %v2798_v52, %v2790_v4  ;;  %v2796_v34 = vadd.f32 %v2744_v2, %v6053_v16  ;;  %v6234_v13 = vmul.f32 0.5, %v2811_v49  ;;  %v2765_v61 = vadd.f32 %v4661_v31, %v6152_v21  ;;  %4686 = vmatpush3.bf16.msra.mxu0 %v4807_v32  ;;  %v4140_v52 = vld [vmem:[%s6635_s5 + $0x3] ss:$0 sm:$0xff] }
 0x66c   :  { %v2756_v60 = vpop.f32.mrf.mxu1 }
 0x66d   :  { %v6237_v25 = vmul.f32 0.5, %v2814_v38  ;;  %v2812_v15 = vadd.f32 %v2796_v34, %v2788_v9  ;;  %v2757_v5 = vadd.f32 %v6152_v21, %v2756_v60  ;;  %v2801_v16 = vadd.f32 %v2765_v61, %v6073_v59  ;;  %4706 = vmatpush3.bf16.msra.mxu1 %v4809_v27 }
 0x66e   :  { %v4662_v42 = vpop.f32.mrf.mxu1  ;;  %v2843_v47 = vmax.f32 %v6234_v13, 0.0 }
 0x66f   :  { %v6245_v0 = vmul.f32 0.5, %v2812_v15  ;;  %v2799_v29 = vadd.f32 %v2757_v5, %v6067_v19  ;;  %v2768_v48 = vadd.f32 %v4662_v42, %v6152_v21  ;;  %v2846_v28 = vmax.f32 %v6237_v25, 0.0 }
 0x670   :  { %v2759_v1 = vpop.f32.mrf.mxu1  ;;  %v2845_v19 = vmax.f32 %v6241_v18, 0.0  ;;  %v2817_v20 = vadd.f32 %v2801_v16, %v2793_v33 }
 0x671   :  { %v2844_v59 = vmax.f32 %v6245_v0, 0.0  ;;  %v2815_v17 = vadd.f32 %v2799_v29, %v2791_v3  ;;  %v2802_v62 = vadd.f32 %v2768_v48, %v6069_v44  ;;  %v2760_v55 = vadd.f32 %v6152_v21, %v2759_v1 }
 0x672   :  { %v2856_v46 = vpack.c.bf16 %v2846_v28, %v2845_v19  ;;  %v6264_v44 = vmul.f32 0.5, %v2817_v20 }
 0x673   :  { %v2818_v41 = vadd.f32 %v2802_v62, %v2794_v37  ;;  %v2800_v12 = vadd.f32 %v2760_v55, %v6075_v39  ;;  %v2855_v56 = vpack.c.bf16 %v2844_v59, %v2843_v47  ;;  %v6259_v22 = vmul.f32 0.5, %v2815_v17 }
 0x674   :  { %v2849_v58 = vmax.f32 %v6264_v44, 0.0 }
 0x675   :  { %v6261_v50 = vmul.f32 0.5, %v2818_v41  ;;  %v2816_v7 = vadd.f32 %v2800_v12, %v2792_v24  ;;  %4675 = vmatprep.mubr.msk.bf16.mxu0 %vm536_vm2, %v2855_v56  ;;  %v2847_v51 = vmax.f32 %v6259_v22, 0.0 }
 0x676   :  { %4676 = vmatmul.mubr.msk.bf16.gmra.mxu0 %vm536_vm2, %v2856_v46 }
 0x677   :  { %v6267_v21 = vmul.f32 0.5, %v2816_v7  ;;  %v2850_v53 = vmax.f32 %v6261_v50, 0.0 }
 0x679   :  { %v2848_v39 = vmax.f32 %v6267_v21, 0.0  ;;  %v2858_v8 = vpack.c.bf16 %v2850_v53, %v2849_v58 }
 0x67b   :  { %v2857_v36 = vpack.c.bf16 %v2848_v39, %v2847_v51 }
 0x67d   :  { %4679 = vmatprep.mubr.msk.bf16.mxu0 %vm536_vm2, %v2857_v36 }
 0x67e   :  { %4680 = vmatmul.mubr.msk.bf16.gmra.mxu0 %vm536_vm2, %v2858_v8 }
 0x716   :  { %v4669_v4 = vpop.f32.mrf.mxu0 }
 0x717   :  { %v2951_v31 = vadd.f32 %v4669_v4, %v4140_v52 }
 0x718   :  { %v2942_v49 = vpop.f32.mrf.mxu0 }
 0x719   :  { %v2943_v35 = vadd.f32 %v4140_v52, %v2942_v49  ;;  %v3007_v60 = vmax.f32 %v2951_v31, 0.0 }
 0x71a   :  { %v4670_v2 = vpop.f32.mrf.mxu0 }
 0x71b   :  { %v2954_v57 = vadd.f32 %v4670_v2, %v4140_v52  ;;  %v3005_v43 = vmax.f32 %v2943_v35, 0.0 }
 0x71c   :  { %v2945_v9 = vpop.f32.mrf.mxu0 }
 0x71d   :  { %v2946_v38 = vadd.f32 %v4140_v52, %v2945_v9  ;;  %v3008_v34 = vmax.f32 %v2954_v57, 0.0 }
 0x71e   :  { %v4673_v61 = vpop.f32.mrf.mxu0 }
 0x71f   :  { %v3006_v6 = vmax.f32 %v2946_v38, 0.0  ;;  %v3022_v3 = vpack.c.bf16 %v3008_v34, %v3007_v60  ;;  %v2967_v29 = vadd.f32 %v4673_v61, %v4140_v52 }
 0x720   :  { %v2958_v5 = vpop.f32.mrf.mxu0 }
 0x721   :  { %v3021_v15 = vpack.c.bf16 %v3006_v6, %v3005_v43  ;;  %v2959_v42 = vadd.f32 %v4140_v52, %v2958_v5  ;;  %v3011_v1 = vmax.f32 %v2967_v29, 0.0  ;;  %v4810_v43 = vld [vmem:[%s6634_s6 + $0x48] sm:$0xff]  }
 0x722   :  { %v4674_v16 = vpop.f32.mrf.mxu0  ;;  %4723 = vmatprep.subr.bf16.mxu0 %v4810_v43 }
 0x723   :  { %4687 = vmatprep.mubr.msk.bf16.mxu0 %vm536_vm2, %v3021_v15  ;;  %v2970_v54 = vadd.f32 %v4674_v16, %v4140_v52  ;;  %v3009_v47 = vmax.f32 %v2959_v42, 0.0 }
 0x724   :  { %4688 = vmatmul.mubr.msk.bf16.vlgmr.msra.gmra.mxu0 %vm536_vm2, %v3022_v3  ;;  %v2961_v48 = vpop.f32.mrf.mxu0 }
 0x725   :  { %v2962_v33 = vadd.f32 %v4140_v52, %v2961_v48  ;;  %v3012_v37 = vmax.f32 %v2970_v54, 0.0  ;;  %4724 = vmatpush3.bf16.msra.mxu0 %v4810_v43 }
 0x727   :  { %v3010_v28 = vmax.f32 %v2962_v33, 0.0  ;;  %v3024_v17 = vpack.c.bf16 %v3012_v37, %v3011_v1 }
 0x729   :  { %v3023_v59 = vpack.c.bf16 %v3010_v28, %v3009_v47 }
 0x72b   :  { %4691 = vmatprep.mubr.msk.bf16.mxu0 %vm536_vm2, %v3023_v59 }
 0x72c   :  { %4692 = vmatmul.mubr.msk.bf16.gmra.mxu0 %vm536_vm2, %v3024_v17 }
 0x736   :  { %v4677_v62 = vpop.f32.mrf.mxu0 }
 0x737   :  { %v2983_v41 = vadd.f32 %v4677_v62, %v4140_v52 }
 0x738   :  { %v2974_v55 = vpop.f32.mrf.mxu0 }
 0x739   :  { %v2975_v20 = vadd.f32 %v4140_v52, %v2974_v55  ;;  %v3015_v39 = vmax.f32 %v2983_v41, 0.0 }
 0x73a   :  { %v4678_v19 = vpop.f32.mrf.mxu0 }
 0x73b   :  { %v2986_v24 = vadd.f32 %v4678_v19, %v4140_v52  ;;  %v3013_v53 = vmax.f32 %v2975_v20, 0.0 }
 0x73c   :  { %v2977_v12 = vpop.f32.mrf.mxu0 }
 0x73d   :  { %v2978_v56 = vadd.f32 %v4140_v52, %v2977_v12  ;;  %v3016_v46 = vmax.f32 %v2986_v24, 0.0 }
 0x73e   :  { %v4681_v7 = vpop.f32.mrf.mxu0 }
 0x73f   :  { %v3014_v51 = vmax.f32 %v2978_v56, 0.0  ;;  %v3026_v8 = vpack.c.bf16 %v3016_v46, %v3015_v39  ;;  %v2999_v4 = vadd.f32 %v4681_v7, %v4140_v52 }
 0x740   :  { %v2990_v58 = vpop.f32.mrf.mxu0 }
 0x741   :  { %v3025_v36 = vpack.c.bf16 %v3014_v51, %v3013_v53  ;;  %v2991_v11 = vadd.f32 %v4140_v52, %v2990_v58  ;;  %v3019_v9 = vmax.f32 %v2999_v4, 0.0 }
 0x742   :  { %v4682_v32 = vpop.f32.mrf.mxu0 }
 0x743   :  { %v3002_v27 = vadd.f32 %v4682_v32, %v4140_v52  ;;  %4695 = vmatprep.mubr.msk.bf16.mxu0 %vm536_vm2, %v3025_v36  ;;  %v3017_v57 = vmax.f32 %v2991_v11, 0.0 }
 0x744   :  { %v2993_v49 = vpop.f32.mrf.mxu0  ;;  %4696 = vmatmul.mubr.msk.bf16.gmra.mxu0 %vm536_vm2, %v3026_v8 }
 0x745   :  { %v2994_v2 = vadd.f32 %v4140_v52, %v2993_v49  ;;  %v3020_v35 = vmax.f32 %v3002_v27, 0.0  ;;  %v6301_v52 = vld [vmem:[%s6636_s7 + $0x3] ss:$0 sm:$0xff] }
 0x747   :  { %v3018_v31 = vmax.f32 %v2994_v2, 0.0  ;;  %v3028_v34 = vpack.c.bf16 %v3020_v35, %v3019_v9 }
 0x749   :  { %v3027_v38 = vpack.c.bf16 %v3018_v31, %v3017_v57 }
 0x74b   :  { %4699 = vmatprep.mubr.msk.bf16.mxu0 %vm536_vm2, %v3027_v38 }
 0x74c   :  { %4700 = vmatmul.mubr.msk.bf16.gmra.mxu0 %vm536_vm2, %v3028_v34 }
 0x7e4   :  { %v4689_v6 = vpop.f32.mrf.mxu0 }
 0x7e5   :  { %v3121_v15 = vadd.f32 %v4689_v6, %v6301_v52 }
 0x7e6   :  { %v3112_v61 = vpop.f32.mrf.mxu0 }
 0x7e7   :  { %v3113_v60 = vadd.f32 %v6301_v52, %v3112_v61  ;;  %v6314_v48 = vadd.f32 %v3121_v15, %v6179_v63 }
 0x7e8   :  { %v4690_v5 = vpop.f32.mrf.mxu0 }
 0x7e9   :  { %v3124_v3 = vadd.f32 %v4690_v5, %v6301_v52  ;;  %v6307_v42 = vadd.f32 %v3113_v60, %v6174_v23  ;;  %v3193_v59 = vmax.f32 %v6314_v48, 0.0 }
 0x7ea   :  { %v3115_v16 = vpop.f32.mrf.mxu0 }
 0x7eb   :  { %v6310_v54 = vadd.f32 %v3124_v3, %v6176_v30  ;;  %v3116_v29 = vadd.f32 %v6301_v52, %v3115_v16  ;;  %v3191_v28 = vmax.f32 %v6307_v42, 0.0 }
 0x7ec   :  { %v4693_v37 = vpop.f32.mrf.mxu0 }
 0x7ed   :  { %v6317_v33 = vadd.f32 %v3116_v29, %v6181_v10  ;;  %v3194_v47 = vmax.f32 %v6310_v54, 0.0  ;;  %v3137_v62 = vadd.f32 %v4693_v37, %v6301_v52 }
 0x7ee   :  { %v3128_v23 = vpop.f32.mrf.mxu0 }
 0x7ef   :  { %v3192_v1 = vmax.f32 %v6317_v33, 0.0  ;;  %v3129_v30 = vadd.f32 %v6301_v52, %v3128_v23  ;;  %v3208_v55 = vpack.c.bf16 %v3194_v47, %v3193_v59  ;;  %v6336_v12 = vadd.f32 %v3137_v62, %v6204_v40  ;;  %v4172_v23 = vld [vmem:[%s6635_s5 + $0x4] ss:$0 sm:$0xff] }
 0x7f0   :  { %v4694_v63 = vpop.f32.mrf.mxu0 }
 0x7f1   :  { %v3207_v17 = vpack.c.bf16 %v3192_v1, %v3191_v28  ;;  %v3140_v10 = vadd.f32 %v4694_v63, %v6301_v52  ;;  %v6328_v20 = vadd.f32 %v3129_v30, %v6201_v14  ;;  %v3197_v53 = vmax.f32 %v6336_v12, 0.0 }
 0x7f2   :  { %v3131_v19 = vpop.f32.mrf.mxu0 }
 0x7f3   :  { %4707 = vmatprep.mubr.msk.bf16.mxu1 %vm536_vm2, %v3207_v17  ;;  %v6331_v24 = vadd.f32 %v3140_v10, %v6198_v45  ;;  %v3132_v41 = vadd.f32 %v6301_v52, %v3131_v19  ;;  %v3195_v7 = vmax.f32 %v6328_v20, 0.0 }
 0x7f4   :  { %4708 = vmatmul.mubr.msk.bf16.vlgmr.msra.gmra.mxu1 %vm536_vm2, %v3208_v55 }
 0x7f5   :  { %v6339_v56 = vadd.f32 %v3132_v41, %v6207_v26  ;;  %v3198_v46 = vmax.f32 %v6331_v24, 0.0 }
 0x7f7   :  { %v3196_v14 = vmax.f32 %v6339_v56, 0.0  ;;  %v3210_v51 = vpack.c.bf16 %v3198_v46, %v3197_v53 }
 0x7f9   :  { %v3209_v45 = vpack.c.bf16 %v3196_v14, %v3195_v7 }
 0x7fb   :  { %4711 = vmatprep.mubr.msk.bf16.mxu1 %vm536_vm2, %v3209_v45 }
 0x7fc   :  { %4712 = vmatmul.mubr.msk.bf16.gmra.mxu1 %vm536_vm2, %v3210_v51 }
 0x804   :  { %v4697_v39 = vpop.f32.mrf.mxu0 }
 0x805   :  { %v3153_v26 = vadd.f32 %v4697_v39, %v6301_v52 }
 0x806   :  { %v3144_v40 = vpop.f32.mrf.mxu0 }
 0x807   :  { %v3145_v58 = vadd.f32 %v6301_v52, %v3144_v40  ;;  %v6358_v49 = vadd.f32 %v3153_v26, %v6241_v18 }
 0x808   :  { %v4698_v36 = vpop.f32.mrf.mxu0 }
 0x809   :  { %v3156_v8 = vadd.f32 %v4698_v36, %v6301_v52  ;;  %v6351_v11 = vadd.f32 %v3145_v58, %v6234_v13 }
 0x80a   :  { %v3147_v32 = vpop.f32.mrf.mxu0 }
 0x80b   :  { %v6354_v27 = vadd.f32 %v3156_v8, %v6237_v25  ;;  %v3148_v4 = vadd.f32 %v6301_v52, %v3147_v32  ;;  %v3199_v9 = vmax.f32 %v6351_v11, 0.0  ;;  %v3201_v25 = vmax.f32 %v6358_v49, 0.0 }
 0x80c   :  { %v4701_v2 = vpop.f32.mrf.mxu0 }
 0x80d   :  { %v6361_v35 = vadd.f32 %v3148_v4, %v6245_v0  ;;  %v3202_v57 = vmax.f32 %v6354_v27, 0.0  ;;  %v3169_v34 = vadd.f32 %v4701_v2, %v6301_v52 }
 0x80e   :  { %v3160_v31 = vpop.f32.mrf.mxu0 }
 0x80f   :  { %v3200_v13 = vmax.f32 %v6361_v35, 0.0  ;;  %v3161_v38 = vadd.f32 %v6301_v52, %v3160_v31  ;;  %v3212_v61 = vpack.c.bf16 %v3202_v57, %v3201_v25  ;;  %v6379_v3 = vadd.f32 %v3169_v34, %v6264_v44  ;;  %v4811_v44 = vld [vmem:[%s6634_s6 + $0x40] sm:$0xff]  }
 0x810   :  { %v4702_v43 = vpop.f32.mrf.mxu0  ;;  %4725 = vmatprep.subr.bf16.mxu0 %v4811_v44 }
 0x811   :  { %v3211_v18 = vpack.c.bf16 %v3200_v13, %v3199_v9  ;;  %v3172_v6 = vadd.f32 %v4702_v43, %v6301_v52  ;;  %v6371_v60 = vadd.f32 %v3161_v38, %v6259_v22  ;;  %4726 = vmatpush3.bf16.msra.mxu0 %v4811_v44 }
 0x812   :  { %v3163_v0 = vpop.f32.mrf.mxu0 }
 0x813   :  { %v6374_v15 = vadd.f32 %v3172_v6, %v6261_v50  ;;  %v3164_v5 = vadd.f32 %v6301_v52, %v3163_v0  ;;  %4715 = vmatprep.mubr.msk.bf16.mxu1 %vm536_vm2, %v3211_v18  ;;  %v3203_v22 = vmax.f32 %v6371_v60, 0.0  ;;  %v3205_v50 = vmax.f32 %v6379_v3, 0.0 }
 0x814   :  { %4716 = vmatmul.mubr.msk.bf16.gmra.mxu1 %vm536_vm2, %v3212_v61 }
 0x815   :  { %v6383_v16 = vadd.f32 %v3164_v5, %v6267_v21  ;;  %v3206_v29 = vmax.f32 %v6374_v15, 0.0  ;;  %v4812_v21 = vld [vmem:[%s6637_s8 + $0x8] sm:$0xff]  }
 0x816   :  { %4743 = vmatprep.subr.bf16.mxu1 %v4812_v21 }
 0x817   :  { %v3204_v37 = vmax.f32 %v6383_v16, 0.0  ;;  %v3214_v52 = vpack.c.bf16 %v3206_v29, %v3205_v50  ;;  %4744 = vmatpush3.bf16.msra.mxu1 %v4812_v21 }
 0x819   :  { %v3213_v47 = vpack.c.bf16 %v3204_v37, %v3203_v22 }
 0x81b   :  { %4719 = vmatprep.mubr.msk.bf16.mxu1 %vm536_vm2, %v3213_v47 }
 0x81c   :  { %4720 = vmatmul.mubr.msk.bf16.gmra.mxu1 %vm536_vm2, %v3214_v52 }
 0x8b4   :  { %v4709_v28 = vpop.f32.mrf.mxu1 }
 0x8b5   :  { %v3307_v62 = vadd.f32 %v4709_v28, %v4172_v23 }
 0x8b6   :  { %v3298_v1 = vpop.f32.mrf.mxu1 }
 0x8b7   :  { %v3299_v30 = vadd.f32 %v4172_v23, %v3298_v1  ;;  %v3363_v7 = vmax.f32 %v3307_v62, 0.0 }
 0x8b8   :  { %v4710_v59 = vpop.f32.mrf.mxu1 }
 0x8b9   :  { %v3310_v17 = vadd.f32 %v4710_v59, %v4172_v23  ;;  %v3361_v19 = vmax.f32 %v3299_v30, 0.0 }
 0x8ba   :  { %v3301_v63 = vpop.f32.mrf.mxu1 }
 0x8bb   :  { %v3302_v55 = vadd.f32 %v4172_v23, %v3301_v63  ;;  %v3364_v10 = vmax.f32 %v3310_v17, 0.0 }
 0x8bc   :  { %v4713_v46 = vpop.f32.mrf.mxu1 }
 0x8bd   :  { %v3362_v41 = vmax.f32 %v3302_v55, 0.0  ;;  %v3378_v45 = vpack.c.bf16 %v3364_v10, %v3363_v7  ;;  %v3323_v58 = vadd.f32 %v4713_v46, %v4172_v23 }
 0x8be   :  { %v3314_v53 = vpop.f32.mrf.mxu1 }
 0x8bf   :  { %v3377_v14 = vpack.c.bf16 %v3362_v41, %v3361_v19  ;;  %v3315_v39 = vadd.f32 %v4172_v23, %v3314_v53  ;;  %v3367_v2 = vmax.f32 %v3323_v58, 0.0  ;;  %v4813_v19 = vld [vmem:[%s6637_s8] sm:$0xff]  }
 0x8c0   :  { %v4714_v51 = vpop.f32.mrf.mxu1  ;;  %4745 = vmatprep.subr.bf16.mxu1 %v4813_v19 }
 0x8c1   :  { %4727 = vmatprep.mubr.msk.bf16.mxu0 %vm536_vm2, %v3377_v14  ;;  %v3326_v40 = vadd.f32 %v4714_v51, %v4172_v23  ;;  %v3365_v32 = vmax.f32 %v3315_v39, 0.0  ;;  %4746 = vmatpush3.bf16.msra.mxu1 %v4813_v19 }
 0x8c2   :  { %4728 = vmatmul.mubr.msk.bf16.vlgmr.msra.gmra.mxu0 %vm536_vm2, %v3378_v45  ;;  %v3317_v26 = vpop.f32.mrf.mxu1 }
 0x8c3   :  { %v3318_v36 = vadd.f32 %v4172_v23, %v3317_v26  ;;  %v3368_v8 = vmax.f32 %v3326_v40, 0.0 }
 0x8c5   :  { %v3366_v4 = vmax.f32 %v3318_v36, 0.0  ;;  %v3380_v31 = vpack.c.bf16 %v3368_v8, %v3367_v2 }
 0x8c7   :  { %v3379_v57 = vpack.c.bf16 %v3366_v4, %v3365_v32 }
 0x8c9   :  { %4731 = vmatprep.mubr.msk.bf16.mxu0 %vm536_vm2, %v3379_v57 }
 0x8ca   :  { %4732 = vmatmul.mubr.msk.bf16.gmra.mxu0 %vm536_vm2, %v3380_v31 }
 0x8d4   :  { %v4717_v9 = vpop.f32.mrf.mxu1 }
 0x8d5   :  { %v3339_v43 = vadd.f32 %v4717_v9, %v4172_v23 }
 0x8d6   :  { %v3330_v13 = vpop.f32.mrf.mxu1 }
 0x8d7   :  { %v3331_v25 = vadd.f32 %v4172_v23, %v3330_v13  ;;  %v3371_v22 = vmax.f32 %v3339_v43, 0.0 }
 0x8d8   :  { %v4718_v38 = vpop.f32.mrf.mxu1 }
 0x8d9   :  { %v3342_v34 = vadd.f32 %v4718_v38, %v4172_v23  ;;  %v3369_v5 = vmax.f32 %v3331_v25, 0.0 }
 0x8da   :  { %v3333_v18 = vpop.f32.mrf.mxu1 }
 0x8db   :  { %v3334_v6 = vadd.f32 %v4172_v23, %v3333_v18  ;;  %v3372_v61 = vmax.f32 %v3342_v34, 0.0 }
 0x8dc   :  { %v4721_v0 = vpop.f32.mrf.mxu1 }
 0x8dd   :  { %v3370_v29 = vmax.f32 %v3334_v6, 0.0  ;;  %v3382_v47 = vpack.c.bf16 %v3372_v61, %v3371_v22  ;;  %v3355_v28 = vadd.f32 %v4721_v0, %v4172_v23 }
 0x8de   :  { %v3346_v37 = vpop.f32.mrf.mxu1 }
 0x8df   :  { %v3381_v50 = vpack.c.bf16 %v3370_v29, %v3369_v5  ;;  %v3347_v44 = vadd.f32 %v4172_v23, %v3346_v37  ;;  %v3375_v63 = vmax.f32 %v3355_v28, 0.0 }
 0x8e0   :  { %v4722_v52 = vpop.f32.mrf.mxu1 }
 0x8e1   :  { %v3358_v21 = vadd.f32 %v4722_v52, %v4172_v23  ;;  %4735 = vmatprep.mubr.msk.bf16.mxu0 %vm536_vm2, %v3381_v50  ;;  %v3373_v17 = vmax.f32 %v3347_v44, 0.0 }
 0x8e2   :  { %v3349_v1 = vpop.f32.mrf.mxu1  ;;  %4736 = vmatmul.mubr.msk.bf16.gmra.mxu0 %vm536_vm2, %v3382_v47 }
 0x8e3   :  { %v3350_v59 = vadd.f32 %v4172_v23, %v3349_v1  ;;  %v3376_v30 = vmax.f32 %v3358_v21, 0.0  ;;  %v6414_v23 = vld [vmem:[%s6636_s7 + $0x4] ss:$0 sm:$0xff] }
 0x8e5   :  { %v3374_v62 = vmax.f32 %v3350_v59, 0.0  ;;  %v3384_v10 = vpack.c.bf16 %v3376_v30, %v3375_v63 }
 0x8e7   :  { %v3383_v55 = vpack.c.bf16 %v3374_v62, %v3373_v17 }
 0x8e9   :  { %4739 = vmatprep.mubr.msk.bf16.mxu0 %vm536_vm2, %v3383_v55 }
 0x8ea   :  { %4740 = vmatmul.mubr.msk.bf16.gmra.mxu0 %vm536_vm2, %v3384_v10 }
 0x982   :  { %v4729_v41 = vpop.f32.mrf.mxu0 }
 0x983   :  { %v3477_v14 = vadd.f32 %v4729_v41, %v6414_v23 }
 0x984   :  { %v3468_v46 = vpop.f32.mrf.mxu0 }
 0x985   :  { %v3469_v7 = vadd.f32 %v6414_v23, %v3468_v46  ;;  %v3533_v26 = vadd.f32 %v3477_v14, %v6314_v48 }
 0x986   :  { %v4730_v53 = vpop.f32.mrf.mxu0 }
 0x987   :  { %v3480_v45 = vadd.f32 %v4730_v53, %v6414_v23  ;;  %v3531_v39 = vadd.f32 %v3469_v7, %v6307_v42  ;;  %v3549_v31 = vmax.f32 %v3533_v26, 0.0 }
 0x988   :  { %v3471_v51 = vpop.f32.mrf.mxu0 }
 0x989   :  { %v3534_v40 = vadd.f32 %v3480_v45, %v6310_v54  ;;  %v3472_v58 = vadd.f32 %v6414_v23, %v3471_v51  ;;  %v3547_v4 = vmax.f32 %v3531_v39, 0.0 }
 0x98a   :  { %v4733_v8 = vpop.f32.mrf.mxu0 }
 0x98b   :  { %v3532_v36 = vadd.f32 %v3472_v58, %v6317_v33  ;;  %v3550_v32 = vmax.f32 %v3534_v40, 0.0  ;;  %v3493_v38 = vadd.f32 %v4733_v8, %v6414_v23 }
 0x98c   :  { %v3484_v57 = vpop.f32.mrf.mxu0 }
 0x98d   :  { %v3548_v2 = vmax.f32 %v3532_v36, 0.0  ;;  %v3485_v9 = vadd.f32 %v6414_v23, %v3484_v57  ;;  %v3564_v25 = vpack.c.bf16 %v3550_v32, %v3549_v31  ;;  %v3537_v18 = vadd.f32 %v3493_v38, %v6336_v12  ;;  %v3717_v31 = vld [vmem:[%s6639_s1] sm:$0xff]  ;;  %v3720_v38 = vld [vmem:[%s6639_s1 + $0x18] sm:$0xff] }
 0x98e   :  { %v4734_v42 = vpop.f32.mrf.mxu0 }
 0x98f   :  { %v3563_v13 = vpack.c.bf16 %v3548_v2, %v3547_v4  ;;  %v3496_v54 = vadd.f32 %v4734_v42, %v6414_v23  ;;  %v3535_v48 = vadd.f32 %v3485_v9, %v6328_v20  ;;  %v3553_v29 = vmax.f32 %v3537_v18, 0.0 }
 0x990   :  { %v3487_v34 = vpop.f32.mrf.mxu0  ;;  %v3733_v42 = vsub.f32 0.0, %v3717_v31  ;;  %v3736_v18 = vsub.f32 0.0, %v3720_v38 }
 0x991   :  { %4747 = vmatprep.mubr.msk.bf16.mxu1 %vm536_vm2, %v3563_v13  ;;  %v3538_v33 = vadd.f32 %v3496_v54, %v6331_v24  ;;  %v3488_v43 = vadd.f32 %v6414_v23, %v3487_v34  ;;  %v3551_v0 = vmax.f32 %v3535_v48, 0.0  ;;  %v3718_v48 = vld [vmem:[%s6639_s1 + $0x8] sm:$0xff] }
 0x992   :  { %4748 = vmatmul.mubr.msk.bf16.vlgmr.msra.gmra.mxu1 %vm536_vm2, %v3564_v25 }
 0x993   :  { %v3536_v6 = vadd.f32 %v3488_v43, %v6339_v56  ;;  %v3554_v61 = vmax.f32 %v3538_v33, 0.0 }
 0x995   :  { %v3552_v5 = vmax.f32 %v3536_v6, 0.0  ;;  %v3566_v37 = vpack.c.bf16 %v3554_v61, %v3553_v29 }
 0x997   :  { %v3565_v22 = vpack.c.bf16 %v3552_v5, %v3551_v0  ;;  %v3734_v0 = vsub.f32 0.0, %v3718_v48  ;;  %v3727_v48 = vld [vmem:[%s6639_s1 + $0x50] sm:$0xff] }
 0x999   :  { %4751 = vmatprep.mubr.msk.bf16.mxu1 %vm536_vm2, %v3565_v22 }
 0x99a   :  { %4752 = vmatmul.mubr.msk.bf16.gmra.mxu1 %vm536_vm2, %v3566_v37 }
 0x9a2   :  { %v4737_v20 = vpop.f32.mrf.mxu0 }
 0x9a3   :  { %v3509_v47 = vadd.f32 %v4737_v20, %v6414_v23 }
 0x9a4   :  { %v3500_v24 = vpop.f32.mrf.mxu0 }
 0x9a5   :  { %v3501_v50 = vadd.f32 %v6414_v23, %v3500_v24  ;;  %v3541_v1 = vadd.f32 %v3509_v47, %v6358_v49  ;;  %v3723_v24 = vld [vmem:[%s6639_s1 + $0x30] sm:$0xff] }
 0x9a6   :  { %v4738_v52 = vpop.f32.mrf.mxu0 }
 0x9a7   :  { %v3512_v12 = vadd.f32 %v4738_v52, %v6414_v23  ;;  %v3539_v44 = vadd.f32 %v3501_v50, %v6351_v11  ;;  %v3557_v19 = vmax.f32 %v3541_v1, 0.0 }
 0x9a8   :  { %v3503_v56 = vpop.f32.mrf.mxu0 }
 0x9a9   :  { %v3542_v21 = vadd.f32 %v3512_v12, %v6354_v27  ;;  %v3504_v28 = vadd.f32 %v6414_v23, %v3503_v56  ;;  %v3555_v63 = vmax.f32 %v3539_v44, 0.0  ;;  %v3739_v56 = vsub.f32 0.0, %v3723_v24 }
 0x9aa   :  { %v4741_v59 = vpop.f32.mrf.mxu0 }
 0x9ab   :  { %v3540_v30 = vadd.f32 %v3504_v28, %v6361_v35  ;;  %v3558_v17 = vmax.f32 %v3542_v21, 0.0  ;;  %v3525_v41 = vadd.f32 %v4741_v59, %v6414_v23 }
 0x9ac   :  { %v3516_v62 = vpop.f32.mrf.mxu0 }
 0x9ad   :  { %v3556_v55 = vmax.f32 %v3540_v30, 0.0  ;;  %v3517_v10 = vadd.f32 %v6414_v23, %v3516_v62  ;;  %v3568_v7 = vpack.c.bf16 %v3558_v17, %v3557_v19  ;;  %v3545_v45 = vadd.f32 %v3525_v41, %v6379_v3  ;;  %v3719_v3 = vld [vmem:[%s6639_s1 + $0x10] sm:$0xff]  ;;  %v3721_v30 = vld [vmem:[%s6639_s1 + $0x20] sm:$0xff] }
 0x9ae   :  { %v4742_v46 = vpop.f32.mrf.mxu0  ;;  %v3735_v32 = vsub.f32 0.0, %v3719_v3 }
 0x9af   :  { %v3567_v11 = vpack.c.bf16 %v3556_v55, %v3555_v63  ;;  %v3528_v27 = vadd.f32 %v4742_v46, %v6414_v23  ;;  %v3543_v49 = vadd.f32 %v3517_v10, %v6371_v60  ;;  %v3561_v26 = vmax.f32 %v3545_v45, 0.0  ;;  %v6459_v60 = vld [vmem:[%s6638_s9] ss:$0 sm:$0xff]  ;;  %v3724_v63 = vld [vmem:[%s6639_s1 + $0x38] sm:$0xff] }
 0x9b0   :  { %v3519_v14 = vpop.f32.mrf.mxu0  ;;  %v3737_v46 = vsub.f32 0.0, %v3721_v30 }
 0x9b1   :  { %v3546_v53 = vadd.f32 %v3528_v27, %v6374_v15  ;;  %v3520_v35 = vadd.f32 %v6414_v23, %v3519_v14  ;;  %4755 = vmatprep.mubr.msk.bf16.mxu1 %vm536_vm2, %v3567_v11  ;;  %v3559_v40 = vmax.f32 %v3543_v49, 0.0  ;;  %v3740_v14 = vsub.f32 0.0, %v3724_v63  ;;  %v3728_v63 = vld [vmem:[%s6639_s1 + $0x58] sm:$0xff] }
 0x9b2   :  { %4756 = vmatmul.mubr.msk.bf16.gmra.mxu1 %vm536_vm2, %v3568_v7 }
 0x9b3   :  { %v3544_v51 = vadd.f32 %v3520_v35, %v6383_v16  ;;  %v3562_v39 = vmax.f32 %v3546_v53, 0.0 }
 0x9b5   :  { %v3560_v58 = vmax.f32 %v3544_v51, 0.0  ;;  %v3570_v8 = vpack.c.bf16 %v3562_v39, %v3561_v26  ;;  %v3722_v26 = vld [vmem:[%s6639_s1 + $0x28] sm:$0xff] }
 0x9b7   :  { %v3569_v36 = vpack.c.bf16 %v3560_v58, %v3559_v40 }
 0x9b9   :  { %4759 = vmatprep.mubr.msk.bf16.mxu1 %vm536_vm2, %v3569_v36 }
 0x9ba   :  { %4760 = vmatmul.mubr.msk.bf16.gmra.mxu1 %vm536_vm2, %v3570_v8 }
 0xa52   :  { %v4749_v15 = vpop.f32.mrf.mxu1 }
 0xa53   :  { %v3661_v16 = vadd.f32 %v4749_v15, %v6459_v60  ;;  %v3715_v15 = vlaneseq }
 0xa54   :  { %v3652_v23 = vpop.f32.mrf.mxu1 }
 0xa55   :  { %v3751_v4 = vmax.f32 %v3661_v16, 0.0  ;;  %v4212_v2 = vmul.f32 -1.442695, %v3661_v16  ;;  %v3653_v57 = vadd.f32 %v6459_v60, %v3652_v23 }
 0xa56   :  { %v4750_v9 = vpop.f32.mrf.mxu1 }
 0xa57   :  { %4814 = vpow2.f32 %v4212_v2  ;;  %v4210_v13 = vmul.f32 -1.442695, %v3653_v57  ;;  %v3749_v25 = vmax.f32 %v3653_v57, 0.0  ;;  %v3664_v54 = vadd.f32 %v4750_v9, %v6459_v60 }
 0xa58   :  { %v3655_v34 = vpop.f32.mrf.mxu1  ;;  %v3767_v33 = vmul.f32 %v3751_v4, %v3735_v32  ;;  %v3738_v32 = vsub.f32 0.0, %v3722_v26  ;;  %v6493_v9 = vand.u32 127, %v3715_v15 }
 0xa59   :  { %4816 = vpow2.f32 %v4210_v13  ;;  %v3656_v43 = vadd.f32 %v6459_v60, %v3655_v34  ;;  %v3752_v6 = vmax.f32 %v3664_v54, 0.0  ;;  %v4213_v61 = vmul.f32 -1.442695, %v3664_v54 }
 0xa5a   :  { %v4753_v29 = vpop.f32.mrf.mxu1  ;;  %v3765_v22 = vmul.f32 %v3749_v25, %v3733_v42  ;;  %v3785_v50 = vmul.f32 1.442695, %v3767_v33  ;;  %vm3829_vm3 = vcmp.eq.s32.totalorder %v6493_v9, 0 }
 0xa5b   :  { %v4211_v5 = vmul.f32 -1.442695, %v3656_v43  ;;  %4818 = vpow2.f32 %v4213_v61  ;;  %v3750_v37 = vmax.f32 %v3656_v43, 0.0  ;;  %v3677_v20 = vadd.f32 %v4753_v29, %v6459_v60 }
 0xa5c   :  { %v3668_v47 = vpop.f32.mrf.mxu1  ;;  %v3768_v52 = vmul.f32 %v3752_v6, %v3736_v18  ;;  %v3781_v1 = vmul.f32 1.442695, %v3765_v22 }
 0xa5d   :  { %4820 = vpow2.f32 %v4211_v5  ;;  %v4216_v12 = vmul.f32 -1.442695, %v3677_v20  ;;  %v3755_v44 = vmax.f32 %v3677_v20, 0.0  ;;  %v3669_v21 = vadd.f32 %v6459_v60, %v3668_v47 }
 0xa5e   :  { %v4754_v28 = vpop.f32.mrf.mxu1  ;;  %v3766_v59 = vmul.f32 %v3750_v37, %v3734_v0  ;;  %4822 = vpow2.f32 %v3785_v50  ;;  %v3787_v55 = vmul.f32 1.442695, %v3768_v52  ;;  %v3743_v37 = vsub.f32 0.0, %v3727_v48 }
 0xa5f   :  { %v3680_v17 = vadd.f32 %v4754_v28, %v6459_v60  ;;  %v4214_v62 = vmul.f32 -1.442695, %v3669_v21  ;;  %4824 = vpow2.f32 %v4216_v12  ;;  %v3771_v41 = vmul.f32 %v3755_v44, %v3739_v56  ;;  %v3725_v12 = vld [vmem:[%s6639_s1 + $0x40] sm:$0xff] }
 0xa60   :  { %v3671_v19 = vpop.f32.mrf.mxu1  ;;  %v3753_v11 = vmax.f32 %v3669_v21, 0.0  ;;  %v3783_v7 = vmul.f32 1.442695, %v3766_v59 }
 0xa61   :  { %v4217_v10 = vmul.f32 -1.442695, %v3680_v17  ;;  %4826 = vpow2.f32 %v4214_v62  ;;  %v3756_v49 = vmax.f32 %v3680_v17, 0.0  ;;  %v3672_v35 = vadd.f32 %v6459_v60, %v3671_v19 }
 0xa62   :  { %4828 = vpow2.f32 %v3781_v1  ;;  %v3793_v39 = vmul.f32 1.442695, %v3771_v41  ;;  %v3769_v40 = vmul.f32 %v3753_v11, %v3737_v46  ;;  %v3741_v17 = vsub.f32 0.0, %v3725_v12 }
 0xa63   :  { %4830 = vpow2.f32 %v4217_v10  ;;  %v3772_v58 = vmul.f32 %v3756_v49, %v3740_v14  ;;  %v4215_v8 = vmul.f32 -1.442695, %v3672_v35  ;;  %v3754_v57 = vmax.f32 %v3672_v35, 0.0  ;;  %v3726_v10 = vld [vmem:[%s6639_s1 + $0x48] sm:$0xff] }
 0xa64   :  { %v4815_v27 = vpop.eup %4814  ;;  %4832 = vpow2.f32 %v3787_v55  ;;  %v3789_v23 = vmul.f32 1.442695, %v3769_v40  ;;  %v3744_v40 = vsub.f32 0.0, %v3728_v63 }
 0xa65   :  { %v3880_v53 = vadd.f32 1.0, %v4815_v27  ;;  %v3795_v2 = vmul.f32 1.442695, %v3772_v58  ;;  %v3770_v25 = vmul.f32 %v3754_v57, %v3738_v32  ;;  %v6526_v27 = vld [vmem:[%s6639_s1 + $0x70] sm:$0xff]  ;;  %v3742_v58 = vsub.f32 0.0, %v3726_v10 }
 0xa66   :  { %v4817_v45 = vpop.eup %4816 }
 0xa67   :  { %4834 = vrcp.f32 %v3880_v53  ;;  %v3878_v51 = vadd.f32 1.0, %v4817_v45  ;;  %v3791_v22 = vmul.f32 1.442695, %v3770_v25  ;;  %v6534_v45 = vld [vmem:[%s6639_s1 + $0x60] sm:$0xff] }
 0xa68   :  { %4836 = vpow2.f32 %v3783_v7  ;;  %v4819_v36 = vpop.eup %4818  ;;  %v3745_v57 = vsub.f32 0.0, %v6534_v45 }
 0xa69   :  { %4838 = vrcp.f32 %v3878_v51  ;;  %v3881_v3 = vadd.f32 1.0, %v4819_v36 }
 0xa6a   :  { %v4821_v16 = vpop.eup %4820  ;;  %4840 = vpow2.f32 %v3793_v39 }
 0xa6b   :  { %4842 = vrcp.f32 %v3881_v3  ;;  %v3879_v4 = vadd.f32 1.0, %v4821_v16  ;;  %v4823_v31 = vpop.eup %4822  ;;  %v3747_v3 = vsub.f32 0.0, %v6526_v27 }
 0xa6c   :  { %4844 = vpow2.f32 %v4215_v8  ;;  %v4825_v13 = vpop.eup %4824  ;;  %v3815_v6 = vsub.f32 1.0, %v4823_v31 }
 0xa6d   :  { %4846 = vrcp.f32 %v3879_v4  ;;  %v3884_v42 = vadd.f32 1.0, %v4825_v13 }
 0xa6e   :  { %4848 = vpow2.f32 %v3789_v23  ;;  %v4827_v38 = vpop.eup %4826  ;;  %v3732_v23 = vld [vmem:[%s6639_s1 + $0x78] sm:$0xff] }
 0xa6f   :  { %4850 = vpow2.f32 %v3795_v2  ;;  %v4829_v54 = vpop.eup %4828  ;;  %v3882_v34 = vadd.f32 1.0, %v4827_v38 }
 0xa70   :  { %v4831_v33 = vpop.eup %4830  ;;  %4852 = vrcp.f32 %v3884_v42  ;;  %v3813_v29 = vsub.f32 1.0, %v4829_v54 }
 0xa71   :  { %v4833_v18 = vpop.eup %4832  ;;  %4854 = vrcp.f32 %v3882_v34  ;;  %v3885_v61 = vadd.f32 1.0, %v4831_v33 }
 0xa72   :  { %v4757_v43 = vpop.f32.mrf.mxu1  ;;  %v3816_v30 = vsub.f32 1.0, %v4833_v18 }
 0xa73   :  { %v3693_v0 = vadd.f32 %v4757_v43, %v6459_v60  ;;  %4856 = vrcp.f32 %v3885_v61  ;;  %v3748_v43 = vsub.f32 0.0, %v3732_v23 }
 0xa74   :  { %v4835_v5 = vpop.eup %4834  ;;  %v3684_v20 = vpop.f32.mrf.mxu1 }
 0xa75   :  { %v4837_v24 = vpop.eup %4836  ;;  %v3928_v50 = vsel %vm3829_vm3, %v3815_v6, %v4835_v5  ;;  %v3759_v47 = vmax.f32 %v3693_v0, 0.0  ;;  %v4220_v52 = vmul.f32 -1.442695, %v3693_v0  ;;  %v3685_v44 = vadd.f32 %v6459_v60, %v3684_v20 }
 0xa76   :  { %v4839_v56 = vpop.eup %4838  ;;  %3945 = vst.msk [vmem:[%s6640_s10 + $0x10] sm:$0xff] %vm3942_vm4, %v3928_v50  ;;  %v4758_v21 = vpop.f32.mrf.mxu1  ;;  %v3814_v41 = vsub.f32 1.0, %v4837_v24 }
 0xa77   :  { %v3926_v28 = vsel %vm3829_vm3, %v3813_v29, %v4839_v56  ;;  %4858 = vpow2.f32 %v4220_v52  ;;  %v3696_v1 = vadd.f32 %v4758_v21, %v6459_v60  ;;  %v4841_v59 = vpop.eup %4840  ;;  %v4218_v62 = vmul.f32 -1.442695, %v3685_v44  ;;  %v3730_v21 = vld [vmem:[%s6639_s1 + $0x68] sm:$0xff] }
 0xa78   :  { %3943 = vst.msk [vmem:[%s6640_s10] sm:$0xff] %vm3942_vm4, %v3926_v28  ;;  %v3687_v55 = vpop.f32.mrf.mxu1  ;;  %v4843_v19 = vpop.eup %4842  ;;  %4860 = vpow2.f32 %v3791_v22  ;;  %v3775_v46 = vmul.f32 %v3759_v47, %v3743_v37  ;;  %v3757_v49 = vmax.f32 %v3685_v44, 0.0  ;;  %v3819_v4 = vsub.f32 1.0, %v4841_v59 }
 0xa79   :  { %v4221_v11 = vmul.f32 -1.442695, %v3696_v1  ;;  %v4845_v7 = vpop.eup %4844  ;;  %v3929_v14 = vsel %vm3829_vm3, %v3816_v30, %v4843_v19  ;;  %4862 = vpow2.f32 %v4218_v62  ;;  %v3688_v53 = vadd.f32 %v6459_v60, %v3687_v55 }
 0xa7a   :  { %v4761_v35 = vpop.f32.mrf.mxu1  ;;  %v4847_v51 = vpop.eup %4846  ;;  %3946 = vst.msk [vmem:[%s6640_s10 + $0x18] sm:$0xff] %vm3942_vm4, %v3929_v14  ;;  %v3883_v39 = vadd.f32 1.0, %v4845_v7  ;;  %v3760_v15 = vmax.f32 %v3696_v1, 0.0  ;;  %v3801_v31 = vmul.f32 1.442695, %v3775_v46  ;;  %v3773_v13 = vmul.f32 %v3757_v49, %v3741_v17 }
 0xa7b   :  { %v3709_v26 = vadd.f32 %v4761_v35, %v6459_v60  ;;  %v4849_v36 = vpop.eup %4848  ;;  %v3927_v8 = vsel %vm3829_vm3, %v3814_v41, %v4847_v51  ;;  %4864 = vpow2.f32 %v4221_v11  ;;  %v4219_v2 = vmul.f32 -1.442695, %v3688_v53 }
 0xa7c   :  { %v3700_v16 = vpop.f32.mrf.mxu1  ;;  %v4851_v32 = vpop.eup %4850  ;;  %3944 = vst.msk [vmem:[%s6640_s10 + $0x8] sm:$0xff] %vm3942_vm4, %v3927_v8  ;;  %4866 = vrcp.f32 %v3883_v39  ;;  %v3817_v34 = vsub.f32 1.0, %v4849_v36  ;;  %v3758_v48 = vmax.f32 %v3688_v53, 0.0  ;;  %v3776_v0 = vmul.f32 %v3760_v15, %v3744_v40 }
 0xa7d   :  { %v4224_v38 = vmul.f32 -1.442695, %v3709_v26  ;;  %v3701_v42 = vadd.f32 %v6459_v60, %v3700_v16  ;;  %v4853_v54 = vpop.eup %4852  ;;  %v3820_v61 = vsub.f32 1.0, %v4851_v32  ;;  %4868 = vpow2.f32 %v4219_v2 }
 0xa7e   :  { %v4762_v25 = vpop.f32.mrf.mxu1  ;;  %v4855_v18 = vpop.eup %4854  ;;  %v3932_v6 = vsel %vm3829_vm3, %v3819_v4, %v4853_v54  ;;  %v3763_v22 = vmax.f32 %v3709_v26, 0.0  ;;  %v3797_v24 = vmul.f32 1.442695, %v3773_v13  ;;  %v3774_v12 = vmul.f32 %v3758_v48, %v3742_v58 }
 0xa7f   :  { %v3712_v33 = vadd.f32 %v4762_v25, %v6459_v60  ;;  %3949 = vst.msk [vmem:[%s6640_s10 + $0x30] sm:$0xff] %vm3942_vm4, %v3932_v6  ;;  %v3930_v29 = vsel %vm3829_vm3, %v3817_v34, %v4855_v18  ;;  %4870 = vpow2.f32 %v4224_v38  ;;  %v4222_v37 = vmul.f32 -1.442695, %v3701_v42 }
 0xa80   :  { %v3703_v5 = vpop.f32.mrf.mxu1  ;;  %v4857_v20 = vpop.eup %4856  ;;  %3947 = vst.msk [vmem:[%s6640_s10 + $0x20] sm:$0xff] %vm3942_vm4, %v3930_v29  ;;  %4872 = vpow2.f32 %v3801_v31  ;;  %v3761_v50 = vmax.f32 %v3701_v42, 0.0  ;;  %v3803_v1 = vmul.f32 1.442695, %v3776_v0  ;;  %v3779_v30 = vmul.f32 %v3763_v22, %v3747_v3 }
 0xa81   :  { %v4225_v47 = vmul.f32 -1.442695, %v3712_v33  ;;  %v3933_v52 = vsel %vm3829_vm3, %v3820_v61, %v4857_v20  ;;  %v3764_v56 = vmax.f32 %v3712_v33, 0.0  ;;  %v3704_v44 = vadd.f32 %v6459_v60, %v3703_v5 }
 0xa82   :  { %3950 = vst.msk [vmem:[%s6640_s10 + $0x38] sm:$0xff] %vm3942_vm4, %v3933_v52  ;;  %4874 = vpow2.f32 %v4222_v37  ;;  %v3777_v63 = vmul.f32 %v3761_v50, %v3745_v57  ;;  %v3746_v60 = vsub.f32 0.0, %v3730_v21  ;;  %v3799_v10 = vmul.f32 1.442695, %v3774_v12 }
 0xa83   :  { %4876 = vpow2.f32 %v4225_v47  ;;  %v4223_v17 = vmul.f32 -1.442695, %v3704_v44  ;;  %v3780_v19 = vmul.f32 %v3764_v56, %v3748_v43  ;;  %v3762_v41 = vmax.f32 %v3704_v44, 0.0 }
 0xa84   :  { %v4859_v28 = vpop.eup %4858  ;;  %4878 = vpow2.f32 %v3797_v24  ;;  %v3809_v7 = vmul.f32 1.442695, %v3779_v30  ;;  %v3805_v53 = vmul.f32 1.442695, %v3777_v63 }
 0xa85   :  { %v3888_v59 = vadd.f32 1.0, %v4859_v28  ;;  %v4861_v62 = vpop.eup %4860  ;;  %v3811_v45 = vmul.f32 1.442695, %v3780_v19  ;;  %v3778_v51 = vmul.f32 %v3762_v41, %v3746_v60 }
 0xa86   :  { %v4863_v55 = vpop.eup %4862  ;;  %v3818_v27 = vsub.f32 1.0, %v4861_v62 }
 0xa87   :  { %4880 = vrcp.f32 %v3888_v59  ;;  %v3886_v46 = vadd.f32 1.0, %v4863_v55  ;;  %v3807_v8 = vmul.f32 1.442695, %v3778_v51 }
 0xa88   :  { %4882 = vpow2.f32 %v3803_v1  ;;  %v4865_v11 = vpop.eup %4864 }
 0xa89   :  { %4884 = vpow2.f32 %v4223_v17  ;;  %v4867_v14 = vpop.eup %4866  ;;  %v3889_v49 = vadd.f32 1.0, %v4865_v11 }
 0xa8a   :  { %4886 = vrcp.f32 %v3886_v46  ;;  %v3931_v35 = vsel %vm3829_vm3, %v3818_v27, %v4867_v14  ;;  %v4869_v39 = vpop.eup %4868 }
 0xa8b   :  { %4888 = vpow2.f32 %v3799_v10  ;;  %3948 = vst.msk [vmem:[%s6640_s10 + $0x28] sm:$0xff] %vm3942_vm4, %v3931_v35  ;;  %v3887_v58 = vadd.f32 1.0, %v4869_v39 }
 0xa8c   :  { %4890 = vrcp.f32 %v3889_v49  ;;  %v4871_v40 = vpop.eup %4870 }
 0xa8d   :  { %4892 = vpow2.f32 %v3809_v7  ;;  %v4873_v26 = vpop.eup %4872  ;;  %v3892_v36 = vadd.f32 1.0, %v4871_v40 }
 0xa8e   :  { %4894 = vpow2.f32 %v3805_v53  ;;  %v3823_v32 = vsub.f32 1.0, %v4873_v26 }
 0xa8f   :  { %4896 = vpow2.f32 %v3811_v45  ;;  %v4875_v15 = vpop.eup %4874 }
 0xa90   :  { %4898 = vrcp.f32 %v3887_v58  ;;  %v4877_v3 = vpop.eup %4876  ;;  %v3890_v16 = vadd.f32 1.0, %v4875_v15 }
 0xa91   :  { %4900 = vrcp.f32 %v3892_v36  ;;  %v4879_v23 = vpop.eup %4878  ;;  %v3893_v4 = vadd.f32 1.0, %v4877_v3 }
 0xa92   :  { %4902 = vpow2.f32 %v3807_v8  ;;  %v3821_v38 = vsub.f32 1.0, %v4879_v23 }
 0xa93   :  { %4904 = vrcp.f32 %v3890_v16 }
 0xa94   :  { %v4881_v2 = vpop.eup %4880  ;;  %4906 = vrcp.f32 %v3893_v4 }
 0xa95   :  { %v4883_v57 = vpop.eup %4882  ;;  %v3936_v31 = vsel %vm3829_vm3, %v3823_v32, %v4881_v2 }
 0xa96   :  { %v4885_v13 = vpop.eup %4884  ;;  %3953 = vst.msk [vmem:[%s6640_s10 + $0x50] sm:$0xff] %vm3942_vm4, %v3936_v31  ;;  %v3824_v48 = vsub.f32 1.0, %v4883_v57 }
 0xa97   :  { %v4887_v42 = vpop.eup %4886  ;;  %v3891_v25 = vadd.f32 1.0, %v4885_v13 }
 0xa98   :  { %v4889_v54 = vpop.eup %4888  ;;  %v3934_v34 = vsel %vm3829_vm3, %v3821_v38, %v4887_v42 }
 0xa99   :  { %v4891_v33 = vpop.eup %4890  ;;  %3951 = vst.msk [vmem:[%s6640_s10 + $0x40] sm:$0xff] %vm3942_vm4, %v3934_v34  ;;  %4908 = vrcp.f32 %v3891_v25  ;;  %v3822_v0 = vsub.f32 1.0, %v4889_v54 }
 0xa9a   :  { %v4893_v43 = vpop.eup %4892  ;;  %v3937_v18 = vsel %vm3829_vm3, %v3824_v48, %v4891_v33 }
 0xa9b   :  { %v4895_v6 = vpop.eup %4894  ;;  %3954 = vst.msk [vmem:[%s6640_s10 + $0x58] sm:$0xff] %vm3942_vm4, %v3937_v18  ;;  %v3827_v29 = vsub.f32 1.0, %v4893_v43 }
 0xa9c   :  { %v4897_v61 = vpop.eup %4896  ;;  %v3825_v50 = vsub.f32 1.0, %v4895_v6 }
 0xa9d   :  { %v4899_v5 = vpop.eup %4898  ;;  %v3828_v52 = vsub.f32 1.0, %v4897_v61 }
 0xa9e   :  { %v4901_v22 = vpop.eup %4900  ;;  %v3935_v37 = vsel %vm3829_vm3, %v3822_v0, %v4899_v5 }
 0xa9f   :  { %3952 = vst.msk [vmem:[%s6640_s10 + $0x48] sm:$0xff] %vm3942_vm4, %v3935_v37  ;;  %v3940_v20 = vsel %vm3829_vm3, %v3827_v29, %v4901_v22  ;;  %v4903_v24 = vpop.eup %4902 }
 0xaa0   :  { %3957 = vst.msk [vmem:[%s6640_s10 + $0x70] sm:$0xff] %vm3942_vm4, %v3940_v20  ;;  %v4905_v47 = vpop.eup %4904  ;;  %v3826_v21 = vsub.f32 1.0, %v4903_v24 }
 0xaa1   :  { %v4907_v12 = vpop.eup %4906  ;;  %v3938_v56 = vsel %vm3829_vm3, %v3825_v50, %v4905_v47 }
 0xaa2   :  { %3955 = vst.msk [vmem:[%s6640_s10 + $0x60] sm:$0xff] %vm3942_vm4, %v3938_v56  ;;  %v3941_v44 = vsel %vm3829_vm3, %v3828_v52, %v4907_v12 }
 0xaa3   :  { %3958 = vst.msk [vmem:[%s6640_s10 + $0x78] sm:$0xff] %vm3942_vm4, %v3941_v44 }
 0xaa6   :  { %v4909_v28 = vpop.eup %4908 }
 0xaa7   :  { %v3939_v1 = vsel %vm3829_vm3, %v3826_v21, %v4909_v28 }
 0xaa8   :  { %3956 = vst.msk [vmem:[%s6640_s10 + $0x68] sm:$0xff] %vm3942_vm4, %v3939_v1 }

</bundles_post_ra>
